<compile_context>
chip_gen: v6e
topology: v6e:2x2x1
jax: 0.10.0
libtpu: 0.0.40
codegen_flags: <defaults>
</compile_context>

<pallas_src>
import functools

import jax
import jax.numpy as jnp
from jax import lax
from jax.experimental import pallas as pl
from jax.experimental.pallas import tpu as pltpu


# ------------------------------ Pallas kernel ------------------------------ #

def _kl_step_kernel(p_ref, q_ref, out_ref, *, seg_width, num_seg):
    """One (TM, W) lane-dense tile: fused log-softmax + KL, accumulated."""

    @pl.when(pl.program_id(1) == 0)
    def _init():
        out_ref[...] = jnp.zeros_like(out_ref)

    p = p_ref[...].astype(jnp.float32)             # (TM, W), W = num_seg*seg_width
    q = q_ref[...].astype(jnp.float32)
    tm, w = p.shape

    # Row-wide shift: exact for the KL formula (log-sum-exp identity), keeps
    # exp() in range, and avoids any per-segment (cross-lane) max.
    mp = jnp.max(p, axis=-1, keepdims=True)        # (TM, 1)
    mq = jnp.max(q, axis=-1, keepdims=True)
    ep = jnp.exp(p - mp)                           # lane-dense EUP work
    eq = jnp.exp(q - mq)
    epd = ep * (p - q)

    # Segment-sum matrix S (W, 128): S[c, g] = 1 iff class c belongs to packed
    # distribution g (< num_seg); remaining columns are zero.  Built from 2-D
    # iotas (cheap, (W,128) only).  The three segmented sums then become one
    # MXU matmul each -- the MXU is otherwise idle in this kernel.
    wid = lax.broadcasted_iota(jnp.int32, (w, 128), 0)
    gid = lax.broadcasted_iota(jnp.int32, (w, 128), 1)
    smat = jnp.where((wid >= gid * seg_width) & (wid < (gid + 1) * seg_width),
                     1.0, 0.0).astype(jnp.float32)

    dot = functools.partial(jnp.dot, preferred_element_type=jnp.float32,
                            precision=lax.Precision.HIGHEST)
    sp = dot(ep, smat)                             # (TM, 128): col g < num_seg = sum_c ep
    sq = dot(eq, smat)
    tn = dot(epd, smat)                            # sum_c ep*(p - q)

    # Per packed distribution (valid columns only):
    #   kl_g = t_g/sp_g - log sp_g + log sq_g   (+ mq - mp added per segment below)
    kl_seg = (tn * pl.reciprocal(sp, approx=True)
              - jnp.log(sp) + jnp.log(sq))
    lane = lax.broadcasted_iota(jnp.int32, kl_seg.shape, 1)
    kl_seg = jnp.where(lane < num_seg, kl_seg, 0.0)   # zero (and NaN-free) padding cols

    step_sum = (jnp.sum(kl_seg, axis=0, keepdims=True).sum(axis=1, keepdims=True)
                + jnp.float32(num_seg)
                * jnp.sum(mq - mp, axis=0, keepdims=True))          # (1, 1)

    # Broadcast-add into the resident (8, 128) per-core accumulator block; every
    # entry carries the same running total, element [0,0] is read back outside.
    out_ref[...] += step_sum


# ------------------------------- JAX wrapper -------------------------------- #

def _round_up(x, m):
    return ((x + m - 1) // m) * m


def _default_n_parallel():
    """2 only on chips exposing two TensorCores per device (v4/v5p/v7x)."""
    try:
        dev = jax.devices()[0]
        if dev.platform != "tpu":
            return 1
        kind = dev.device_kind.lower()
    except Exception:
        return 1
    single_tc = any(t in kind for t in ("v2", "v3", "lite", "v5e", "v6e"))
    return 1 if single_tc else 2


def categorical_kl_div_with_free_bits(p_logits, q_logits, *, free_bits,
                                      tm=4096, n_parallel=None):
    """Forward of CategoricalKLDivLossWithFreeBits on TPU via Pallas.

    p_logits, q_logits: (B, L, D, C) logits (f32 or bf16). Returns
    (kl_div, real_kl_div) as f32 scalars.
    """
    assert p_logits.shape == q_logits.shape and p_logits.ndim == 4
    B, L, D, C = p_logits.shape

    if n_parallel is None:
        n_parallel = _default_n_parallel()

    # Lane-dense packing: G whole distributions side by side on the 128-lane
    # axis (C=32 alone would be lane-padded 4x in both DMA and vregs).
    if C % 128 == 0:
        num_seg, width = 1, C
    elif 128 % C == 0:
        num_seg, width = 128 // C, 128
    else:
        num_seg, width = 1, C        # lane-padded fallback for awkward C

    flat = B * L * D * C
    rows = -(-flat // width)

    # Sublane multiple adapts to dtype (8 for f32, 16 for bf16, ...).
    sub = max(8, 32 // jnp.dtype(p_logits.dtype).itemsize)
    per_core = _round_up(-(-rows // n_parallel), sub)
    tm_eff = min(_round_up(tm, sub), per_core)
    chunk = n_parallel * tm_eff
    rows_pad = _round_up(rows, chunk)
    n_steps = rows_pad // chunk

    # Zero-logit padding distributions are uniform-vs-uniform -> KL contribution
    # is exactly 0 (and ~1e-7 for the at-most-one row mixing real/pad segments).
    p1 = p_logits.reshape(flat)
    q1 = q_logits.reshape(flat)
    pad = rows_pad * width - flat
    if pad:
        p1 = jnp.pad(p1, (0, pad))
        q1 = jnp.pad(q1, (0, pad))
    p2 = p1.reshape(rows_pad, width)
    q2 = q1.reshape(rows_pad, width)

    kernel = functools.partial(_kl_step_kernel, seg_width=C, num_seg=num_seg)

    # grid = (n_parallel, n_steps): outer axis shards across TensorCores where
    # available; inner "arbitrary" axis streams double-buffered (tm, W) tiles
    # (~4 MiB of input per step at the defaults).  If a trace ever shows the
    # two input streams exposing DMA, bump pipeline_mode=pl.Buffered(3) here.
    partials = pl.pallas_call(
        kernel,
        out_shape=jax.ShapeDtypeStruct((n_parallel * 8, 128), jnp.float32),
        grid_spec=pltpu.PrefetchScalarGridSpec(
            num_scalar_prefetch=0,
            grid=(n_parallel, n_steps),
            in_specs=[
                pl.BlockSpec((tm_eff, width), lambda c, s: (c * n_steps + s, 0)),
                pl.BlockSpec((tm_eff, width), lambda c, s: (c * n_steps + s, 0)),
            ],
            out_specs=pl.BlockSpec((8, 128), lambda c, s: (c, 0)),
        ),
        compiler_params=pltpu.CompilerParams(
            dimension_semantics=("parallel", "arbitrary"),
            vmem_limit_bytes=40 * 1024 * 1024),
    )(p2, q2)

    # Each core's accumulator block holds identical entries; take [0,0] per core.
    total = jnp.sum(partials.reshape(n_parallel, 8, 128)[:, 0, 0])
    real_kl_div = total / jnp.float32(B * L)
    kl_div = jnp.maximum(jnp.float32(free_bits), real_kl_div)
    return kl_div, real_kl_div


# ---------------------------------- demo ------------------------------------ #

if __name__ == "__main__":
    key = jax.random.PRNGKey(0)
    kp, kq = jax.random.split(key)

    # Small DreamerV3-style shapes: batch B=2, sequence L=8, D=32 categorical
    # latents with C=32 classes each; free_bits = 1.0.
    B, L, D, C = 2, 8, 32, 32
    free_bits = 1.0

    p_logits = jax.random.normal(kp, (B, L, D, C), jnp.float32)
    q_logits = jax.random.normal(kq, (B, L, D, C), jnp.float32)

    fwd = jax.jit(functools.partial(categorical_kl_div_with_free_bits,
                                    free_bits=free_bits))
    kl_div, real_kl_div = jax.block_until_ready(fwd(p_logits, q_logits))

    # Pure-JAX reference (same math as torch.distributions.kl for Categorical).
    lp = jax.nn.log_softmax(p_logits, axis=-1)
    lq = jax.nn.log_softmax(q_logits, axis=-1)
    ref_real = jnp.mean(jnp.sum(jnp.exp(lp) * (lp - lq), axis=(-1, -2)))
    ref_kl = jnp.maximum(jnp.float32(free_bits), ref_real)

    assert kl_div.shape == () and real_kl_div.shape == ()
    assert bool(jnp.isfinite(kl_div)) and bool(jnp.isfinite(real_kl_div))
    assert jnp.allclose(real_kl_div, ref_real, rtol=2e-3, atol=2e-3), (
        real_kl_div, ref_real)
    assert jnp.allclose(kl_div, ref_kl, rtol=2e-3, atol=2e-3), (kl_div, ref_kl)
    print("KERNEL_OK")
</pallas_src>

<mosaic_0001>
module attributes {stable_mosaic.version = 11 : i64} {
  func.func @_kl_step_kernel(%arg0: i32, %arg1: i32, %arg2: memref<128x128xf32, #tpu.memory_space<vmem>>, %arg3: memref<128x128xf32, #tpu.memory_space<vmem>>, %arg4: memref<8x128xf32, #tpu.memory_space<vmem>>) attributes {dimension_semantics = [#tpu.dimension_semantics<parallel>, #tpu.dimension_semantics<arbitrary>], iteration_bounds = array<i64: 1, 1>, scalar_prefetch = 0 : i64, scratch_operands = 0 : i64, tpu.core_type = #tpu.core_type<tc>, window_params = [{transform_indices = @transform_0, window_bounds = array<i64: 128, 128>}, {transform_indices = @transform_1, window_bounds = array<i64: 128, 128>}, {transform_indices = @transform_2, window_bounds = array<i64: 8, 128>}]} {
    %c0_i32 = arith.constant 0 : i32
    %0 = arith.cmpi eq, %arg1, %c0_i32 : i32
    %1 = arith.extui %0 : i1 to i32
    %c0_i32_0 = arith.constant 0 : i32
    %2 = arith.cmpi ne, %1, %c0_i32_0 : i32
    scf.if %2 {
      %cst_20 = arith.constant 0.000000e+00 : f32
      %59 = vector.broadcast %cst_20 : f32 to vector<8x128xf32>
      %c0_21 = arith.constant 0 : index
      %c0_22 = arith.constant 0 : index
      %60 = vector.load %arg4[%c0_21, %c0_22] : memref<8x128xf32, #tpu.memory_space<vmem>>, vector<8x128xf32>
      tpu.vector_store %arg4[%c0_21, %c0_22], %59 {strides = array<i32>} : memref<8x128xf32, #tpu.memory_space<vmem>>, vector<8x128xf32>,
    } else {
    }
    %c0 = arith.constant 0 : index
    %c0_1 = arith.constant 0 : index
    %3 = vector.load %arg2[%c0, %c0_1] : memref<128x128xf32, #tpu.memory_space<vmem>>, vector<128x128xf32>
    %c0_2 = arith.constant 0 : index
    %c0_3 = arith.constant 0 : index
    %4 = vector.load %arg3[%c0_2, %c0_3] : memref<128x128xf32, #tpu.memory_space<vmem>>, vector<128x128xf32>
    %cst = arith.constant dense<0xFF800000> : vector<128xf32>
    %5 = vector.multi_reduction <maximumf>, %3, %cst [1] : vector<128x128xf32> to vector<128xf32>
    %6 = vector.shape_cast %5 : vector<128xf32> to vector<128x1xf32>
    %cst_4 = arith.constant dense<0xFF800000> : vector<128xf32>
    %7 = vector.multi_reduction <maximumf>, %4, %cst_4 [1] : vector<128x128xf32> to vector<128xf32>
    %8 = vector.shape_cast %7 : vector<128xf32> to vector<128x1xf32>
    %9 = vector.broadcast %6 : vector<128x1xf32> to vector<128x128xf32>
    %10 = arith.subf %3, %9 : vector<128x128xf32>
    %11 = math.exp %10 : vector<128x128xf32>
    %12 = vector.broadcast %8 : vector<128x1xf32> to vector<128x128xf32>
    %13 = arith.subf %4, %12 : vector<128x128xf32>
    %14 = math.exp %13 : vector<128x128xf32>
    %15 = arith.subf %3, %4 : vector<128x128xf32>
    %16 = arith.mulf %11, %15 : vector<128x128xf32>
    %17 = tpu.iota {dimensions = array<i32: 0>} : vector<128x128xi32>
    %18 = tpu.iota {dimensions = array<i32: 1>} : vector<128x128xi32>
    %c32_i32 = arith.constant 32 : i32
    %19 = vector.broadcast %c32_i32 : i32 to vector<128x128xi32>
    %20 = arith.muli %18, %19 : vector<128x128xi32>
    %21 = arith.cmpi sge, %17, %20 : vector<128x128xi32>
    %c1_i32 = arith.constant 1 : i32
    %22 = vector.broadcast %c1_i32 : i32 to vector<128x128xi32>
    %23 = arith.addi %18, %22 : vector<128x128xi32>
    %c32_i32_5 = arith.constant 32 : i32
    %24 = vector.broadcast %c32_i32_5 : i32 to vector<128x128xi32>
    %25 = arith.muli %23, %24 : vector<128x128xi32>
    %26 = arith.cmpi slt, %17, %25 : vector<128x128xi32>
    %27 = arith.andi %21, %26 : vector<128x128xi1>
    %cst_6 = arith.constant 1.000000e+00 : f32
    %cst_7 = arith.constant 0.000000e+00 : f32
    %28 = vector.broadcast %cst_6 : f32 to vector<128x128xf32>
    %29 = vector.broadcast %cst_7 : f32 to vector<128x128xf32>
    %30 = arith.select %27, %28, %29 : vector<128x128xi1>, vector<128x128xf32>
    %cst_8 = arith.constant dense<0.000000e+00> : vector<128x128xf32>
    %31 = tpu.matmul %11, %30, %cst_8 {dimension_numbers = #tpu.dot_dimension_numbers<[1], [0], [0], [1], [0, 0, 1, 1], [], []>, precision = #tpu.contract_precision<fp32>} : vector<128x128xf32>, vector<128x128xf32>, vector<128x128xf32> -> vector<128x128xf32>
    %cst_9 = arith.constant dense<0.000000e+00> : vector<128x128xf32>
    %32 = tpu.matmul %14, %30, %cst_9 {dimension_numbers = #tpu.dot_dimension_numbers<[1], [0], [0], [1], [0, 0, 1, 1], [], []>, precision = #tpu.contract_precision<fp32>} : vector<128x128xf32>, vector<128x128xf32>, vector<128x128xf32> -> vector<128x128xf32>
    %cst_10 = arith.constant dense<0.000000e+00> : vector<128x128xf32>
    %33 = tpu.matmul %16, %30, %cst_10 {dimension_numbers = #tpu.dot_dimension_numbers<[1], [0], [0], [1], [0, 0, 1, 1], [], []>, precision = #tpu.contract_precision<fp32>} : vector<128x128xf32>, vector<128x128xf32>, vector<128x128xf32> -> vector<128x128xf32>
    %34 = tpu.reciprocal %31 {approx = true} : vector<128x128xf32> -> vector<128x128xf32>
    %35 = arith.mulf %33, %34 : vector<128x128xf32>
    %36 = math.log %31 : vector<128x128xf32>
    %37 = arith.subf %35, %36 : vector<128x128xf32>
    %38 = math.log %32 : vector<128x128xf32>
    %39 = arith.addf %37, %38 : vector<128x128xf32>
    %40 = tpu.iota {dimensions = array<i32: 1>} : vector<128x128xi32>
    %c4_i32 = arith.constant 4 : i32
    %41 = vector.broadcast %c4_i32 : i32 to vector<128x128xi32>
    %42 = arith.cmpi slt, %40, %41 : vector<128x128xi32>
    %cst_11 = arith.constant 0.000000e+00 : f32
    %43 = vector.broadcast %cst_11 : f32 to vector<128x128xf32>
    %44 = arith.select %42, %39, %43 : vector<128x128xi1>, vector<128x128xf32>
    %cst_12 = arith.constant dense<0.000000e+00> : vector<128xf32>
    %45 = vector.multi_reduction <add>, %44, %cst_12 [0] : vector<128x128xf32> to vector<128xf32>
    %46 = vector.shape_cast %45 : vector<128xf32> to vector<1x128xf32>
    %cst_13 = arith.constant dense<0.000000e+00> : vector<1xf32>
    %47 = vector.multi_reduction <add>, %46, %cst_13 [1] : vector<1x128xf32> to vector<1xf32>
    %48 = vector.shape_cast %47 : vector<1xf32> to vector<1x1xf32>
    %49 = arith.subf %8, %6 : vector<128x1xf32>
    %cst_14 = arith.constant dense<0.000000e+00> : vector<1xf32>
    %50 = vector.multi_reduction <add>, %49, %cst_14 [0] : vector<128x1xf32> to vector<1xf32>
    %51 = vector.shape_cast %50 : vector<1xf32> to vector<1x1xf32>
    %cst_15 = arith.constant 4.000000e+00 : f32
    %52 = vector.broadcast %cst_15 : f32 to vector<1x1xf32>
    %53 = arith.mulf %52, %51 : vector<1x1xf32>
    %54 = arith.addf %48, %53 : vector<1x1xf32>
    %c0_16 = arith.constant 0 : index
    %c0_17 = arith.constant 0 : index
    %55 = vector.load %arg4[%c0_16, %c0_17] : memref<8x128xf32, #tpu.memory_space<vmem>>, vector<8x128xf32>
    %56 = vector.broadcast %54 : vector<1x1xf32> to vector<8x128xf32>
    %57 = arith.addf %55, %56 : vector<8x128xf32>
    %c0_18 = arith.constant 0 : index
    %c0_19 = arith.constant 0 : index
    %58 = vector.load %arg4[%c0_18, %c0_19] : memref<8x128xf32, #tpu.memory_space<vmem>>, vector<8x128xf32>
    tpu.vector_store %arg4[%c0_18, %c0_19], %57 {strides = array<i32>} : memref<8x128xf32, #tpu.memory_space<vmem>>, vector<8x128xf32>,
    return
  }
  func.func @transform_0(%arg0: i32, %arg1: i32) -> (i32, i32) {
    %c1_i32 = arith.constant 1 : i32
    %0 = arith.muli %arg0, %c1_i32 : i32
    %1 = arith.addi %0, %arg1 : i32
    %c0_i32 = arith.constant 0 : i32
    %c0_i32_0 = arith.constant 0 : i32
    return %1, %c0_i32 : i32, i32
  }
  func.func @transform_1(%arg0: i32, %arg1: i32) -> (i32, i32) {
    %c1_i32 = arith.constant 1 : i32
    %0 = arith.muli %arg0, %c1_i32 : i32
    %1 = arith.addi %0, %arg1 : i32
    %c0_i32 = arith.constant 0 : i32
    %c0_i32_0 = arith.constant 0 : i32
    return %1, %c0_i32 : i32, i32
  }
  func.func @transform_2(%arg0: i32, %arg1: i32) -> (i32, i32) {
    %c0_i32 = arith.constant 0 : i32
    %c0_i32_0 = arith.constant 0 : i32
    return %arg0, %c0_i32 : i32, i32
  }
}

</mosaic_0001>

<bundles_post_ra>
// kernel: categorical_kl_div_with_free_bits.1
= control target key start
LH: loop header
LB: loop body
LE: loop exit
PB: predicated region body
PF: predicated region fallthrough
CT: control target
= control target key end

     0   :  { %v284_v0 = vlaneseq  ;;  %v9897_v20 = vmov 0  ;;  %v9625_v21 = vmov 0.0   ;;  %v9900_v23 = vmov 0  ;;  %s9622_s0 = inlined_call_operand.vmem [shape: f32[128,128], index: 0, kind: input, shape index: {}]   ;;  %s9623_s1 = inlined_call_operand.vmem [shape: f32[128,128], index: 1, kind: input, shape index: {}]   ;;  %s9624_s2 = inlined_call_operand.vmem [shape: f32[8,128], index: 2, kind: output, shape index: {}]  }
   0x1   :  { %v6124_v1 = vld [vmem:[%s9622_s0 + $0x10] sm:$0xff]  ;;  %v6129_v2 = vld [vmem:[%s9622_s0] sm:$0xff]  ;;  %v6140_v5 = vld [vmem:[%s9622_s0 + $0x18] sm:$0xff]  ;;  %v9627_v24 = vmov 1.0   ;;  %v9904_v28 = vmov 0  ;;  %v9908_v31 = vmov 0 }
   0x2   :  { %96 = vmax.xlane.f32.xlu1 %v6124_v1  ;;  %92 = vmax.xlane.f32.xlu0 %v6129_v2  ;;  %v6133_v3 = vshrl.u32 %v284_v0, 7  ;;  %v6135_v4 = vand.u32 127, %v284_v0  ;;  %v6145_v6 = vld [vmem:[%s9622_s0 + $0x8] sm:$0xff]  ;;  %v6166_v14 = vld [vmem:[%s9622_s0 + $0x20] sm:$0xff]  ;;  %v6181_v18 = vld [vmem:[%s9622_s0 + $0x38] sm:$0xff]  ;;  %v9925_v54 = vmov 0 }
   0x3   :  { %v6161_v13 = vld [vmem:[%s9622_s0 + $0x28] sm:$0xff]  ;;  %v6186_v19 = vld [vmem:[%s9622_s0 + $0x30] sm:$0xff]  ;;  %v6242_v33 = vld [vmem:[%s9622_s0 + $0x40] sm:$0xff] }
   0x4   :  { %9896 = vst [vmem:[#allocation2_spill] sm:$0xff] %v6135_v4  ;;  %v300_v7 = vadd.s32 120, %v6133_v3  ;;  %v6149_v8 = vmul.u32 32, %v6135_v4  ;;  %v320_v9 = vadd.s32 1, %v6135_v4  ;;  %v299_v10 = vadd.s32 112, %v6133_v3  ;;  %v6237_v32 = vld [vmem:[%s9622_s0 + $0x48] sm:$0xff] }
   0x5   :  { %v298_v12 = vadd.s32 104, %v6133_v3  ;;  %v297_v15 = vadd.s32 96, %v6133_v3  ;;  %v296_v16 = vadd.s32 88, %v6133_v3  ;;  %v295_v17 = vadd.s32 80, %v6133_v3  ;;  %v6302_v49 = vld [vmem:[%s9622_s0 + $0x58] sm:$0xff]  ;;  %v6307_v50 = vld [vmem:[%s9622_s0 + $0x50] sm:$0xff] }
   0x6   :  { %98 = vmax.xlane.f32.xlu1 %v6140_v5  ;;  %94 = vmax.xlane.f32.xlu0 %v6145_v6  ;;  %v6155_v11 = vmul.u32 32, %v320_v9  ;;  %vm319_vm0 = vcmp.ge.s32.totalorder %v300_v7, %v6149_v8  ;;  %vm318_vm2 = vcmp.ge.s32.totalorder %v299_v10, %v6149_v8  ;;  %v294_v25 = vadd.s32 72, %v6133_v3  ;;  %v6355_v63 = vld [vmem:[%s9622_s0 + $0x68] sm:$0xff]  ;;  %v6360_v0 = vld [vmem:[%s9622_s0 + $0x60] sm:$0xff] }
   0x7   :  { %vm317_vm4 = vcmp.ge.s32.totalorder %v298_v12, %v6149_v8  ;;  %vm316_vm8 = vcmp.ge.s32.totalorder %v297_v15, %v6149_v8  ;;  %vm315_vm11 = vcmp.ge.s32.totalorder %v296_v16, %v6149_v8  ;;  %vm314_vm14 = vcmp.ge.s32.totalorder %v295_v17, %v6149_v8 }
   0x8   :  { %vm337_vm1 = vcmp.lt.s32.totalorder %v300_v7, %v6155_v11  ;;  %vm336_vm3 = vcmp.lt.s32.totalorder %v299_v10, %v6155_v11  ;;  %vm335_vm6 = vcmp.lt.s32.totalorder %v298_v12, %v6155_v11  ;;  %vm334_vm10 = vcmp.lt.s32.totalorder %v297_v15, %v6155_v11 }
   0x9   :  { %vm6188_vm5 = vmand %vm319_vm0, %vm337_vm1  ;;  %vm333_vm13 = vcmp.lt.s32.totalorder %v296_v16, %v6155_v11  ;;  %vm332_vm0 = vcmp.lt.s32.totalorder %v295_v17, %v6155_v11  ;;  %v293_v55 = vadd.s32 64, %v6133_v3  ;;  %v292_v62 = vadd.s32 56, %v6133_v3 }
   0xa   :  { %102 = vmax.xlane.f32.xlu1 %v6161_v13  ;;  %100 = vmax.xlane.f32.xlu0 %v6166_v14  ;;  %v9898_v20 = vsel %vm6188_vm5, 4294967295, %v9897_v20  ;;  %v369_v22 = vsel %vm6188_vm5, 1.0, %v9625_v21  ;;  %vm6196_vm7 = vmand %vm318_vm2, %vm336_vm3  ;;  %vm313_vm2 = vcmp.ge.s32.totalorder %v294_v25, %v6149_v8  ;;  %vm331_vm3 = vcmp.lt.s32.totalorder %v294_v25, %v6155_v11 }
   0xb   :  { %9899 = vst [vmem:[#allocation3_spill] sm:$0xff] %v9898_v20  ;;  %v9901_v23 = vsel %vm6196_vm7, 4294967295, %v9900_v23  ;;  %4886 = vmatprep.subr.msk.mxu0 %vm6188_vm5, %v9627_v24  ;;  %v6205_v26 = vsub.f32 %v369_v22, %v369_v22  ;;  %v368_v27 = vsel %vm6196_vm7, 1.0, %v9625_v21  ;;  %vm6212_vm9 = vmand %vm317_vm4, %vm335_vm6  ;;  %vm312_vm6 = vcmp.ge.s32.totalorder %v293_v55, %v6149_v8 }
   0xc   :  { %9902 = vst [vmem:[#allocation4_spill] sm:$0xff] %v9901_v23  ;;  %v9905_v28 = vsel %vm6212_vm9, 4294967295, %v9904_v28  ;;  %4887 = vmatpush3.msk.msra.mxu0 %vm6188_vm5, %v9627_v24  ;;  %v6223_v29 = vsub.f32 %v368_v27, %v368_v27  ;;  %v367_v30 = vsel %vm6212_vm9, 1.0, %v9625_v21  ;;  %vm6228_vm12 = vmand %vm316_vm8, %vm334_vm10  ;;  %vm330_vm8 = vcmp.lt.s32.totalorder %v293_v55, %v6155_v11 }
   0xd   :  { %9903 = vst [vmem:[#allocation5_spill] sm:$0xff] %v6205_v26  ;;  %9906 = vst [vmem:[#allocation6_spill] sm:$0xff] %v9905_v28  ;;  %v9909_v31 = vsel %vm6228_vm12, 4294967295, %v9908_v31  ;;  %v6245_v34 = vand.u32 4294901760, %v6205_v26  ;;  %v6247_v35 = vsub.f32 %v367_v30, %v367_v30  ;;  %v366_v36 = vsel %vm6228_vm12, 1.0, %v9625_v21  ;;  %4888 = vmatprep.subr.msk.mxu0 %vm6196_vm7, %v9627_v24 }
   0xe   :  { %106 = vmax.xlane.f32.xlu1 %v6181_v18  ;;  %104 = vmax.xlane.f32.xlu0 %v6186_v19  ;;  %9907 = vst [vmem:[#allocation7_spill] sm:$0xff] %v6223_v29  ;;  %9910 = vst [vmem:[#allocation8_spill] sm:$0xff] %v9909_v31  ;;  %v6261_v38 = vand.u32 4294901760, %v6223_v29  ;;  %v6263_v39 = vsub.f32 %v366_v36, %v366_v36  ;;  %v9932_v10 = vmov 0  ;;  %v291_v12 = vadd.s32 48, %v6133_v3 }
   0xf   :  { %9911 = vst [vmem:[#allocation9_spill] sm:$0xff] %v6245_v34  ;;  %9912 = vst [vmem:[#allocation10_spill] sm:$0xff] %v6247_v35  ;;  %4889 = vmatpush3.msk.msra.mxu0 %vm6196_vm7, %v9627_v24  ;;  %v598_v42 = vsub.f32 %v6205_v26, %v6245_v34  ;;  %v6279_v43 = vand.u32 4294901760, %v6247_v35  ;;  %v290_v15 = vadd.s32 40, %v6133_v3  ;;  %v289_v30 = vadd.s32 32, %v6133_v3 }
  0x10   :  { %vm6252_vm15 = vmand %vm315_vm11, %vm333_vm13  ;;  %9915 = vst [vmem:[#allocation11_spill] sm:$0xff] %v6261_v38  ;;  %4890 = vmatprep.subr.msk.mxu0 %vm6212_vm9, %v9627_v24  ;;  %v604_v46 = vsub.f32 %v6223_v29, %v6261_v38  ;;  %v6294_v47 = vand.u32 4294901760, %v6263_v39  ;;  %vm311_vm11 = vcmp.ge.s32.totalorder %v292_v62, %v6149_v8  ;;  %vm329_vm13 = vcmp.lt.s32.totalorder %v292_v62, %v6155_v11 }
  0x11   :  { %9916 = vst [vmem:[#allocation12_spill] sm:$0xff] %v6263_v39  ;;  %v365_v40 = vsel %vm6252_vm15, 1.0, %v9625_v21  ;;  %vm6271_vm1 = vmand %vm314_vm14, %vm332_vm0  ;;  %v6309_v51 = vand.u32 4294901760, %v598_v42  ;;  %v610_v52 = vsub.f32 %v6247_v35, %v6279_v43  ;;  %4891 = vmatpush3.msk.msra.mxu0 %vm6212_vm9, %v9627_v24  ;;  %vm310_vm0 = vcmp.ge.s32.totalorder %v291_v12, %v6149_v8  ;;  %v6418_v42 = vld [vmem:[%s9622_s0 + $0x70] sm:$0xff] }
  0x12   :  { %9919 = vst [vmem:[#allocation13_spill] sm:$0xff] %v6279_v43  ;;  %v6281_v44 = vsub.f32 %v365_v40, %v365_v40  ;;  %v364_v45 = vsel %vm6271_vm1, 1.0, %v9625_v21  ;;  %110 = vmax.xlane.f32.xlu1 %v6237_v32  ;;  %108 = vmax.xlane.f32.xlu0 %v6242_v33  ;;  %9921 = vst [vmem:[#allocation15_spill] sm:$0xff] %v6294_v47  ;;  %v6326_v56 = vand.u32 4294901760, %v604_v46  ;;  %v6413_v40 = vld [vmem:[%s9622_s0 + $0x78] sm:$0xff]  ;;  %v288_v62 = vadd.s32 24, %v6133_v3 }
  0x13   :  { %v6296_v48 = vsub.f32 %v364_v45, %v364_v45  ;;  %9923 = vst [vmem:[#allocation17_spill] sm:$0xff] %v6309_v51  ;;  %vm6321_vm4 = vmand %vm313_vm2, %vm331_vm3  ;;  %v616_v57 = vsub.f32 %v6263_v39, %v6294_v47  ;;  %4892 = vmatprep.subr.msk.mxu0 %vm6228_vm12, %v9627_v24  ;;  %4942 = vmatprep.subr.mxu1 %v6309_v51  ;;  %v6348_v61 = vand.u32 4294901760, %v610_v52 }
  0x14   :  { %9920 = vst [vmem:[#allocation14_spill] sm:$0xff] %v6281_v44  ;;  %v6314_v53 = vand.u32 4294901760, %v6281_v44  ;;  %v9926_v54 = vsel %vm6321_vm4, 4294967295, %v9925_v54  ;;  %9927 = vst [vmem:[#allocation19_spill] sm:$0xff] %v6326_v56  ;;  %v363_v59 = vsel %vm6321_vm4, 1.0, %v9625_v21  ;;  %4893 = vmatpush3.msk.msra.mxu0 %vm6228_vm12, %v9627_v24  ;;  %4943 = vmatpush3.msra.mxu1 %v6309_v51  ;;  %vm328_vm2 = vcmp.lt.s32.totalorder %v291_v12, %v6155_v11 }
  0x15   :  { %9922 = vst [vmem:[#allocation16_spill] sm:$0xff] %v6296_v48  ;;  %v6331_v58 = vand.u32 4294901760, %v6296_v48  ;;  %v6340_v60 = vsub.f32 %v363_v59, %v363_v59  ;;  %9930 = vst [vmem:[#allocation22_spill] sm:$0xff] %v6348_v61  ;;  %v6363_v7 = vand.u32 4294901760, %v616_v57  ;;  %4894 = vmatprep.subr.msk.mxu0 %vm6252_vm15, %v9627_v24  ;;  %4944 = vmatprep.subr.mxu1 %v6326_v56 }
  0x16   :  { %9924 = vst [vmem:[#allocation18_spill] sm:$0xff] %v6314_v53  ;;  %114 = vmax.xlane.f32.xlu1 %v6302_v49  ;;  %112 = vmax.xlane.f32.xlu0 %v6307_v50  ;;  %v622_v9 = vsub.f32 %v6281_v44, %v6314_v53  ;;  %vm6367_vm10 = vmand %vm312_vm6, %vm330_vm8  ;;  %vm309_vm3 = vcmp.ge.s32.totalorder %v290_v15, %v6149_v8 }
  0x17   :  { %9928 = vst [vmem:[#allocation20_spill] sm:$0xff] %v6331_v58  ;;  %9929 = vst [vmem:[#allocation21_spill] sm:$0xff] %v6340_v60  ;;  %v9933_v10 = vsel %vm6367_vm10, 4294967295, %v9932_v10  ;;  %v628_v16 = vsub.f32 %v6296_v48, %v6331_v58  ;;  %v362_v17 = vsel %vm6367_vm10, 1.0, %v9625_v21  ;;  %4895 = vmatpush3.msk.msra.mxu0 %vm6252_vm15, %v9627_v24  ;;  %4945 = vmatpush3.msra.mxu1 %v6326_v56  ;;  %v6389_v22 = vand.u32 4294901760, %v6340_v60 }
  0x18   :  { %9931 = vst [vmem:[#allocation23_spill] sm:$0xff] %v6363_v7  ;;  %v6391_v25 = vsub.f32 %v362_v17, %v362_v17  ;;  %vm6393_vm14 = vmand %vm311_vm11, %vm329_vm13  ;;  %4896 = vmatprep.subr.msk.mxu0 %vm6271_vm1, %v9627_v24  ;;  %vm327_vm6 = vcmp.lt.s32.totalorder %v290_v15, %v6155_v11  ;;  %4946 = vmatprep.subr.mxu1 %v6348_v61  ;;  %v6421_v45 = vand.u32 4294901760, %v622_v9  ;;  %v287_v9 = vadd.s32 16, %v6133_v3 }
  0x19   :  { %9934 = vst [vmem:[#allocation24_spill] sm:$0xff] %v6389_v22  ;;  %v361_v36 = vsel %vm6393_vm14, 1.0, %v9625_v21  ;;  %4897 = vmatpush3.msk.msra.mxu0 %vm6271_vm1, %v9627_v24  ;;  %vm6433_vm8 = vmand %vm310_vm0, %vm328_vm2  ;;  %vm308_vm11 = vcmp.ge.s32.totalorder %v289_v30, %v6149_v8  ;;  %4947 = vmatpush3.msra.mxu1 %v6348_v61  ;;  %vm326_vm0 = vcmp.lt.s32.totalorder %v289_v30, %v6155_v11  ;;  %v9950_v61 = vmov 1.0  }
  0x1a   :  { %9935 = vst [vmem:[#allocation25_spill] sm:$0xff] %v6391_v25  ;;  %118 = vmax.xlane.f32.xlu1 %v6355_v63  ;;  %116 = vmax.xlane.f32.xlu0 %v6360_v0  ;;  %9938 = vst [vmem:[#allocation26_spill] sm:$0xff] %v6421_v45  ;;  %v6424_v46 = vand.u32 4294901760, %v6391_v25  ;;  %v6426_v52 = vsub.f32 %v361_v36, %v361_v36  ;;  %v360_v57 = vsel %vm6433_vm8, 1.0, %v9625_v21  ;;  %v77_v36 = vld [vmem:[%s9623_s1 + $0x8] sm:$0xff] }
  0x1b   :  { %4898 = vmatprep.subr.msk.mxu0 %vm6321_vm4, %v9627_v24  ;;  %vm6447_vm13 = vmand %vm309_vm3, %vm327_vm6  ;;  %4948 = vmatprep.subr.mxu1 %v6363_v7  ;;  %v634_v12 = vsub.f32 %v6340_v60, %v6389_v22  ;;  %v6457_v17 = vsub.f32 %v360_v57, %v360_v57  ;;  %vm307_vm3 = vcmp.ge.s32.totalorder %v288_v62, %v6149_v8  ;;  %v76_v57 = vld [vmem:[%s9623_s1] sm:$0xff] }
  0x1c   :  { %9939 = vst [vmem:[#allocation27_spill] sm:$0xff] %v6424_v46  ;;  %9940 = vst [vmem:[#allocation28_spill] sm:$0xff] %v6426_v52  ;;  %4899 = vmatpush3.msk.msra.mxu0 %vm6321_vm4, %v9627_v24  ;;  %v359_v15 = vsel %vm6447_vm13, 1.0, %v9625_v21  ;;  %vm325_vm6 = vcmp.lt.s32.totalorder %v288_v62, %v6155_v11  ;;  %4949 = vmatpush3.msra.mxu1 %v6363_v7  ;;  %v6480_v21 = vand.u32 4294901760, %v628_v16  ;;  %v6485_v4 = vand.u32 4294901760, %v6426_v52 }
  0x1d   :  { %9945 = vst [vmem:[#allocation29_spill] sm:$0xff] %v6457_v17  ;;  %vm6465_vm2 = vmand %vm308_vm11, %vm326_vm0  ;;  %v640_v24 = vsub.f32 %v6391_v25, %v6424_v46  ;;  %4900 = vmatprep.subr.msk.mxu0 %vm6367_vm10, %v9950_v61  ;;  %4950 = vmatprep.subr.mxu1 %v6421_v45  ;;  %v6495_v56 = vsub.f32 %v359_v15, %v359_v15  ;;  %v9954_v16 = vmov 0.0   ;;  %v6506_v51 = vand.u32 4294901760, %v634_v12  ;;  %v79_v12 = vld [vmem:[%s9623_s1 + $0x18] sm:$0xff] }
  0x1e   :  { %122 = vmax.xlane.f32.xlu1 %v6413_v40  ;;  %120 = vmax.xlane.f32.xlu0 %v6418_v42  ;;  %9948 = vst [vmem:[#allocation30_spill] sm:$0xff] %v6480_v21  ;;  %9949 = vst [vmem:[#allocation31_spill] sm:$0xff] %v6485_v4  ;;  %v358_v7 = vsel %vm6465_vm2, 1.0, %v9954_v16  ;;  %vm306_vm0 = vcmp.ge.s32.totalorder %v287_v9, %v6149_v8  ;;  %vm324_vm4 = vcmp.lt.s32.totalorder %v287_v9, %v6155_v11 }
  0x1f   :  { %vm6490_vm11 = vmand %vm307_vm3, %vm325_vm6  ;;  %9953 = vst [vmem:[#allocation32_spill] sm:$0xff] %v6495_v56  ;;  %4901 = vmatpush3.msk.msra.mxu0 %vm6367_vm10, %v9950_v61  ;;  %4951 = vmatpush3.msra.mxu1 %v6421_v45  ;;  %v6509_v46 = vand.u32 4294901760, %v6457_v17  ;;  %v286_v9 = vadd.s32 8, %v6133_v3  ;;  %v78_v45 = vld [vmem:[%s9623_s1 + $0x10] sm:$0xff]  ;;  %v6533_v58 = vsub.f32 %v358_v7, %v358_v7  ;;  %v6542_v53 = vand.u32 4294901760, %v6495_v56 }
  0x20   :  { %9955 = vst [vmem:[#allocation33_spill] sm:$0xff] %v6506_v51  ;;  %4902 = vmatprep.subr.msk.mxu0 %vm6393_vm14, %v9950_v61  ;;  %v357_v15 = vsel %vm6490_vm11, 1.0, %v9954_v16  ;;  %vm6517_vm3 = vmand %vm306_vm0, %vm324_vm4  ;;  %4952 = vmatprep.subr.mxu1 %v6480_v21  ;;  %vm322_vm10 = vcmp.lt.s32.totalorder %v6133_v3, %v6155_v11 }
  0x21   :  { %9956 = vst [vmem:[#allocation34_spill] sm:$0xff] %v6509_v46  ;;  %9960 = vst [vmem:[#allocation36_spill] sm:$0xff] %v6533_v58  ;;  %4903 = vmatpush3.msk.msra.mxu0 %vm6393_vm14, %v9950_v61  ;;  %4953 = vmatpush3.msra.mxu1 %v6480_v21  ;;  %vm305_vm6 = vcmp.ge.s32.totalorder %v286_v9, %v6149_v8  ;;  %vm323_vm0 = vcmp.lt.s32.totalorder %v286_v9, %v6155_v11  ;;  %v356_v21 = vsel %vm6517_vm3, 1.0, %v9954_v16 }
  0x22   :  { %126 = vmax.xlane.f32.xlu1 %v77_v36  ;;  %124 = vmax.xlane.f32.xlu0 %v76_v57  ;;  %v6529_v36 = vand.u32 4294901760, %v640_v24  ;;  %v646_v57 = vsub.f32 %v6426_v52, %v6485_v4  ;;  %9961 = vst [vmem:[#allocation37_spill] sm:$0xff] %v6542_v53  ;;  %v652_v24 = vsub.f32 %v6457_v17, %v6509_v46  ;;  %vm6562_vm4 = vmand %vm305_vm6, %vm323_vm0  ;;  %v81_v46 = vld [vmem:[%s9623_s1 + $0x28] sm:$0xff]  ;;  %v6576_v47 = vand.u32 4294901760, %v6533_v58 }
  0x23   :  { %4904 = vmatprep.subr.msk.mxu0 %vm6433_vm8, %v9950_v61  ;;  %4954 = vmatprep.subr.mxu1 %v6506_v51  ;;  %v6554_v7 = vsub.f32 %v357_v15, %v357_v15  ;;  %v80_v15 = vld [vmem:[%s9623_s1 + $0x20] sm:$0xff]  ;;  %vm9967_vm6 = vcmp.ge.s32.totalorder %v6133_v3, %v6149_v8  ;;  %v355_v11 = vsel %vm6562_vm4, 1.0, %v9954_v16 }
  0x24   :  { %9959 = vst [vmem:[#allocation35_spill] sm:$0xff] %v6529_v36  ;;  %4905 = vmatpush3.msk.msra.mxu0 %vm6433_vm8, %v9950_v61  ;;  %4955 = vmatpush3.msra.mxu1 %v6506_v51  ;;  %v6573_v4 = vand.u32 4294901760, %v646_v57  ;;  %9966 = vst [vmem:[#allocation40_spill] sm:$0xff] %v6576_v47  ;;  %v6594_v57 = vsub.f32 %v356_v21, %v356_v21  ;;  %v6603_v3 = vand.u32 4294901760, %v652_v24  ;;  %v83_v51 = vld [vmem:[%s9623_s1 + $0x38] sm:$0xff]  ;;  %v82_v24 = vld [vmem:[%s9623_s1 + $0x30] sm:$0xff] }
  0x25   :  { %9962 = vst [vmem:[#allocation38_spill] sm:$0xff] %v6554_v7  ;;  %4906 = vmatprep.subr.msk.mxu0 %vm6447_vm13, %v9950_v61  ;;  %vm6587_vm0 = vmand %vm9967_vm6, %vm322_vm10  ;;  %4956 = vmatprep.subr.mxu1 %v6529_v36  ;;  %v6606_v8 = vand.u32 4294901760, %v6554_v7  ;;  %vm10011_vm10 = vnez %v9926_v54  ;;  %vm10014_vm6 = vnez %v9933_v10 }
  0x26   :  { %130 = vmax.xlane.f32.xlu1 %v79_v12  ;;  %128 = vmax.xlane.f32.xlu0 %v78_v45  ;;  %9965 = vst [vmem:[#allocation39_spill] sm:$0xff] %v6573_v4  ;;  %v9968_v45 = vmov 0  ;;  %v658_v12 = vsub.f32 %v6495_v56, %v6542_v53  ;;  %9971 = vst [vmem:[#allocation42_spill] sm:$0xff] %v6594_v57  ;;  %v354_v21 = vsel %vm6587_vm0, 1.0, %v9954_v16  ;;  %v6623_v53 = vsub.f32 %v355_v11, %v355_v11 }
  0x27   :  { %v9969_v45 = vsel %vm6587_vm0, 4294967295, %v9968_v45  ;;  %4907 = vmatpush3.msk.msra.mxu0 %vm6447_vm13, %v9950_v61  ;;  %4957 = vmatpush3.msra.mxu1 %v6529_v36  ;;  %9972 = vst [vmem:[#allocation43_spill] sm:$0xff] %v6603_v3  ;;  %9973 = vst [vmem:[#allocation44_spill] sm:$0xff] %v6606_v8  ;;  %v664_v36 = vsub.f32 %v6533_v58, %v6576_v47  ;;  %v6632_v16 = vand.u32 4294901760, %v6594_v57 }
  0x28   :  { %9970 = vst [vmem:[#allocation41_spill] sm:$0xff] %v9969_v45  ;;  %4908 = vmatprep.subr.msk.mxu0 %vm6465_vm2, %v9950_v61  ;;  %4958 = vmatprep.subr.mxu1 %v6573_v4  ;;  %9974 = vst [vmem:[#allocation45_spill] sm:$0xff] %v6623_v53  ;;  %v6640_v11 = vsub.f32 %v354_v21, %v354_v21  ;;  %v6655_v21 = vand.u32 4294901760, %v6623_v53 }
  0x29   :  { %4909 = vmatpush3.msk.msra.mxu0 %vm6465_vm2, %v9950_v61  ;;  %4959 = vmatpush3.msra.mxu1 %v6573_v4  ;;  %9976 = vst [vmem:[#allocation47_spill] sm:$0xff] %v6632_v16  ;;  %v84_v4 = vld [vmem:[%s9623_s1 + $0x40] sm:$0xff]  ;;  %v6652_v47 = vand.u32 4294901760, %v664_v36 }
  0x2a   :  { %134 = vmax.xlane.f32.xlu1 %v81_v46  ;;  %132 = vmax.xlane.f32.xlu0 %v80_v15  ;;  %v6629_v46 = vand.u32 4294901760, %v658_v12  ;;  %v670_v15 = vsub.f32 %v6554_v7, %v6606_v8  ;;  %9977 = vst [vmem:[#allocation48_spill] sm:$0xff] %v6640_v11  ;;  %v85_v12 = vld [vmem:[%s9623_s1 + $0x48] sm:$0xff]  ;;  %9979 = vst [vmem:[#allocation50_spill] sm:$0xff] %v6655_v21 }
  0x2b   :  { %4910 = vmatprep.subr.msk.mxu0 %vm6490_vm11, %v9950_v61  ;;  %4960 = vmatprep.subr.mxu1 %v6603_v3  ;;  %9978 = vst [vmem:[#allocation49_spill] sm:$0xff] %v6652_v47  ;;  %v10299_v22 = vld [vmem:[#allocation40_spill] sm:$0xff] }
  0x2c   :  { %9975 = vst [vmem:[#allocation46_spill] sm:$0xff] %v6629_v46  ;;  %4911 = vmatpush3.msk.msra.mxu0 %vm6490_vm11, %v9950_v61  ;;  %4961 = vmatpush3.msra.mxu1 %v6603_v3  ;;  %v6667_v36 = vand.u32 4294901760, %v670_v15  ;;  %v87_v3 = vld [vmem:[%s9623_s1 + $0x58] sm:$0xff]  ;;  %v682_v15 = vsub.f32 %v6623_v53, %v6655_v21 }
  0x2d   :  { %4912 = vmatprep.subr.msk.mxu0 %vm6517_vm3, %v9950_v61  ;;  %4962 = vmatprep.subr.mxu1 %v6629_v46 }
  0x2e   :  { %138 = vmax.xlane.f32.xlu1 %v83_v51  ;;  %136 = vmax.xlane.f32.xlu0 %v82_v24  ;;  %v676_v51 = vsub.f32 %v6594_v57, %v6632_v16  ;;  %9980 = vst [vmem:[#allocation51_spill] sm:$0xff] %v6667_v36  ;;  %v6670_v24 = vand.u32 4294901760, %v6640_v11  ;;  %v86_v16 = vld [vmem:[%s9623_s1 + $0x50] sm:$0xff] }
  0x2f   :  { %4913 = vmatpush3.msk.msra.mxu0 %vm6517_vm3, %v9950_v61  ;;  %4963 = vmatpush3.msra.mxu1 %v6629_v46  ;;  %v6706_v46 = vand.u32 4294901760, %v682_v15 }
  0x30   :  { %9981 = vst [vmem:[#allocation52_spill] sm:$0xff] %v6670_v24  ;;  %4914 = vmatprep.subr.msk.mxu0 %vm6562_vm4, %v9950_v61  ;;  %4964 = vmatprep.subr.mxu1 %v6652_v47 }
  0x31   :  { %4915 = vmatpush3.msk.msra.mxu0 %vm6562_vm4, %v9950_v61  ;;  %4965 = vmatpush3.msra.mxu1 %v6652_v47  ;;  %v88_v47 = vld [vmem:[%s9623_s1 + $0x60] sm:$0xff]  ;;  %9983 = vst [vmem:[#allocation54_spill] sm:$0xff] %v6706_v46 }
  0x32   :  { %142 = vmax.xlane.f32.xlu1 %v85_v12  ;;  %140 = vmax.xlane.f32.xlu0 %v84_v4  ;;  %v6688_v4 = vand.u32 4294901760, %v676_v51  ;;  %v688_v12 = vsub.f32 %v6640_v11, %v6670_v24  ;;  %v89_v51 = vld [vmem:[%s9623_s1 + $0x68] sm:$0xff] }
  0x33   :  { %4916 = vmatprep.subr.msk.mxu0 %vm6587_vm0, %v9950_v61  ;;  %4966 = vmatprep.subr.mxu1 %v6667_v36 }
  0x34   :  { %9982 = vst [vmem:[#allocation53_spill] sm:$0xff] %v6688_v4  ;;  %4917 = vmatpush3.msk.msra.mxu0 %vm6587_vm0, %v9950_v61  ;;  %4967 = vmatpush3.msra.mxu1 %v6667_v36  ;;  %v90_v36 = vld [vmem:[%s9623_s1 + $0x70] sm:$0xff] }
  0x35   :  { %4998 = vmatprep.subr.mxu0 %v6205_v26  ;;  %4968 = vmatprep.subr.mxu1 %v6688_v4 }
  0x36   :  { %146 = vmax.xlane.f32.xlu1 %v87_v3  ;;  %144 = vmax.xlane.f32.xlu0 %v86_v16  ;;  %v6711_v3 = vand.u32 4294901760, %v688_v12  ;;  %v91_v16 = vld [vmem:[%s9623_s1 + $0x78] sm:$0xff] }
  0x37   :  { %4969 = vmatpush3.msra.mxu1 %v6688_v4 }
  0x38   :  { %9984 = vst [vmem:[#allocation55_spill] sm:$0xff] %v6711_v3  ;;  %4970 = vmatprep.subr.mxu1 %v6706_v46 }
  0x39   :  { %4971 = vmatpush3.msra.mxu1 %v6706_v46 }
  0x3a   :  { %150 = vmax.xlane.f32.xlu1 %v89_v51  ;;  %148 = vmax.xlane.f32.xlu0 %v88_v47 }
  0x3b   :  { %4972 = vmatprep.subr.mxu1 %v6711_v3 }
  0x3c   :  { %4973 = vmatpush3.msra.mxu1 %v6711_v3 }
  0x3d   :  { %5054 = vmatprep.subr.msk.mxu1 %vm6188_vm5, %v9950_v61 }
  0x3e   :  { %154 = vmax.xlane.f32.xlu1 %v91_v16  ;;  %152 = vmax.xlane.f32.xlu0 %v90_v36 }
  0x8b   :  { %v6726_v47 = vpop.xlane.xlu1 %96  ;;  %v6728_v15 = vpop.xlane.xlu0 %92 }
  0x8c   :  { %v158_v12 = vsub.f32 %v6124_v1, %v6726_v47  ;;  %v156_v51 = vsub.f32 %v6129_v2, %v6728_v15 }
  0x8e   :  { %v176_v46 = vmul.f32 1.442695, %v158_v12  ;;  %v172_v4 = vmul.f32 1.442695, %v156_v51 }
  0x8f   :  { %v6734_v16 = vpop.xlane.xlu1 %98  ;;  %v6736_v36 = vpop.xlane.xlu0 %94 }
  0x90   :  { %5896 = vpow2.f32 %v176_v46  ;;  %v159_v3 = vsub.f32 %v6140_v5, %v6734_v16  ;;  %v157_v24 = vsub.f32 %v6145_v6, %v6736_v36 }
  0x91   :  { %5898 = vpow2.f32 %v172_v4 }
  0x92   :  { %v178_v21 = vmul.f32 1.442695, %v159_v3  ;;  %v174_v8 = vmul.f32 1.442695, %v157_v24 }
  0x93   :  { %v6742_v1 = vpop.xlane.xlu1 %102  ;;  %v6744_v43 = vpop.xlane.xlu0 %100 }
  0x94   :  { %5900 = vpow2.f32 %v178_v21  ;;  %v161_v2 = vsub.f32 %v6161_v13, %v6742_v1  ;;  %v160_v46 = vsub.f32 %v6166_v14, %v6744_v43 }
  0x95   :  { %5902 = vpow2.f32 %v174_v8 }
  0x96   :  { %v182_v12 = vmul.f32 1.442695, %v161_v2  ;;  %v180_v5 = vmul.f32 1.442695, %v160_v46 }
  0x97   :  { %v6750_v51 = vpop.xlane.xlu1 %106  ;;  %v6752_v6 = vpop.xlane.xlu0 %104 }
  0x98   :  { %5904 = vpow2.f32 %v182_v12  ;;  %v163_v24 = vsub.f32 %v6181_v18, %v6750_v51  ;;  %v162_v21 = vsub.f32 %v6186_v19, %v6752_v6 }
  0x99   :  { %5906 = vpow2.f32 %v180_v5 }
  0x9a   :  { %v186_v4 = vmul.f32 1.442695, %v163_v24  ;;  %v184_v13 = vmul.f32 1.442695, %v162_v21 }
  0x9b   :  { %v6758_v3 = vpop.xlane.xlu1 %110  ;;  %v6760_v14 = vpop.xlane.xlu0 %108 }
  0x9c   :  { %5908 = vpow2.f32 %v186_v4  ;;  %v165_v8 = vsub.f32 %v6237_v32, %v6758_v3  ;;  %v164_v2 = vsub.f32 %v6242_v33, %v6760_v14 }
  0x9d   :  { %v6766_v46 = vpop.eup %5896  ;;  %5910 = vpow2.f32 %v184_v13 }
  0x9e   :  { %9985 = vst [vmem:[#allocation56_spill] sm:$0xff] %v6766_v46  ;;  %v6768_v18 = vpop.eup %5898  ;;  %v188_v19 = vmul.f32 1.442695, %v164_v2  ;;  %v6771_v12 = vand.u32 4294901760, %v6766_v46  ;;  %v190_v5 = vmul.f32 1.442695, %v165_v8 }
  0x9f   :  { %9986 = vst [vmem:[#allocation57_spill] sm:$0xff] %v6768_v18  ;;  %v6773_v24 = vpop.xlane.xlu1 %114  ;;  %v6775_v21 = vpop.xlane.xlu0 %112  ;;  %v6778_v4 = vand.u32 4294901760, %v6768_v18 }
  0xa0   :  { %9987 = vst [vmem:[#allocation58_spill] sm:$0xff] %v6771_v12  ;;  %v167_v32 = vsub.f32 %v6302_v49, %v6773_v24  ;;  %v166_v33 = vsub.f32 %v6307_v50, %v6775_v21  ;;  %5912 = vpow2.f32 %v188_v19  ;;  %v6793_v2 = vsub.f32 %v6766_v46, %v6771_v12 }
  0xa1   :  { %9988 = vst [vmem:[#allocation59_spill] sm:$0xff] %v6778_v4  ;;  %v6784_v13 = vpop.eup %5900  ;;  %4974 = vmatprep.mubr.f32.mxu1 %v6778_v4  ;;  %v6789_v8 = vsub.f32 %v6768_v18, %v6778_v4  ;;  %5914 = vpow2.f32 %v190_v5 }
  0xa2   :  { %9989 = vst [vmem:[#allocation60_spill] sm:$0xff] %v6784_v13  ;;  %v6795_v38 = vpop.eup %5902  ;;  %v6798_v49 = vand.u32 4294901760, %v6784_v13  ;;  %v192_v50 = vmul.f32 1.442695, %v166_v33  ;;  %v194_v4 = vmul.f32 1.442695, %v167_v32 }
  0xa3   :  { %9990 = vst [vmem:[#allocation61_spill] sm:$0xff] %v6789_v8  ;;  %9991 = vst [vmem:[#allocation62_spill] sm:$0xff] %v6795_v38  ;;  %v6800_v34 = vpop.xlane.xlu1 %118  ;;  %v6802_v19 = vpop.xlane.xlu0 %116  ;;  %v6805_v11 = vand.u32 4294901760, %v6795_v38  ;;  %v9713_v18 = vand.u32 4294901760, %v6789_v8  ;;  %v9998_v20 = vand.u32 4294901760, %v6793_v2 }
  0xa4   :  { %9992 = vst [vmem:[#allocation63_spill] sm:$0xff] %v6798_v49  ;;  %v168_v46 = vsub.f32 %v6360_v0, %v6802_v19  ;;  %v6823_v32 = vsub.f32 %v6784_v13, %v6798_v49  ;;  %v169_v0 = vsub.f32 %v6355_v63, %v6800_v34  ;;  %5916 = vpow2.f32 %v192_v50 }
  0xa5   :  { %9993 = vst [vmem:[#allocation64_spill] sm:$0xff] %v6805_v11  ;;  %v6810_v53 = vpop.eup %5904  ;;  %4975 = vmatmul.mubr.f32.vlgmr.msra.gmra.mxu1 %v6805_v11  ;;  %v438_v5 = vsub.f32 %v6789_v8, %v9713_v18  ;;  %v6818_v33 = vsub.f32 %v6795_v38, %v6805_v11  ;;  %5918 = vpow2.f32 %v194_v4  ;;  %v458_v23 = vsub.f32 %v6793_v2, %v9998_v20 }
  0xa6   :  { %9994 = vst [vmem:[#allocation65_spill] sm:$0xff] %v6810_v53  ;;  %v6825_v7 = vpop.eup %5906  ;;  %v196_v45 = vmul.f32 1.442695, %v168_v46  ;;  %4977 = vmatprep.mubr.f32.mxu1 %v6771_v12  ;;  %5055 = vmatpush3.msk.msra.mxu1 %vm6188_vm5, %v9950_v61  ;;  %v6834_v18 = vand.u32 4294901760, %v6810_v53  ;;  %v198_v12 = vmul.f32 1.442695, %v169_v0 }
  0xa7   :  { %9995 = vst [vmem:[#allocation66_spill] sm:$0xff] %v6825_v7  ;;  %5056 = vmatprep.subr.msk.mxu1 %vm6196_vm7, %v9950_v61  ;;  %v6839_v57 = vpop.xlane.xlu1 %122  ;;  %v6841_v13 = vpop.xlane.xlu0 %120  ;;  %v439_v63 = vand.u32 4294901760, %v438_v5  ;;  %v6844_v46 = vand.u32 4294901760, %v6825_v7  ;;  %v9726_v38 = vand.u32 4294901760, %v6818_v33 }
  0xa8   :  { %5057 = vmatpush3.msk.msra.mxu1 %vm6196_vm7, %v9950_v61  ;;  %v170_v50 = vsub.f32 %v6418_v42, %v6841_v13  ;;  %5920 = vpow2.f32 %v196_v45  ;;  %v6874_v4 = vsub.f32 %v6810_v53, %v6834_v18  ;;  %v10001_v53 = vand.u32 4294901760, %v6823_v32 }
  0xa9   :  { %9996 = vst [vmem:[#allocation67_spill] sm:$0xff] %v6844_v46  ;;  %v6853_v11 = vpop.eup %5908  ;;  %4918 = vmatprep.mubr.f32.mxu0 %v439_v63  ;;  %4978 = vmatmul.mubr.f32.gmra.mxu1 %v6798_v49  ;;  %v448_v5 = vsub.f32 %v6818_v33, %v9726_v38  ;;  %v6864_v8 = vsub.f32 %v6825_v7, %v6844_v46  ;;  %5922 = vpow2.f32 %v198_v12 }
  0xaa   :  { %9997 = vst [vmem:[#allocation68_spill] sm:$0xff] %v6853_v11  ;;  %v6866_v42 = vpop.eup %5910  ;;  %5058 = vmatprep.subr.msk.mxu1 %vm6212_vm9, %v9950_v61  ;;  %4980 = vmatprep.mubr.f32.mxu1 %v6844_v46  ;;  %v200_v63 = vmul.f32 1.442695, %v170_v50  ;;  %v171_v46 = vsub.f32 %v6413_v40, %v6839_v57  ;;  %v468_v49 = vsub.f32 %v6823_v32, %v10001_v53  ;;  %v459_v40 = vand.u32 4294901760, %v458_v23 }
  0xab   :  { %9999 = vst [vmem:[#allocation69_spill] sm:$0xff] %v6866_v42  ;;  %5059 = vmatpush3.msk.msra.mxu1 %vm6212_vm9, %v9950_v61  ;;  %v6879_v20 = vpop.xlane.xlu1 %126  ;;  %v6881_v38 = vpop.xlane.xlu0 %124  ;;  %v449_v45 = vand.u32 4294901760, %v448_v5  ;;  %v6884_v0 = vand.u32 4294901760, %v6866_v42  ;;  %v6903_v7 = vand.u32 4294901760, %v6853_v11  ;;  %v10002_v28 = vand.u32 4294901760, %v6864_v8 }
  0xac   :  { %10000 = vst [vmem:[#allocation70_spill] sm:$0xff] %v6879_v20  ;;  %5060 = vmatprep.subr.msk.mxu1 %vm6228_vm12, %v9950_v61  ;;  %v4109_v50 = vsub.f32 %v6879_v20, %v6736_v36  ;;  %v4108_v5 = vsub.f32 %v6881_v38, %v6728_v15  ;;  %5924 = vpow2.f32 %v200_v63  ;;  %v202_v53 = vmul.f32 1.442695, %v171_v46 }
  0xad   :  { %5061 = vmatpush3.msk.msra.mxu1 %vm6228_vm12, %v9950_v61  ;;  %4919 = vmatmul.mubr.f32.vlgmr.msra.gmra.mxu0 %v449_v45  ;;  %v478_v36 = vsub.f32 %v6864_v8, %v10002_v28  ;;  %v6908_v20 = vpop.eup %5912  ;;  %v6915_v15 = vsub.f32 %v6866_v42, %v6884_v0  ;;  %v6944_v42 = vsub.f32 %v6853_v11, %v6903_v7 }
  0xae   :  { %10003 = vst [vmem:[#allocation71_spill] sm:$0xff] %v6908_v20  ;;  %4981 = vmatmul.mubr.f32.gmra.mxu1 %v6834_v18  ;;  %4999 = vmatpush3.msra.mxu0 %v6205_v26  ;;  %v4124_v23 = vadd.f32 %v4109_v50, %v4108_v5  ;;  %v6925_v45 = vand.u32 4294901760, %v6908_v20  ;;  %v6927_v26 = vpop.eup %5914  ;;  %v469_v50 = vand.u32 4294901760, %v468_v49  ;;  %5926 = vpow2.f32 %v202_v53 }
  0xaf   :  { %5062 = vmatprep.subr.msk.mxu1 %vm6252_vm15, %v9950_v61  ;;  %4921 = vmatprep.mubr.f32.mxu0 %v459_v40  ;;  %v6920_v28 = vpop.xlane.xlu1 %130  ;;  %v6922_v12 = vpop.xlane.xlu0 %128  ;;  %10006 = vst [vmem:[#allocation74_spill] sm:$0xff] %v6927_v26  ;;  %v479_v46 = vand.u32 4294901760, %v478_v36  ;;  %v6963_v11 = vand.u32 4294901760, %v6927_v26 }
  0xb0   :  { %10004 = vst [vmem:[#allocation72_spill] sm:$0xff] %v6920_v28  ;;  %10005 = vst [vmem:[#allocation73_spill] sm:$0xff] %v6922_v12  ;;  %5000 = vmatprep.subr.mxu0 %v6223_v29  ;;  %5063 = vmatpush3.msk.msra.mxu1 %vm6252_vm15, %v9950_v61  ;;  %v4111_v63 = vsub.f32 %v6920_v28, %v6734_v16  ;;  %v4110_v5 = vsub.f32 %v6922_v12, %v6726_v47  ;;  %v10007_v16 = vand.u32 4294901760, %v6874_v4 }
  0xb1   :  { %5001 = vmatpush3.msra.mxu0 %v6223_v29  ;;  %5064 = vmatprep.subr.msk.mxu1 %vm6271_vm1, %v9950_v61  ;;  %v6953_v29 = vsub.f32 %v6908_v20, %v6925_v45  ;;  %v10009_v28 = vand.u32 4294901760, %v6915_v15  ;;  %v6968_v12 = vpop.eup %5916 }
  0xb2   :  { %4983 = vmatprep.mubr.f32.mxu1 %v6884_v0  ;;  %5002 = vmatprep.subr.mxu0 %v6247_v35  ;;  %v488_v49 = vsub.f32 %v6874_v4, %v10007_v16  ;;  %v4125_v47 = vadd.f32 %v4124_v23, %v4110_v5  ;;  %10010 = vst [vmem:[#allocation76_spill] sm:$0xff] %v6968_v12  ;;  %v6980_v20 = vpop.eup %5918 }
  0xb3   :  { %5065 = vmatpush3.msk.msra.mxu1 %vm6271_vm1, %v9950_v61  ;;  %4922 = vmatmul.mubr.f32.gmra.mxu0 %v469_v50  ;;  %v6958_v36 = vpop.xlane.xlu1 %134  ;;  %v6960_v40 = vpop.xlane.xlu0 %132  ;;  %v498_v16 = vsub.f32 %v6915_v15, %v10009_v28  ;;  %10012 = vst [vmem:[#allocation77_spill] sm:$0xff] %v6980_v20 }
  0xb4   :  { %10008 = vst [vmem:[#allocation75_spill] sm:$0xff] %v6958_v36  ;;  %4984 = vmatmul.mubr.f32.gmra.mxu1 %v6903_v7  ;;  %5003 = vmatpush3.msra.mxu0 %v6247_v35  ;;  %v4113_v23 = vsub.f32 %v6958_v36, %v6742_v1  ;;  %v4126_v5 = vadd.f32 %v4125_v47, %v4111_v63  ;;  %v489_v1 = vand.u32 4294901760, %v488_v49  ;;  %v6996_v47 = vand.u32 4294901760, %v6968_v12 }
  0xb5   :  { %5066 = vmatprep.subr.msk.mxu1 %vm10011_vm10, %v9950_v61  ;;  %4924 = vmatprep.mubr.f32.mxu0 %v479_v46  ;;  %v4112_v28 = vsub.f32 %v6960_v40, %v6744_v43  ;;  %v6987_v50 = vpop.eup %5920  ;;  %v499_v63 = vand.u32 4294901760, %v498_v16  ;;  %v7002_v49 = vsub.f32 %v6927_v26, %v6963_v11  ;;  %v10017_v16 = vand.u32 4294901760, %v6944_v42 }
  0xb6   :  { %5004 = vmatprep.subr.mxu0 %v6263_v39  ;;  %5067 = vmatpush3.msk.msra.mxu1 %vm10011_vm10, %v9950_v61  ;;  %10013 = vst [vmem:[#allocation78_spill] sm:$0xff] %v6987_v50  ;;  %v7025_v36 = vpop.eup %5922 }
  0xb7   :  { %5005 = vmatpush3.msra.mxu0 %v6263_v39  ;;  %5068 = vmatprep.subr.msk.mxu1 %vm10014_vm6, %v9950_v61  ;;  %v4127_v43 = vadd.f32 %v4126_v5, %v4112_v28  ;;  %v6993_v46 = vpop.xlane.xlu1 %138  ;;  %v6998_v35 = vpop.xlane.xlu0 %136  ;;  %v508_v5 = vsub.f32 %v6944_v42, %v10017_v16  ;;  %v7017_v39 = vand.u32 4294901760, %v6980_v20  ;;  %10019 = vst [vmem:[#allocation81_spill] sm:$0xff] %v7025_v36 }
  0xb8   :  { %10015 = vst [vmem:[#allocation79_spill] sm:$0xff] %v6993_v46  ;;  %10016 = vst [vmem:[#allocation80_spill] sm:$0xff] %v6998_v35  ;;  %4986 = vmatprep.mubr.f32.mxu1 %v6925_v45  ;;  %5006 = vmatprep.subr.mxu0 %v6281_v44  ;;  %v4115_v53 = vsub.f32 %v6993_v46, %v6750_v51  ;;  %v4114_v26 = vsub.f32 %v6998_v35, %v6752_v6  ;;  %v10018_v51 = vand.u32 4294901760, %v6953_v29 }
  0xb9   :  { %5069 = vmatpush3.msk.msra.mxu1 %vm10014_vm6, %v9950_v61  ;;  %4925 = vmatmul.mubr.f32.gmra.mxu0 %v489_v1  ;;  %v4128_v28 = vadd.f32 %v4127_v43, %v4113_v23  ;;  %v7033_v1 = vand.u32 4294901760, %v6987_v50  ;;  %v7041_v46 = vpop.eup %5924  ;;  %v7057_v35 = vsub.f32 %v6980_v20, %v7017_v39 }
  0xba   :  { %4987 = vmatmul.mubr.f32.gmra.mxu1 %v6963_v11  ;;  %5007 = vmatpush3.msra.mxu0 %v6281_v44  ;;  %v518_v16 = vsub.f32 %v6953_v29, %v10018_v51  ;;  %v7039_v51 = vsub.f32 %v6968_v12, %v6996_v47  ;;  %10021 = vst [vmem:[#allocation83_spill] sm:$0xff] %v7041_v46 }
  0xbb   :  { %5070 = vmatprep.subr.msk.mxu1 %vm6393_vm14, %v9950_v61  ;;  %4927 = vmatprep.mubr.f32.mxu0 %v499_v63  ;;  %v4129_v6 = vadd.f32 %v4128_v28, %v4114_v26  ;;  %v7030_v23 = vpop.xlane.xlu1 %142  ;;  %v7035_v43 = vpop.xlane.xlu0 %140  ;;  %v509_v26 = vand.u32 4294901760, %v508_v5 }
  0xbc   :  { %10020 = vst [vmem:[#allocation82_spill] sm:$0xff] %v7030_v23  ;;  %5008 = vmatprep.subr.mxu0 %v6296_v48  ;;  %5071 = vmatpush3.msk.msra.mxu1 %vm6393_vm14, %v9950_v61  ;;  %v4117_v63 = vsub.f32 %v7030_v23, %v6758_v3  ;;  %v519_v28 = vand.u32 4294901760, %v518_v16  ;;  %v4116_v44 = vsub.f32 %v7035_v43, %v6760_v14  ;;  %v10022_v3 = vand.u32 4294901760, %v7002_v49  ;;  %v7093_v23 = vpop.eup %5926 }
  0xbd   :  { %5009 = vmatpush3.msra.mxu0 %v6296_v48  ;;  %5072 = vmatprep.subr.msk.mxu1 %vm6433_vm8, %v9950_v61  ;;  %v4130_v12 = vadd.f32 %v4129_v6, %v4115_v53  ;;  %v9761_v48 = vand.u32 4294901760, %v7039_v51  ;;  %v7069_v53 = vand.u32 4294901760, %v7025_v36  ;;  %v7074_v6 = vand.u32 4294901760, %v7041_v46  ;;  %10024 = vst [vmem:[#allocation85_spill] sm:$0xff] %v7093_v23 }
  0xbe   :  { %4989 = vmatprep.mubr.f32.mxu1 %v6996_v47  ;;  %5010 = vmatprep.subr.mxu0 %v6340_v60  ;;  %v528_v5 = vsub.f32 %v7002_v49, %v10022_v3  ;;  %v7080_v3 = vsub.f32 %v6987_v50, %v7033_v1 }
  0xbf   :  { %5073 = vmatpush3.msk.msra.mxu1 %vm6433_vm8, %v9950_v61  ;;  %4928 = vmatmul.mubr.f32.gmra.mxu0 %v509_v26  ;;  %v4131_v14 = vadd.f32 %v4130_v12, %v4116_v44  ;;  %v7071_v16 = vpop.xlane.xlu1 %146  ;;  %v7076_v20 = vpop.xlane.xlu0 %144  ;;  %v538_v44 = vsub.f32 %v7039_v51, %v9761_v48  ;;  %v7112_v50 = vsub.f32 %v7025_v36, %v7069_v53  ;;  %v7127_v36 = vand.u32 4294901760, %v7093_v23 }
  0xc0   :  { %10023 = vst [vmem:[#allocation84_spill] sm:$0xff] %v7071_v16  ;;  %4990 = vmatmul.mubr.f32.gmra.mxu1 %v7017_v39  ;;  %5011 = vmatpush3.msra.mxu0 %v6340_v60  ;;  %v4119_v12 = vsub.f32 %v7071_v16, %v6773_v24  ;;  %v529_v48 = vand.u32 4294901760, %v528_v5  ;;  %v4118_v60 = vsub.f32 %v7076_v20, %v6775_v21 }
  0xc1   :  { %5074 = vmatprep.subr.msk.mxu1 %vm6447_vm13, %v9950_v61  ;;  %4930 = vmatprep.mubr.f32.mxu0 %v519_v28  ;;  %v4132_v26 = vadd.f32 %v4131_v14, %v4117_v63  ;;  %v539_v24 = vand.u32 4294901760, %v538_v44  ;;  %v7116_v21 = vsub.f32 %v7041_v46, %v7074_v6  ;;  %v10025_v44 = vand.u32 4294901760, %v7057_v35 }
  0xc2   :  { %5012 = vmatprep.subr.mxu0 %v6391_v25  ;;  %5075 = vmatpush3.msk.msra.mxu1 %vm6447_vm13, %v9950_v61  ;;  %v10026_v46 = vand.u32 4294901760, %v7080_v3 }
  0xc3   :  { %5013 = vmatpush3.msra.mxu0 %v6391_v25  ;;  %5076 = vmatprep.subr.msk.mxu1 %vm6465_vm2, %v9950_v61  ;;  %v7106_v28 = vpop.xlane.xlu1 %150  ;;  %v7108_v14 = vpop.xlane.xlu0 %148  ;;  %v4133_v5 = vadd.f32 %v4132_v26, %v4118_v60  ;;  %v548_v63 = vsub.f32 %v7057_v35, %v10025_v44  ;;  %v9769_v26 = vand.u32 4294901760, %v7112_v50 }
  0xc4   :  { %4992 = vmatprep.mubr.f32.mxu1 %v7033_v1  ;;  %5014 = vmatprep.subr.mxu0 %v6426_v52  ;;  %v558_v25 = vsub.f32 %v7080_v3, %v10026_v46  ;;  %v4121_v16 = vsub.f32 %v7106_v28, %v6800_v34  ;;  %v7159_v46 = vsub.f32 %v7093_v23, %v7127_v36  ;;  %v10070_v23 = vld [vmem:[#allocation47_spill] sm:$0xff] }
  0xc5   :  { %5077 = vmatpush3.msk.msra.mxu1 %vm6465_vm2, %v9950_v61  ;;  %4931 = vmatmul.mubr.f32.gmra.mxu0 %v529_v48  ;;  %v4134_v60 = vadd.f32 %v4133_v5, %v4119_v12  ;;  %v4120_v48 = vsub.f32 %v7108_v14, %v6802_v19  ;;  %v549_v12 = vand.u32 4294901760, %v548_v63 }
  0xc6   :  { %4993 = vmatmul.mubr.f32.gmra.mxu1 %v7069_v53  ;;  %5015 = vmatpush3.msra.mxu0 %v6426_v52 }
  0xc7   :  { %5078 = vmatprep.subr.msk.mxu1 %vm6490_vm11, %v9950_v61  ;;  %4933 = vmatprep.mubr.f32.mxu0 %v539_v24  ;;  %v7143_v44 = vpop.xlane.xlu1 %154  ;;  %v7145_v34 = vpop.xlane.xlu0 %152  ;;  %v4135_v19 = vadd.f32 %v4134_v60, %v4120_v48  ;;  %v559_v24 = vand.u32 4294901760, %v558_v25  ;;  %v568_v25 = vsub.f32 %v7112_v50, %v9769_v26 }
  0xc8   :  { %5016 = vmatprep.subr.mxu0 %v6457_v17  ;;  %5079 = vmatpush3.msk.msra.mxu1 %vm6490_vm11, %v9950_v61  ;;  %v4123_v5 = vsub.f32 %v7143_v44, %v6839_v57  ;;  %v4122_v48 = vsub.f32 %v7145_v34, %v6841_v13  ;;  %v10027_v57 = vand.u32 4294901760, %v7116_v21  ;;  %v9770_v13 = vand.u32 4294901760, %v7159_v46 }
  0xc9   :  { %5017 = vmatpush3.msra.mxu0 %v6457_v17  ;;  %5080 = vmatprep.subr.msk.mxu1 %vm6517_vm3, %v9950_v61  ;;  %v4136_v60 = vadd.f32 %v4135_v19, %v4121_v16 }
  0xca   :  { %4995 = vmatprep.mubr.f32.mxu1 %v7074_v6  ;;  %5018 = vmatprep.subr.mxu0 %v6495_v56  ;;  %v578_v63 = vsub.f32 %v7116_v21, %v10027_v57 }
  0xcb   :  { %5081 = vmatpush3.msk.msra.mxu1 %vm6517_vm3, %v9950_v61  ;;  %4934 = vmatmul.mubr.f32.gmra.mxu0 %v549_v12  ;;  %v4137_v16 = vadd.f32 %v4136_v60, %v4122_v48  ;;  %v10029_v12 = vld [vmem:[#allocation61_spill] sm:$0xff]  ;;  %v569_v60 = vand.u32 4294901760, %v568_v25  ;;  %v10033_v25 = vand.u32 4294901760, %v6818_v33 }
  0xcc   :  { %4996 = vmatmul.mubr.f32.gmra.mxu1 %v7127_v36  ;;  %5019 = vmatpush3.msra.mxu0 %v6495_v56  ;;  %v10030_v57 = vand.u32 4294901760, %v10029_v12  ;;  %v579_v48 = vand.u32 4294901760, %v578_v63 }
  0xcd   :  { %5082 = vmatprep.subr.msk.mxu1 %vm6562_vm4, %v9950_v61  ;;  %4936 = vmatprep.mubr.f32.mxu0 %v559_v24  ;;  %v7184_v19 = vadd.f32 %v4137_v16, %v4123_v5  ;;  %v10032_v24 = vld [vmem:[#allocation38_spill] sm:$0xff]  ;;  %v588_v5 = vsub.f32 %v7159_v46, %v9770_v13 }
  0xce   :  { %5020 = vmatprep.subr.mxu0 %v6533_v58  ;;  %5083 = vmatpush3.msk.msra.mxu1 %vm6562_vm4, %v9950_v61  ;;  %v10035_v16 = vld [vmem:[#allocation42_spill] sm:$0xff] }
  0xcf   :  { %10028 = vst [vmem:[#allocation86_spill] sm:$0xff] %v7184_v19  ;;  %5086 = vmatprep.mubr.f32.mxu1 %v10030_v57  ;;  %5021 = vmatpush3.msra.mxu0 %v6533_v58  ;;  %v10036_v57 = vand.u32 4294901760, %v6793_v2  ;;  %v10042_v19 = vand.u32 4294901760, %v6864_v8 }
  0xd0   :  { %5084 = vmatprep.subr.msk.mxu1 %vm6587_vm0, %v9950_v61  ;;  %5022 = vmatprep.subr.mxu0 %v10032_v24 }
  0xd1   :  { %5085 = vmatpush3.msk.msra.mxu1 %vm6587_vm0, %v9950_v61  ;;  %4937 = vmatmul.mubr.f32.gmra.mxu0 %v569_v60  ;;  %v589_v60 = vand.u32 4294901760, %v588_v5  ;;  %v10041_v5 = vld [vmem:[#allocation48_spill] sm:$0xff] }
  0xd2   :  { %5023 = vmatpush3.msra.mxu0 %v10032_v24  ;;  %5087 = vmatmul.mubr.f32.vlgmr.msra.gmra.mxu1 %v10033_v25  ;;  %v10038_v25 = vld [vmem:[#allocation45_spill] sm:$0xff] }
  0xd3   :  { %5166 = vmatprep.subr.msk.mxu1 %vm6188_vm5, %v9950_v61  ;;  %4939 = vmatprep.mubr.f32.mxu0 %v579_v48  ;;  %v10039_v48 = vand.u32 4294901760, %v6823_v32 }
  0xd4   :  { %5024 = vmatprep.subr.mxu0 %v10035_v16  ;;  %5089 = vmatprep.mubr.f32.mxu1 %v10036_v57 }
  0xd5   :  { %5167 = vmatpush3.msk.msra.mxu1 %vm6188_vm5, %v9950_v61  ;;  %5025 = vmatpush3.msra.mxu0 %v10035_v16 }
  0xd6   :  { %5168 = vmatprep.subr.msk.mxu1 %vm6196_vm7, %v9950_v61  ;;  %5026 = vmatprep.subr.mxu0 %v10038_v25 }
  0xd7   :  { %5169 = vmatpush3.msk.msra.mxu1 %vm6196_vm7, %v9950_v61  ;;  %4940 = vmatmul.mubr.f32.gmra.mxu0 %v589_v60  ;;  %v10043_v60 = vld [vmem:[#allocation9_spill] sm:$0xff] }
  0xd8   :  { %5027 = vmatpush3.msra.mxu0 %v10038_v25  ;;  %5090 = vmatmul.mubr.f32.gmra.mxu1 %v10039_v48  ;;  %v10046_v48 = vld [vmem:[#allocation11_spill] sm:$0xff] }
  0xd9   :  { %5170 = vmatprep.subr.msk.mxu1 %vm6212_vm9, %v9950_v61  ;;  %5028 = vmatprep.subr.mxu0 %v10041_v5 }
  0xda   :  { %5030 = vmatprep.mubr.f32.mxu0 %v10029_v12  ;;  %5092 = vmatprep.mubr.f32.mxu1 %v10042_v19  ;;  %v10044_v19 = vand.u32 4294901760, %v6874_v4  ;;  %v10045_v12 = vand.u32 4294901760, %v6915_v15 }
  0xdb   :  { %5171 = vmatpush3.msk.msra.mxu1 %vm6212_vm9, %v9950_v61  ;;  %5029 = vmatpush3.msra.mxu0 %v10041_v5 }
  0xdc   :  { %5172 = vmatprep.subr.msk.mxu1 %vm6228_vm12, %v9950_v61  ;;  %5110 = vmatprep.subr.mxu0 %v10043_v60 }
  0xdd   :  { %5173 = vmatpush3.msk.msra.mxu1 %vm6228_vm12, %v9950_v61  ;;  %5031 = vmatmul.mubr.f32.vlgmr.msra.gmra.mxu0 %v6818_v33  ;;  %v10047_v33 = vld [vmem:[#allocation13_spill] sm:$0xff] }
  0xde   :  { %5093 = vmatmul.mubr.f32.gmra.mxu1 %v10044_v19  ;;  %5111 = vmatpush3.msra.mxu0 %v10043_v60  ;;  %v10049_v19 = vand.u32 4294901760, %v6953_v29 }
  0xdf   :  { %5174 = vmatprep.subr.msk.mxu1 %vm6252_vm15, %v9950_v61  ;;  %5033 = vmatprep.mubr.f32.mxu0 %v6793_v2  ;;  %v10048_v2 = vand.u32 4294901760, %v6944_v42 }
  0xe0   :  { %5095 = vmatprep.mubr.f32.mxu1 %v10045_v12  ;;  %5112 = vmatprep.subr.mxu0 %v10046_v48  ;;  %v10050_v12 = vld [vmem:[#allocation15_spill] sm:$0xff] }
  0xe1   :  { %5175 = vmatpush3.msk.msra.mxu1 %vm6252_vm15, %v9950_v61  ;;  %5113 = vmatpush3.msra.mxu0 %v10046_v48 }
  0xe2   :  { %5176 = vmatprep.subr.msk.mxu1 %vm6271_vm1, %v9950_v61  ;;  %5114 = vmatprep.subr.mxu0 %v10047_v33 }
  0xe3   :  { %5177 = vmatpush3.msk.msra.mxu1 %vm6271_vm1, %v9950_v61  ;;  %5034 = vmatmul.mubr.f32.gmra.mxu0 %v6823_v32  ;;  %v10051_v32 = vld [vmem:[#allocation18_spill] sm:$0xff] }
  0xe4   :  { %5096 = vmatmul.mubr.f32.gmra.mxu1 %v10048_v2  ;;  %5115 = vmatpush3.msra.mxu0 %v10047_v33  ;;  %v10053_v2 = vand.u32 4294901760, %v7039_v51 }
  0xe5   :  { %5178 = vmatprep.subr.msk.mxu1 %vm10011_vm10, %v9950_v61  ;;  %5036 = vmatprep.mubr.f32.mxu0 %v6864_v8  ;;  %v10052_v8 = vand.u32 4294901760, %v7002_v49 }
  0xe6   :  { %5098 = vmatprep.mubr.f32.mxu1 %v10049_v19  ;;  %5116 = vmatprep.subr.mxu0 %v10050_v12  ;;  %v10054_v19 = vld [vmem:[#allocation20_spill] sm:$0xff] }
  0xe7   :  { %5179 = vmatpush3.msk.msra.mxu1 %vm10011_vm10, %v9950_v61  ;;  %5117 = vmatpush3.msra.mxu0 %v10050_v12 }
  0xe8   :  { %5180 = vmatprep.subr.msk.mxu1 %vm10014_vm6, %v9950_v61  ;;  %5118 = vmatprep.subr.mxu0 %v10051_v32 }
  0xe9   :  { %5181 = vmatpush3.msk.msra.mxu1 %vm10014_vm6, %v9950_v61  ;;  %5037 = vmatmul.mubr.f32.gmra.mxu0 %v6874_v4  ;;  %v10055_v4 = vld [vmem:[#allocation24_spill] sm:$0xff] }
  0xea   :  { %5099 = vmatmul.mubr.f32.gmra.mxu1 %v10052_v8  ;;  %5119 = vmatpush3.msra.mxu0 %v10051_v32  ;;  %v10057_v8 = vand.u32 4294901760, %v7080_v3 }
  0xeb   :  { %5182 = vmatprep.subr.msk.mxu1 %vm6393_vm14, %v9950_v61  ;;  %5039 = vmatprep.mubr.f32.mxu0 %v6915_v15  ;;  %v10056_v15 = vand.u32 4294901760, %v7057_v35 }
  0xec   :  { %5101 = vmatprep.mubr.f32.mxu1 %v10053_v2  ;;  %5120 = vmatprep.subr.mxu0 %v10054_v19  ;;  %v10058_v2 = vld [vmem:[#allocation27_spill] sm:$0xff] }
  0xed   :  { %5183 = vmatpush3.msk.msra.mxu1 %vm6393_vm14, %v9950_v61  ;;  %5121 = vmatpush3.msra.mxu0 %v10054_v19 }
  0xee   :  { %5184 = vmatprep.subr.msk.mxu1 %vm6433_vm8, %v9950_v61  ;;  %5122 = vmatprep.subr.mxu0 %v10055_v4 }
  0xef   :  { %5185 = vmatpush3.msk.msra.mxu1 %vm6433_vm8, %v9950_v61  ;;  %5040 = vmatmul.mubr.f32.gmra.mxu0 %v6944_v42  ;;  %v10059_v42 = vld [vmem:[#allocation31_spill] sm:$0xff] }
  0xf0   :  { %5102 = vmatmul.mubr.f32.gmra.mxu1 %v10056_v15  ;;  %5123 = vmatpush3.msra.mxu0 %v10055_v4  ;;  %v10061_v15 = vand.u32 4294901760, %v7116_v21 }
  0xf1   :  { %5186 = vmatprep.subr.msk.mxu1 %vm6447_vm13, %v9950_v61  ;;  %5042 = vmatprep.mubr.f32.mxu0 %v6953_v29  ;;  %v10060_v29 = vand.u32 4294901760, %v7112_v50 }
  0xf2   :  { %5104 = vmatprep.mubr.f32.mxu1 %v10057_v8  ;;  %5124 = vmatprep.subr.mxu0 %v10058_v2  ;;  %v10062_v8 = vld [vmem:[#allocation34_spill] sm:$0xff] }
  0xf3   :  { %5187 = vmatpush3.msk.msra.mxu1 %vm6447_vm13, %v9950_v61  ;;  %5125 = vmatpush3.msra.mxu0 %v10058_v2 }
  0xf4   :  { %5188 = vmatprep.subr.msk.mxu1 %vm6465_vm2, %v9950_v61  ;;  %5126 = vmatprep.subr.mxu0 %v10059_v42 }
  0xf5   :  { %5189 = vmatpush3.msk.msra.mxu1 %vm6465_vm2, %v9950_v61  ;;  %5043 = vmatmul.mubr.f32.gmra.mxu0 %v7002_v49  ;;  %v10063_v49 = vld [vmem:[#allocation37_spill] sm:$0xff] }
  0xf6   :  { %5105 = vmatmul.mubr.f32.gmra.mxu1 %v10060_v29  ;;  %5127 = vmatpush3.msra.mxu0 %v10059_v42  ;;  %v10065_v29 = vld [vmem:[#allocation40_spill] sm:$0xff] }
  0xf7   :  { %5190 = vmatprep.subr.msk.mxu1 %vm6490_vm11, %v9950_v61  ;;  %5045 = vmatprep.mubr.f32.mxu0 %v7039_v51  ;;  %v10064_v51 = vand.u32 4294901760, %v7159_v46 }
  0xf8   :  { %5107 = vmatprep.mubr.f32.mxu1 %v10061_v15  ;;  %5128 = vmatprep.subr.mxu0 %v10062_v8  ;;  %v10066_v15 = vld [vmem:[#allocation59_spill] sm:$0xff] }
  0xf9   :  { %5191 = vmatpush3.msk.msra.mxu1 %vm6490_vm11, %v9950_v61  ;;  %5129 = vmatpush3.msra.mxu0 %v10062_v8  ;;  %v10073_v8 = vld [vmem:[#allocation50_spill] sm:$0xff] }
  0xfa   :  { %5192 = vmatprep.subr.msk.mxu1 %vm6517_vm3, %v9950_v61  ;;  %5130 = vmatprep.subr.mxu0 %v10063_v49 }
  0xfb   :  { %5193 = vmatpush3.msk.msra.mxu1 %vm6517_vm3, %v9950_v61  ;;  %5046 = vmatmul.mubr.f32.gmra.mxu0 %v7057_v35  ;;  %v10067_v35 = vld [vmem:[#allocation44_spill] sm:$0xff] }
  0xfc   :  { %5108 = vmatmul.mubr.f32.gmra.mxu1 %v10064_v51  ;;  %5131 = vmatpush3.msra.mxu0 %v10063_v49  ;;  %v10069_v51 = vld [vmem:[#allocation17_spill] sm:$0xff]  ;;  %v10072_v49 = vld [vmem:[#allocation19_spill] sm:$0xff] }
  0xfd   :  { %5194 = vmatprep.subr.msk.mxu1 %vm6562_vm4, %v9950_v61  ;;  %5048 = vmatprep.mubr.f32.mxu0 %v7080_v3  ;;  %v10068_v3 = vld [vmem:[#allocation64_spill] sm:$0xff] }
  0xfe   :  { %5132 = vmatprep.subr.mxu0 %v10065_v29  ;;  %5195 = vmatpush3.msk.msra.mxu1 %vm6562_vm4, %v9950_v61 }
  0xff   :  { %5198 = vmatprep.mubr.f32.mxu1 %v10066_v15  ;;  %5133 = vmatpush3.msra.mxu0 %v10065_v29  ;;  %v10071_v29 = vld [vmem:[#allocation58_spill] sm:$0xff] }
 0x100   :  { %5196 = vmatprep.subr.msk.mxu1 %vm6587_vm0, %v9950_v61  ;;  %5134 = vmatprep.subr.mxu0 %v10067_v35 }
 0x101   :  { %5197 = vmatpush3.msk.msra.mxu1 %vm6587_vm0, %v9950_v61  ;;  %5049 = vmatmul.mubr.f32.gmra.mxu0 %v7112_v50  ;;  %v10074_v50 = vld [vmem:[#allocation63_spill] sm:$0xff] }
 0x102   :  { %5135 = vmatpush3.msra.mxu0 %v10067_v35  ;;  %5199 = vmatmul.mubr.f32.vlgmr.msra.gmra.mxu1 %v10068_v3  ;;  %v10076_v35 = vld [vmem:[#allocation52_spill] sm:$0xff] }
 0x103   :  { %5278 = vmatprep.subr.mxu1 %v10069_v51  ;;  %5051 = vmatprep.mubr.f32.mxu0 %v7116_v21  ;;  %v10075_v21 = vld [vmem:[#allocation22_spill] sm:$0xff] }
 0x104   :  { %5136 = vmatprep.subr.mxu0 %v10070_v23  ;;  %5201 = vmatprep.mubr.f32.mxu1 %v10071_v29 }
 0x105   :  { %5279 = vmatpush3.msra.mxu1 %v10069_v51  ;;  %5137 = vmatpush3.msra.mxu0 %v10070_v23  ;;  %v10077_v51 = vld [vmem:[#allocation67_spill] sm:$0xff] }
 0x106   :  { %5280 = vmatprep.subr.mxu1 %v10072_v49  ;;  %5138 = vmatprep.subr.mxu0 %v10073_v8  ;;  %v10078_v23 = vld [vmem:[#allocation23_spill] sm:$0xff] }
 0x107   :  { %5281 = vmatpush3.msra.mxu1 %v10072_v49  ;;  %5052 = vmatmul.mubr.f32.gmra.mxu0 %v7159_v46  ;;  %v10079_v46 = vld [vmem:[#allocation26_spill] sm:$0xff]  ;;  %v10083_v49 = vld [vmem:[#allocation33_spill] sm:$0xff] }
 0x108   :  { %5139 = vmatpush3.msra.mxu0 %v10073_v8  ;;  %5202 = vmatmul.mubr.f32.gmra.mxu1 %v10074_v50 }
 0x109   :  { %5282 = vmatprep.subr.mxu1 %v10075_v21  ;;  %5140 = vmatprep.subr.mxu0 %v10076_v35 }
 0x10a   :  { %5142 = vmatprep.mubr.f32.mxu0 %v10066_v15  ;;  %5204 = vmatprep.mubr.f32.mxu1 %v10077_v51  ;;  %v6056_v15 = vld [vmem:[%s9623_s1] sm:$0xff] }
 0x10b   :  { %5283 = vmatpush3.msra.mxu1 %v10075_v21  ;;  %5141 = vmatpush3.msra.mxu0 %v10076_v35  ;;  %v204_v35 = vsub.f32 %v6056_v15, %v6881_v38  ;;  %v6057_v38 = vld [vmem:[%s9623_s1 + $0x8] sm:$0xff]  ;;  %v10082_v21 = vld [vmem:[#allocation73_spill] sm:$0xff] }
 0x10c   :  { %5284 = vmatprep.subr.mxu1 %v10078_v23  ;;  %5222 = vmatprep.subr.msk.mxu0 %vm6188_vm5, %v9950_v61 }
 0x10d   :  { %5285 = vmatpush3.msra.mxu1 %v10078_v23  ;;  %5143 = vmatmul.mubr.f32.vlgmr.msra.gmra.mxu0 %v10068_v3  ;;  %v10080_v3 = vld [vmem:[#allocation30_spill] sm:$0xff]  ;;  %v6058_v23 = vld [vmem:[%s9623_s1 + $0x10] sm:$0xff] }
 0x10e   :  { %5205 = vmatmul.mubr.f32.gmra.mxu1 %v6834_v18  ;;  %5223 = vmatpush3.msk.msra.mxu0 %vm6188_vm5, %v9950_v61  ;;  %v206_v8 = vsub.f32 %v6058_v23, %v10082_v21  ;;  %v6059_v23 = vld [vmem:[%s9623_s1 + $0x18] sm:$0xff] }
 0x10f   :  { %5286 = vmatprep.subr.mxu1 %v10079_v46  ;;  %5145 = vmatprep.mubr.f32.mxu0 %v10071_v29  ;;  %v10081_v29 = vld [vmem:[#allocation70_spill] sm:$0xff] }
 0x110   :  { %5207 = vmatprep.mubr.f32.mxu1 %v6884_v0  ;;  %5224 = vmatprep.subr.msk.mxu0 %vm6196_vm7, %v9950_v61  ;;  %v205_v15 = vsub.f32 %v6057_v38, %v10081_v29  ;;  %v224_v38 = vmul.f32 1.442695, %v206_v8  ;;  %v10087_v8 = vld [vmem:[#allocation43_spill] sm:$0xff] }
 0x111   :  { %5287 = vmatpush3.msra.mxu1 %v10079_v46  ;;  %5225 = vmatpush3.msk.msra.mxu0 %vm6196_vm7, %v9950_v61  ;;  %v220_v46 = vmul.f32 1.442695, %v204_v35 }
 0x112   :  { %5288 = vmatprep.subr.mxu1 %v10080_v3  ;;  %5226 = vmatprep.subr.msk.mxu0 %vm6212_vm9, %v9950_v61  ;;  %v222_v35 = vmul.f32 1.442695, %v205_v15  ;;  %v10086_v15 = vld [vmem:[#allocation39_spill] sm:$0xff] }
 0x113   :  { %5289 = vmatpush3.msra.mxu1 %v10080_v3  ;;  %5146 = vmatmul.mubr.f32.gmra.mxu0 %v10074_v50  ;;  %5928 = vpow2.f32 %v220_v46  ;;  %v10084_v50 = vld [vmem:[#allocation35_spill] sm:$0xff]  ;;  %v6060_v46 = vld [vmem:[%s9623_s1 + $0x20] sm:$0xff] }
 0x114   :  { %5208 = vmatmul.mubr.f32.gmra.mxu1 %v6903_v7  ;;  %5227 = vmatpush3.msk.msra.mxu0 %vm6212_vm9, %v9950_v61  ;;  %5930 = vpow2.f32 %v222_v35  ;;  %v208_v29 = vsub.f32 %v6060_v46, %v6960_v40  ;;  %v10088_v40 = vld [vmem:[#allocation75_spill] sm:$0xff]  ;;  %v10090_v46 = vld [vmem:[#allocation46_spill] sm:$0xff] }
 0x115   :  { %5290 = vmatprep.subr.mxu1 %v10083_v49  ;;  %5148 = vmatprep.mubr.f32.mxu0 %v10077_v51  ;;  %v10085_v51 = vld [vmem:[#allocation72_spill] sm:$0xff]  ;;  %5932 = vpow2.f32 %v224_v38 }
 0x116   :  { %5210 = vmatprep.mubr.f32.mxu1 %v6925_v45  ;;  %5228 = vmatprep.subr.msk.mxu0 %vm6228_vm12, %v9950_v61  ;;  %v207_v21 = vsub.f32 %v6059_v23, %v10085_v51  ;;  %v228_v23 = vmul.f32 1.442695, %v208_v29  ;;  %v6062_v51 = vld [vmem:[%s9623_s1 + $0x30] sm:$0xff]  ;;  %v10091_v29 = vld [vmem:[#allocation49_spill] sm:$0xff] }
 0x117   :  { %5291 = vmatpush3.msra.mxu1 %v10083_v49  ;;  %5229 = vmatpush3.msk.msra.mxu0 %vm6228_vm12, %v9950_v61 }
 0x118   :  { %5292 = vmatprep.subr.mxu1 %v10084_v50  ;;  %5230 = vmatprep.subr.msk.mxu0 %vm6252_vm15, %v9950_v61 }
 0x119   :  { %5293 = vmatpush3.msra.mxu1 %v10084_v50  ;;  %5149 = vmatmul.mubr.f32.gmra.mxu0 %v6834_v18  ;;  %v226_v18 = vmul.f32 1.442695, %v207_v21  ;;  %v10089_v21 = vld [vmem:[#allocation80_spill] sm:$0xff]  ;;  %v10105_v50 = vld [vmem:[#allocation5_spill] sm:$0xff] }
 0x11a   :  { %5211 = vmatmul.mubr.f32.gmra.mxu1 %v6963_v11  ;;  %5231 = vmatpush3.msk.msra.mxu0 %vm6252_vm15, %v9950_v61  ;;  %v210_v38 = vsub.f32 %v6062_v51, %v10089_v21  ;;  %v10093_v21 = vld [vmem:[#allocation51_spill] sm:$0xff] }
 0x11b   :  { %5294 = vmatprep.subr.mxu1 %v10086_v15  ;;  %5151 = vmatprep.mubr.f32.mxu0 %v6884_v0  ;;  %v6061_v0 = vld [vmem:[%s9623_s1 + $0x28] sm:$0xff]  ;;  %5934 = vpow2.f32 %v226_v18  ;;  %v6063_v18 = vld [vmem:[%s9623_s1 + $0x38] sm:$0xff] }
 0x11c   :  { %5213 = vmatprep.mubr.f32.mxu1 %v6996_v47  ;;  %5232 = vmatprep.subr.msk.mxu0 %vm6271_vm1, %v9950_v61  ;;  %v209_v35 = vsub.f32 %v6061_v0, %v10088_v40  ;;  %5936 = vpow2.f32 %v228_v23  ;;  %v10092_v0 = vld [vmem:[#allocation79_spill] sm:$0xff]  ;;  %v6064_v23 = vld [vmem:[%s9623_s1 + $0x40] sm:$0xff] }
 0x11d   :  { %5295 = vmatpush3.msra.mxu1 %v10086_v15  ;;  %5233 = vmatpush3.msk.msra.mxu0 %vm6271_vm1, %v9950_v61  ;;  %v211_v40 = vsub.f32 %v6063_v18, %v10092_v0  ;;  %v212_v51 = vsub.f32 %v6064_v23, %v7035_v43  ;;  %v10094_v18 = vld [vmem:[#allocation53_spill] sm:$0xff]  ;;  %v10095_v0 = vld [vmem:[#allocation82_spill] sm:$0xff] }
 0x11e   :  { %5296 = vmatprep.subr.mxu1 %v10087_v8  ;;  %5234 = vmatprep.subr.msk.mxu0 %vm10011_vm10, %v9950_v61 }
 0x11f   :  { %5297 = vmatpush3.msra.mxu1 %v10087_v8  ;;  %5152 = vmatmul.mubr.f32.gmra.mxu0 %v6903_v7  ;;  %v230_v7 = vmul.f32 1.442695, %v209_v35  ;;  %v232_v35 = vmul.f32 1.442695, %v210_v38 }
 0x120   :  { %5214 = vmatmul.mubr.f32.gmra.mxu1 %v7017_v39  ;;  %5235 = vmatpush3.msk.msra.mxu0 %vm10011_vm10, %v9950_v61 }
 0x121   :  { %5298 = vmatprep.subr.mxu1 %v10090_v46  ;;  %5154 = vmatprep.mubr.f32.mxu0 %v6925_v45  ;;  %v5929_v45 = vpop.eup %5928  ;;  %5938 = vpow2.f32 %v230_v7  ;;  %v234_v7 = vmul.f32 1.442695, %v211_v40 }
 0x122   :  { %5216 = vmatprep.mubr.f32.mxu1 %v7033_v1  ;;  %5236 = vmatprep.subr.msk.mxu0 %vm10014_vm6, %v9950_v61  ;;  %v5931_v38 = vpop.eup %5930  ;;  %5940 = vpow2.f32 %v232_v35  ;;  %v236_v35 = vmul.f32 1.442695, %v212_v51  ;;  %v6066_v51 = vld [vmem:[%s9623_s1 + $0x50] sm:$0xff] }
 0x123   :  { %5299 = vmatpush3.msra.mxu1 %v10090_v46  ;;  %5237 = vmatpush3.msk.msra.mxu0 %vm10014_vm6, %v9950_v61  ;;  %v5933_v43 = vpop.eup %5932  ;;  %v7540_v23 = vand.u32 4294901760, %v5931_v38  ;;  %5942 = vpow2.f32 %v234_v7 }
 0x124   :  { %5300 = vmatprep.subr.mxu1 %v10091_v29  ;;  %5238 = vmatprep.subr.msk.mxu0 %vm6393_vm14, %v9950_v61  ;;  %5944 = vpow2.f32 %v236_v35  ;;  %v10098_v35 = vld [vmem:[#allocation84_spill] sm:$0xff] }
 0x125   :  { %5301 = vmatpush3.msra.mxu1 %v10091_v29  ;;  %5155 = vmatmul.mubr.f32.gmra.mxu0 %v6963_v11  ;;  %v7524_v11 = vand.u32 4294901760, %v5929_v45  ;;  %v7566_v7 = vsub.f32 %v5931_v38, %v7540_v23 }
 0x126   :  { %5217 = vmatmul.mubr.f32.gmra.mxu1 %v7069_v53  ;;  %5239 = vmatpush3.msk.msra.mxu0 %vm6393_vm14, %v9950_v61 }
 0x127   :  { %5302 = vmatprep.subr.mxu1 %v10093_v21  ;;  %5157 = vmatprep.mubr.f32.mxu0 %v6996_v47  ;;  %v6065_v47 = vld [vmem:[%s9623_s1 + $0x48] sm:$0xff] }
 0x128   :  { %5219 = vmatprep.mubr.f32.mxu1 %v7074_v6  ;;  %5240 = vmatprep.subr.msk.mxu0 %vm6433_vm8, %v9950_v61  ;;  %v213_v40 = vsub.f32 %v6065_v47, %v10095_v0  ;;  %v214_v47 = vsub.f32 %v6066_v51, %v7076_v20  ;;  %v10096_v0 = vld [vmem:[#allocation54_spill] sm:$0xff]  ;;  %v10097_v20 = vld [vmem:[#allocation55_spill] sm:$0xff] }
 0x129   :  { %5303 = vmatpush3.msra.mxu1 %v10093_v21  ;;  %5241 = vmatpush3.msk.msra.mxu0 %vm6433_vm8, %v9950_v61  ;;  %v7547_v21 = vsub.f32 %v5929_v45, %v7524_v11 }
 0x12a   :  { %5304 = vmatprep.subr.mxu1 %v10094_v18  ;;  %5242 = vmatprep.subr.msk.mxu0 %vm6447_vm13, %v9950_v61  ;;  %v238_v45 = vmul.f32 1.442695, %v213_v40  ;;  %v6067_v40 = vld [vmem:[%s9623_s1 + $0x58] sm:$0xff]  ;;  %v240_v29 = vmul.f32 1.442695, %v214_v47  ;;  %v6068_v47 = vld [vmem:[%s9623_s1 + $0x60] sm:$0xff] }
 0x12b   :  { %5305 = vmatpush3.msra.mxu1 %v10094_v18  ;;  %5158 = vmatmul.mubr.f32.gmra.mxu0 %v7017_v39  ;;  %v7555_v39 = vand.u32 4294901760, %v5933_v43  ;;  %v5935_v18 = vpop.eup %5934  ;;  %v9790_v51 = vand.u32 4294901760, %v7547_v21 }
 0x12c   :  { %5220 = vmatmul.mubr.f32.gmra.mxu1 %v7127_v36  ;;  %5243 = vmatpush3.msk.msra.mxu0 %vm6447_vm13, %v9950_v61  ;;  %v7579_v38 = vand.u32 4294901760, %v5935_v18  ;;  %5946 = vpow2.f32 %v238_v45 }
 0x12d   :  { %5306 = vmatprep.subr.mxu1 %v10096_v0  ;;  %5160 = vmatprep.mubr.f32.mxu0 %v7033_v1  ;;  %v5937_v1 = vpop.eup %5936  ;;  %v7582_v46 = vsub.f32 %v5933_v43, %v7555_v39  ;;  %5948 = vpow2.f32 %v240_v29 }
 0x12e   :  { %5244 = vmatprep.subr.msk.mxu0 %vm6465_vm2, %v9950_v61  ;;  %5307 = vmatpush3.msra.mxu1 %v10096_v0  ;;  %v215_v0 = vsub.f32 %v6067_v40, %v10098_v35  ;;  %10099 = vst [vmem:[#allocation61_spill] sm:$0xff] %v7579_v38  ;;  %v216_v40 = vsub.f32 %v6068_v47, %v7108_v14  ;;  %v5939_v35 = vpop.eup %5938 }
 0x12f   :  { %5245 = vmatpush3.msk.msra.mxu0 %vm6465_vm2, %v9950_v61  ;;  %5308 = vmatprep.subr.mxu1 %v10097_v20  ;;  %v1628_v14 = vsub.f32 %v7547_v21, %v9790_v51  ;;  %v7616_v47 = vsub.f32 %v5935_v18, %v7579_v38  ;;  %v5941_v43 = vpop.eup %5940  ;;  %v6069_v51 = vld [vmem:[%s9623_s1 + $0x68] sm:$0xff]  ;;  %v10101_v18 = vand.u32 4294901760, %v7566_v7 }
 0x130   :  { %5246 = vmatprep.subr.msk.mxu0 %vm6490_vm11, %v9950_v61  ;;  %5309 = vmatpush3.msra.mxu1 %v10097_v20  ;;  %v242_v45 = vmul.f32 1.442695, %v215_v0  ;;  %v217_v29 = vsub.f32 %v6069_v51, %v7106_v28  ;;  %v244_v0 = vmul.f32 1.442695, %v216_v40  ;;  %v7633_v20 = vand.u32 4294901760, %v5939_v35  ;;  %v6070_v51 = vld [vmem:[%s9623_s1 + $0x70] sm:$0xff]  ;;  %v5943_v8 = vpop.eup %5942 }
 0x131   :  { %5310 = vmatprep.mubr.f32.mxu1 %v7524_v11  ;;  %5161 = vmatmul.mubr.f32.gmra.mxu0 %v7069_v53  ;;  %v7596_v53 = vand.u32 4294901760, %v5937_v1  ;;  %v218_v40 = vsub.f32 %v6070_v51, %v7145_v34  ;;  %v7683_v49 = vand.u32 4294901760, %v5943_v8 }
 0x132   :  { %5247 = vmatpush3.msk.msra.mxu0 %vm6490_vm11, %v9950_v61  ;;  %5311 = vmatmul.mubr.f32.vlgmr.msra.gmra.mxu1 %v7540_v23  ;;  %10102 = vst [vmem:[#allocation59_spill] sm:$0xff] %v7633_v20  ;;  %5950 = vpow2.f32 %v242_v45  ;;  %v246_v15 = vmul.f32 1.442695, %v217_v29  ;;  %v5945_v29 = vpop.eup %5944 }
 0x133   :  { %5390 = vmatprep.subr.msk.mxu1 %vm6188_vm5, %v9950_v61  ;;  %5163 = vmatprep.mubr.f32.mxu0 %v7074_v6  ;;  %10100 = vst [vmem:[#allocation41_spill] sm:$0xff] %v7596_v53  ;;  %v1638_v6 = vsub.f32 %v7566_v7, %v10101_v18  ;;  %v7636_v28 = vsub.f32 %v5937_v1, %v7596_v53  ;;  %v10103_v1 = vand.u32 4294901760, %v7582_v46  ;;  %v7655_v18 = vand.u32 4294901760, %v5941_v43 }
 0x134   :  { %5248 = vmatprep.subr.msk.mxu0 %vm6517_vm3, %v9950_v61  ;;  %5391 = vmatpush3.msk.msra.mxu1 %vm6188_vm5, %v9950_v61  ;;  %5952 = vpow2.f32 %v244_v0  ;;  %v248_v51 = vmul.f32 1.442695, %v218_v40  ;;  %10107 = vst [vmem:[#allocation58_spill] sm:$0xff] %v7683_v49 }
 0x135   :  { %5249 = vmatpush3.msk.msra.mxu0 %vm6517_vm3, %v9950_v61  ;;  %5392 = vmatprep.subr.msk.mxu1 %vm6196_vm7, %v9950_v61  ;;  %v1648_v34 = vsub.f32 %v7582_v46, %v10103_v1  ;;  %10104 = vst [vmem:[#allocation64_spill] sm:$0xff] %v7655_v18  ;;  %v7669_v1 = vsub.f32 %v5939_v35, %v7633_v20  ;;  %v10106_v35 = vand.u32 4294901760, %v7616_v47  ;;  %5954 = vpow2.f32 %v246_v15 }
 0x136   :  { %5250 = vmatprep.subr.msk.mxu0 %vm6562_vm4, %v9950_v61  ;;  %5313 = vmatprep.mubr.f32.mxu1 %v7555_v39  ;;  %v7686_v3 = vsub.f32 %v5941_v43, %v7655_v18  ;;  %5956 = vpow2.f32 %v248_v51 }
 0x137   :  { %5393 = vmatpush3.msk.msra.mxu1 %vm6196_vm7, %v9950_v61  ;;  %5164 = vmatmul.mubr.f32.gmra.mxu0 %v7127_v36  ;;  %v1629_v36 = vand.u32 4294901760, %v1628_v14  ;;  %v1639_v14 = vand.u32 4294901760, %v1638_v6  ;;  %v1649_v6 = vand.u32 4294901760, %v1648_v34  ;;  %v1658_v45 = vsub.f32 %v7616_v47, %v10106_v35  ;;  %v10110_v35 = vld [vmem:[#allocation7_spill] sm:$0xff] }
 0x138   :  { %5251 = vmatpush3.msk.msra.mxu0 %vm6562_vm4, %v9950_v61  ;;  %5314 = vmatmul.mubr.f32.gmra.mxu1 %v7579_v38  ;;  %v7696_v34 = vand.u32 4294901760, %v5945_v29 }
 0x139   :  { %5394 = vmatprep.subr.msk.mxu1 %vm6212_vm9, %v9950_v61  ;;  %5252 = vmatprep.subr.msk.mxu0 %vm6587_vm0, %v9950_v61  ;;  %v5947_v43 = vpop.eup %5946  ;;  %v1659_v15 = vand.u32 4294901760, %v1658_v45 }
 0x13a   :  { %5254 = vmatprep.mubr.f32.mxu0 %v1629_v36  ;;  %5395 = vmatpush3.msk.msra.mxu1 %vm6212_vm9, %v9950_v61  ;;  %v6071_v36 = vld [vmem:[%s9623_s1 + $0x78] sm:$0xff]  ;;  %10109 = vst [vmem:[#allocation63_spill] sm:$0xff] %v7696_v34 }
 0x13b   :  { %5253 = vmatpush3.msk.msra.mxu0 %vm6587_vm0, %v9950_v61  ;;  %5396 = vmatprep.subr.msk.mxu1 %vm6228_vm12, %v9950_v61  ;;  %v219_v0 = vsub.f32 %v6071_v36, %v7143_v44  ;;  %v10108_v44 = vand.u32 4294901760, %v7636_v28 }
 0x13c   :  { %5316 = vmatprep.mubr.f32.mxu1 %v7596_v53  ;;  %5334 = vmatprep.subr.mxu0 %v10105_v50 }
 0x13d   :  { %5397 = vmatpush3.msk.msra.mxu1 %vm6228_vm12, %v9950_v61  ;;  %5255 = vmatmul.mubr.f32.vlgmr.msra.gmra.mxu0 %v1639_v14  ;;  %v1668_v40 = vsub.f32 %v7636_v28, %v10108_v44  ;;  %v250_v36 = vmul.f32 1.442695, %v219_v0  ;;  %v7709_v44 = vsub.f32 %v5943_v8, %v7683_v49  ;;  %v5949_v0 = vpop.eup %5948  ;;  %v10111_v14 = vld [vmem:[#allocation10_spill] sm:$0xff]  ;;  %v7722_v8 = vsub.f32 %v5945_v29, %v7696_v34 }
 0x13e   :  { %5317 = vmatmul.mubr.f32.gmra.mxu1 %v7633_v20  ;;  %5335 = vmatpush3.msra.mxu0 %v10105_v50  ;;  %v7719_v50 = vand.u32 4294901760, %v5947_v43 }
 0x13f   :  { %5398 = vmatprep.subr.msk.mxu1 %vm6252_vm15, %v9950_v61  ;;  %5257 = vmatprep.mubr.f32.mxu0 %v1649_v6  ;;  %v9801_v6 = vand.u32 4294901760, %v7686_v3  ;;  %v1669_v51 = vand.u32 4294901760, %v1668_v40  ;;  %5958 = vpow2.f32 %v250_v36  ;;  %v5951_v29 = vpop.eup %5950 }
 0x140   :  { %5336 = vmatprep.subr.mxu0 %v10110_v35  ;;  %5399 = vmatpush3.msk.msra.mxu1 %vm6252_vm15, %v9950_v61  ;;  %10113 = vst [vmem:[#allocation67_spill] sm:$0xff] %v7719_v50  ;;  %v7755_v20 = vand.u32 4294901760, %v5951_v29 }
 0x141   :  { %5337 = vmatpush3.msra.mxu0 %v10110_v35  ;;  %5400 = vmatprep.subr.msk.mxu1 %vm6271_vm1, %v9950_v61  ;;  %v10112_v35 = vand.u32 4294901760, %v7669_v1  ;;  %v1688_v40 = vsub.f32 %v7686_v3, %v9801_v6  ;;  %v7745_v6 = vsub.f32 %v5947_v43, %v7719_v50 }
 0x142   :  { %5319 = vmatprep.mubr.f32.mxu1 %v7655_v18  ;;  %5338 = vmatprep.subr.mxu0 %v10111_v14  ;;  %v10115_v18 = vld [vmem:[#allocation12_spill] sm:$0xff]  ;;  %10118 = vst [vmem:[#allocation73_spill] sm:$0xff] %v7755_v20 }
 0x143   :  { %5401 = vmatpush3.msk.msra.mxu1 %vm6271_vm1, %v9950_v61  ;;  %5258 = vmatmul.mubr.f32.gmra.mxu0 %v1659_v15  ;;  %v1678_v45 = vsub.f32 %v7669_v1, %v10112_v35  ;;  %v7732_v35 = vand.u32 4294901760, %v5949_v0  ;;  %v5953_v15 = vpop.eup %5952  ;;  %v10121_v53 = vand.u32 4294901760, %v7745_v6 }
 0x144   :  { %5320 = vmatmul.mubr.f32.gmra.mxu1 %v7683_v49  ;;  %5339 = vmatpush3.msra.mxu0 %v10111_v14  ;;  %v10116_v14 = vld [vmem:[#allocation14_spill] sm:$0xff]  ;;  %v10117_v49 = vand.u32 4294901760, %v7709_v44 }
 0x145   :  { %5402 = vmatprep.subr.msk.mxu1 %vm10011_vm10, %v9950_v61  ;;  %5260 = vmatprep.mubr.f32.mxu0 %v1669_v51  ;;  %10114 = vst [vmem:[#allocation70_spill] sm:$0xff] %v7732_v35  ;;  %v1679_v36 = vand.u32 4294901760, %v1678_v45  ;;  %v9810_v51 = vand.u32 4294901760, %v7722_v8  ;;  %v7758_v43 = vsub.f32 %v5949_v0, %v7732_v35  ;;  %v10119_v0 = vld [vmem:[#allocation16_spill] sm:$0xff] }
 0x146   :  { %5340 = vmatprep.subr.mxu0 %v10115_v18  ;;  %5403 = vmatpush3.msk.msra.mxu1 %vm10011_vm10, %v9950_v61  ;;  %v1698_v45 = vsub.f32 %v7709_v44, %v10117_v49 }
 0x147   :  { %5341 = vmatpush3.msra.mxu0 %v10115_v18  ;;  %5404 = vmatprep.subr.msk.mxu1 %vm10014_vm6, %v9950_v61  ;;  %v1689_v18 = vand.u32 4294901760, %v1688_v40  ;;  %v1708_v40 = vsub.f32 %v7722_v8, %v9810_v51  ;;  %v9821_v51 = vand.u32 4294901760, %v7758_v43 }
 0x148   :  { %5322 = vmatprep.mubr.f32.mxu1 %v7696_v34  ;;  %5342 = vmatprep.subr.mxu0 %v10116_v14  ;;  %v5955_v34 = vpop.eup %5954 }
 0x149   :  { %5405 = vmatpush3.msk.msra.mxu1 %vm10014_vm6, %v9950_v61  ;;  %5261 = vmatmul.mubr.f32.gmra.mxu0 %v1679_v36  ;;  %v7768_v36 = vand.u32 4294901760, %v5953_v15  ;;  %v5957_v49 = vpop.eup %5956  ;;  %v7791_v38 = vand.u32 4294901760, %v5955_v34 }
 0x14a   :  { %5323 = vmatmul.mubr.f32.gmra.mxu1 %v7719_v50  ;;  %5343 = vmatpush3.msra.mxu0 %v10116_v14  ;;  %v7781_v14 = vsub.f32 %v5951_v29, %v7755_v20  ;;  %v10120_v50 = vld [vmem:[#allocation21_spill] sm:$0xff] }
 0x14b   :  { %5406 = vmatprep.subr.msk.mxu1 %vm6393_vm14, %v9950_v61  ;;  %5263 = vmatprep.mubr.f32.mxu0 %v1689_v18  ;;  %v1699_v18 = vand.u32 4294901760, %v1698_v45  ;;  %v1718_v45 = vsub.f32 %v7745_v6, %v10121_v53  ;;  %v7794_v29 = vsub.f32 %v5953_v15, %v7768_v36  ;;  %v10122_v15 = vld [vmem:[#allocation25_spill] sm:$0xff] }
 0x14c   :  { %5344 = vmatprep.subr.mxu0 %v10119_v0  ;;  %5407 = vmatpush3.msk.msra.mxu1 %vm6393_vm14, %v9950_v61 }
 0x14d   :  { %5345 = vmatpush3.msra.mxu0 %v10119_v0  ;;  %5408 = vmatprep.subr.msk.mxu1 %vm6433_vm8, %v9950_v61  ;;  %v1709_v0 = vand.u32 4294901760, %v1708_v40  ;;  %v1728_v40 = vsub.f32 %v7758_v43, %v9821_v51 }
 0x14e   :  { %5325 = vmatprep.mubr.f32.mxu1 %v7732_v35  ;;  %5346 = vmatprep.subr.mxu0 %v10120_v50  ;;  %v5959_v35 = vpop.eup %5958 }
 0x14f   :  { %5409 = vmatpush3.msk.msra.mxu1 %vm6433_vm8, %v9950_v61  ;;  %5264 = vmatmul.mubr.f32.gmra.mxu0 %v1699_v18  ;;  %v7804_v18 = vand.u32 4294901760, %v5957_v49  ;;  %v1729_v53 = vand.u32 4294901760, %v1728_v40 }
 0x150   :  { %5326 = vmatmul.mubr.f32.gmra.mxu1 %v7755_v20  ;;  %5347 = vmatpush3.msra.mxu0 %v10120_v50  ;;  %v7817_v50 = vsub.f32 %v5955_v34, %v7791_v38  ;;  %v10124_v34 = vand.u32 4294901760, %v7794_v29 }
 0x151   :  { %5410 = vmatprep.subr.msk.mxu1 %vm6447_vm13, %v9950_v61  ;;  %5266 = vmatprep.mubr.f32.mxu0 %v1709_v0  ;;  %v1719_v0 = vand.u32 4294901760, %v1718_v45  ;;  %v7827_v45 = vand.u32 4294901760, %v5959_v35  ;;  %v7830_v51 = vsub.f32 %v5957_v49, %v7804_v18 }
 0x152   :  { %5348 = vmatprep.subr.mxu0 %v10122_v15  ;;  %5411 = vmatpush3.msk.msra.mxu1 %vm6447_vm13, %v9950_v61  ;;  %v1748_v40 = vsub.f32 %v7794_v29, %v10124_v34 }
 0x153   :  { %5349 = vmatpush3.msra.mxu0 %v10122_v15  ;;  %5412 = vmatprep.subr.msk.mxu1 %vm6465_vm2, %v9950_v61  ;;  %v10123_v15 = vand.u32 4294901760, %v7781_v14 }
 0x154   :  { %5328 = vmatprep.mubr.f32.mxu1 %v7768_v36  ;;  %5350 = vmatprep.subr.mxu0 %v6426_v52  ;;  %v1749_v34 = vand.u32 4294901760, %v1748_v40  ;;  %v10125_v40 = vand.u32 4294901760, %v7547_v21 }
 0x155   :  { %5413 = vmatpush3.msk.msra.mxu1 %vm6465_vm2, %v9950_v61  ;;  %5267 = vmatmul.mubr.f32.gmra.mxu0 %v1719_v0  ;;  %v1738_v20 = vsub.f32 %v7781_v14, %v10123_v15  ;;  %v9830_v15 = vand.u32 4294901760, %v7817_v50  ;;  %v7851_v0 = vsub.f32 %v5959_v35, %v7827_v45 }
 0x156   :  { %5329 = vmatmul.mubr.f32.gmra.mxu1 %v7791_v38  ;;  %5351 = vmatpush3.msra.mxu0 %v6426_v52 }
 0x157   :  { %5414 = vmatprep.subr.msk.mxu1 %vm6490_vm11, %v9950_v61  ;;  %5269 = vmatprep.mubr.f32.mxu0 %v1729_v53  ;;  %v1739_v49 = vand.u32 4294901760, %v1738_v20  ;;  %v9828_v53 = vand.u32 4294901760, %v7830_v51  ;;  %v9829_v35 = vand.u32 4294901760, %v7851_v0 }
 0x158   :  { %5352 = vmatprep.subr.mxu0 %v6457_v17  ;;  %5415 = vmatpush3.msk.msra.mxu1 %vm6490_vm11, %v9950_v61 }
 0x159   :  { %5353 = vmatpush3.msra.mxu0 %v6457_v17  ;;  %5416 = vmatprep.subr.msk.mxu1 %vm6517_vm3, %v9950_v61  ;;  %v1758_v17 = vsub.f32 %v7817_v50, %v9830_v15  ;;  %v1768_v20 = vsub.f32 %v7830_v51, %v9828_v53  ;;  %v1778_v53 = vsub.f32 %v7851_v0, %v9829_v35 }
 0x15a   :  { %5331 = vmatprep.mubr.f32.mxu1 %v7804_v18  ;;  %5354 = vmatprep.subr.mxu0 %v6495_v56 }
 0x15b   :  { %5417 = vmatpush3.msk.msra.mxu1 %vm6517_vm3, %v9950_v61  ;;  %5270 = vmatmul.mubr.f32.gmra.mxu0 %v1739_v49  ;;  %v1759_v49 = vand.u32 4294901760, %v1758_v17  ;;  %v10126_v17 = vand.u32 4294901760, %v7566_v7 }
 0x15c   :  { %5332 = vmatmul.mubr.f32.gmra.mxu1 %v7827_v45  ;;  %5355 = vmatpush3.msra.mxu0 %v6495_v56 }
 0x15d   :  { %5418 = vmatprep.subr.msk.mxu1 %vm6562_vm4, %v9950_v61  ;;  %5272 = vmatprep.mubr.f32.mxu0 %v1749_v34  ;;  %v1769_v34 = vand.u32 4294901760, %v1768_v20  ;;  %v1779_v20 = vand.u32 4294901760, %v1778_v53 }
 0x15e   :  { %5356 = vmatprep.subr.mxu0 %v6533_v58  ;;  %5419 = vmatpush3.msk.msra.mxu1 %vm6562_vm4, %v9950_v61 }
 0x15f   :  { %5422 = vmatprep.mubr.f32.mxu1 %v10125_v40  ;;  %5357 = vmatpush3.msra.mxu0 %v6533_v58  ;;  %v10127_v40 = vand.u32 4294901760, %v7582_v46 }
 0x160   :  { %5420 = vmatprep.subr.msk.mxu1 %vm6587_vm0, %v9950_v61  ;;  %5358 = vmatprep.subr.mxu0 %v10032_v24 }
 0x161   :  { %5421 = vmatpush3.msk.msra.mxu1 %vm6587_vm0, %v9950_v61  ;;  %5273 = vmatmul.mubr.f32.gmra.mxu0 %v1759_v49 }
 0x162   :  { %5359 = vmatpush3.msra.mxu0 %v10032_v24  ;;  %5423 = vmatmul.mubr.f32.vlgmr.msra.gmra.mxu1 %v10126_v17  ;;  %v10128_v17 = vand.u32 4294901760, %v7616_v47  ;;  %v10166_v24 = vld [vmem:[#allocation63_spill] sm:$0xff] }
 0x163   :  { %5502 = vmatprep.subr.msk.mxu1 %vm6188_vm5, %v9950_v61  ;;  %5275 = vmatprep.mubr.f32.mxu0 %v1769_v34 }
 0x164   :  { %5360 = vmatprep.subr.mxu0 %v10035_v16  ;;  %5425 = vmatprep.mubr.f32.mxu1 %v10127_v40  ;;  %v10129_v40 = vand.u32 4294901760, %v7636_v28 }
 0x165   :  { %5503 = vmatpush3.msk.msra.mxu1 %vm6188_vm5, %v9950_v61  ;;  %5361 = vmatpush3.msra.mxu0 %v10035_v16  ;;  %v4976_v49 = vpop.f32.mrf.mxu1  ;;  %v10158_v16 = vld [vmem:[#allocation41_spill] sm:$0xff] }
 0x166   :  { %5504 = vmatprep.subr.msk.mxu1 %vm6196_vm7, %v9950_v61  ;;  %5362 = vmatprep.subr.mxu0 %v10038_v25 }
 0x167   :  { %5505 = vmatpush3.msk.msra.mxu1 %vm6196_vm7, %v9950_v61  ;;  %5276 = vmatmul.mubr.f32.gmra.mxu0 %v1779_v20  ;;  %v7907_v34 = vpop.f32.mrf.mxu1 }
 0x168   :  { %5363 = vmatpush3.msra.mxu0 %v10038_v25  ;;  %5426 = vmatmul.mubr.f32.gmra.mxu1 %v10128_v17  ;;  %v10130_v17 = vand.u32 4294901760, %v7669_v1  ;;  %v10155_v25 = vld [vmem:[#allocation22_spill] sm:$0xff] }
 0x169   :  { %5506 = vmatprep.subr.msk.mxu1 %vm6212_vm9, %v9950_v61  ;;  %5364 = vmatprep.subr.mxu0 %v10041_v5  ;;  %v4979_v53 = vpop.f32.mrf.mxu1 }
 0x16a   :  { %5366 = vmatprep.mubr.f32.mxu0 %v7547_v21  ;;  %5428 = vmatprep.mubr.f32.mxu1 %v10129_v40 }
 0x16b   :  { %5507 = vmatpush3.msk.msra.mxu1 %vm6212_vm9, %v9950_v61  ;;  %5365 = vmatpush3.msra.mxu0 %v10041_v5  ;;  %v7923_v20 = vpop.f32.mrf.mxu1  ;;  %v10131_v5 = vand.u32 4294901760, %v7686_v3 }
 0x16c   :  { %5508 = vmatprep.subr.msk.mxu1 %vm6228_vm12, %v9950_v61  ;;  %5446 = vmatprep.subr.mxu0 %v10043_v60 }
 0x16d   :  { %5509 = vmatpush3.msk.msra.mxu1 %vm6228_vm12, %v9950_v61  ;;  %5367 = vmatmul.mubr.f32.vlgmr.msra.gmra.mxu0 %v7566_v7  ;;  %v4920_v21 = vpop.f32.mrf.mxu0 }
 0x16e   :  { %5429 = vmatmul.mubr.f32.gmra.mxu1 %v10130_v17  ;;  %5447 = vmatpush3.msra.mxu0 %v10043_v60  ;;  %v7936_v40 = vadd.f32 %v4976_v49, %v4920_v21  ;;  %v4982_v35 = vpop.f32.mrf.mxu1 }
 0x16f   :  { %5510 = vmatprep.subr.msk.mxu1 %vm6252_vm15, %v9950_v61  ;;  %5369 = vmatprep.mubr.f32.mxu0 %v7582_v46  ;;  %v7942_v15 = vpop.f32.mrf.mxu0  ;;  %v10132_v46 = vand.u32 4294901760, %v7709_v44 }
 0x170   :  { %5431 = vmatprep.mubr.f32.mxu1 %v10131_v5  ;;  %5448 = vmatprep.subr.mxu0 %v10046_v48  ;;  %v7947_v7 = vpop.f32.mrf.mxu1 }
 0x171   :  { %5511 = vmatpush3.msk.msra.mxu1 %vm6252_vm15, %v9950_v61  ;;  %5449 = vmatpush3.msra.mxu0 %v10046_v48  ;;  %v10133_v48 = vand.u32 4294901760, %v7722_v8 }
 0x172   :  { %5512 = vmatprep.subr.msk.mxu1 %vm6271_vm1, %v9950_v61  ;;  %5450 = vmatprep.subr.mxu0 %v10047_v33 }
 0x173   :  { %5513 = vmatpush3.msk.msra.mxu1 %vm6271_vm1, %v9950_v61  ;;  %5370 = vmatmul.mubr.f32.gmra.mxu0 %v7616_v47  ;;  %v4923_v5 = vpop.f32.mrf.mxu0 }
 0x174   :  { %5432 = vmatmul.mubr.f32.gmra.mxu1 %v10132_v46  ;;  %5451 = vmatpush3.msra.mxu0 %v10047_v33  ;;  %v7964_v49 = vadd.f32 %v4979_v53, %v4923_v5  ;;  %v4985_v21 = vpop.f32.mrf.mxu1 }
 0x175   :  { %5514 = vmatprep.subr.msk.mxu1 %vm10011_vm10, %v9950_v61  ;;  %5372 = vmatprep.mubr.f32.mxu0 %v7636_v28  ;;  %v7970_v17 = vpop.f32.mrf.mxu0  ;;  %v10134_v28 = vand.u32 4294901760, %v7745_v6 }
 0x176   :  { %5434 = vmatprep.mubr.f32.mxu1 %v10133_v48  ;;  %5452 = vmatprep.subr.mxu0 %v10050_v12  ;;  %v7975_v47 = vpop.f32.mrf.mxu1  ;;  %v739_v31 = vadd.f32 %v7923_v20, %v7970_v17  ;;  %v10212_v20 = vld [vmem:[#allocation74_spill] sm:$0xff] }
 0x177   :  { %5515 = vmatpush3.msk.msra.mxu1 %vm10011_vm10, %v9950_v61  ;;  %5453 = vmatpush3.msra.mxu0 %v10050_v12  ;;  %v10135_v12 = vand.u32 4294901760, %v7758_v43 }
 0x178   :  { %5516 = vmatprep.subr.msk.mxu1 %vm10014_vm6, %v9950_v61  ;;  %5454 = vmatprep.subr.mxu0 %v10051_v32 }
 0x179   :  { %5517 = vmatpush3.msk.msra.mxu1 %vm10014_vm6, %v9950_v61  ;;  %5373 = vmatmul.mubr.f32.gmra.mxu0 %v7669_v1  ;;  %v4926_v48 = vpop.f32.mrf.mxu0 }
 0x17a   :  { %5435 = vmatmul.mubr.f32.gmra.mxu1 %v10134_v28  ;;  %5455 = vmatpush3.msra.mxu0 %v10051_v32  ;;  %v7992_v53 = vadd.f32 %v4982_v35, %v4926_v48  ;;  %v4988_v5 = vpop.f32.mrf.mxu1  ;;  %v10151_v32 = vld [vmem:[#allocation47_spill] sm:$0xff] }
 0x17b   :  { %5518 = vmatprep.subr.msk.mxu1 %vm6393_vm14, %v9950_v61  ;;  %5375 = vmatprep.mubr.f32.mxu0 %v7686_v3  ;;  %v7998_v46 = vpop.f32.mrf.mxu0  ;;  %v10136_v3 = vand.u32 4294901760, %v7781_v14 }
 0x17c   :  { %5437 = vmatprep.mubr.f32.mxu1 %v10135_v12  ;;  %5456 = vmatprep.subr.mxu0 %v10054_v19  ;;  %v8003_v1 = vpop.f32.mrf.mxu1 }
 0x17d   :  { %5519 = vmatpush3.msk.msra.mxu1 %vm6393_vm14, %v9950_v61  ;;  %5457 = vmatpush3.msra.mxu0 %v10054_v19  ;;  %v10137_v19 = vand.u32 4294901760, %v7794_v29 }
 0x17e   :  { %5520 = vmatprep.subr.msk.mxu1 %vm6433_vm8, %v9950_v61  ;;  %5458 = vmatprep.subr.mxu0 %v10055_v4 }
 0x17f   :  { %5521 = vmatpush3.msk.msra.mxu1 %vm6433_vm8, %v9950_v61  ;;  %5376 = vmatmul.mubr.f32.gmra.mxu0 %v7709_v44  ;;  %v4929_v12 = vpop.f32.mrf.mxu0 }
 0x180   :  { %5438 = vmatmul.mubr.f32.gmra.mxu1 %v10136_v3  ;;  %5459 = vmatpush3.msra.mxu0 %v10055_v4  ;;  %v8020_v35 = vadd.f32 %v4985_v21, %v4929_v12  ;;  %v4991_v48 = vpop.f32.mrf.mxu1 }
 0x181   :  { %5522 = vmatprep.subr.msk.mxu1 %vm6447_vm13, %v9950_v61  ;;  %5378 = vmatprep.mubr.f32.mxu0 %v7722_v8  ;;  %v8026_v28 = vpop.f32.mrf.mxu0  ;;  %v10139_v8 = vand.u32 4294901760, %v7817_v50 }
 0x182   :  { %5440 = vmatprep.mubr.f32.mxu1 %v10137_v19  ;;  %5460 = vmatprep.subr.mxu0 %v10058_v2  ;;  %v8031_v44 = vpop.f32.mrf.mxu1 }
 0x183   :  { %10138 = vst [vmem:[#allocation72_spill] sm:$0xff] %v8031_v44  ;;  %5523 = vmatpush3.msk.msra.mxu1 %vm6447_vm13, %v9950_v61  ;;  %5461 = vmatpush3.msra.mxu0 %v10058_v2  ;;  %v10140_v2 = vand.u32 4294901760, %v7830_v51  ;;  %v10178_v44 = vld [vmem:[#allocation51_spill] sm:$0xff] }
 0x184   :  { %5524 = vmatprep.subr.msk.mxu1 %vm6465_vm2, %v9950_v61  ;;  %5462 = vmatprep.subr.mxu0 %v10059_v42 }
 0x185   :  { %5525 = vmatpush3.msk.msra.mxu1 %vm6465_vm2, %v9950_v61  ;;  %5379 = vmatmul.mubr.f32.gmra.mxu0 %v7745_v6  ;;  %v4932_v19 = vpop.f32.mrf.mxu0  ;;  %v10141_v6 = vld [vmem:[#allocation34_spill] sm:$0xff] }
 0x186   :  { %5441 = vmatmul.mubr.f32.gmra.mxu1 %v10139_v8  ;;  %5463 = vmatpush3.msra.mxu0 %v10059_v42  ;;  %v8048_v21 = vadd.f32 %v4988_v5, %v4932_v19  ;;  %v4994_v12 = vpop.f32.mrf.mxu1  ;;  %v10144_v5 = vand.u32 4294901760, %v7851_v0  ;;  %v10146_v42 = vld [vmem:[#allocation40_spill] sm:$0xff] }
 0x187   :  { %5526 = vmatprep.subr.msk.mxu1 %vm6490_vm11, %v9950_v61  ;;  %5381 = vmatprep.mubr.f32.mxu0 %v7758_v43  ;;  %v8054_v3 = vpop.f32.mrf.mxu0  ;;  %v10143_v43 = vld [vmem:[#allocation37_spill] sm:$0xff] }
 0x188   :  { %5443 = vmatprep.mubr.f32.mxu1 %v10140_v2  ;;  %5464 = vmatprep.subr.mxu0 %v10141_v6  ;;  %v8059_v4 = vpop.f32.mrf.mxu1 }
 0x189   :  { %10142 = vst [vmem:[#allocation75_spill] sm:$0xff] %v8059_v4  ;;  %5527 = vmatpush3.msk.msra.mxu1 %vm6490_vm11, %v9950_v61  ;;  %5465 = vmatpush3.msra.mxu0 %v10141_v6  ;;  %v10170_v4 = vld [vmem:[#allocation70_spill] sm:$0xff] }
 0x18a   :  { %5528 = vmatprep.subr.msk.mxu1 %vm6517_vm3, %v9950_v61  ;;  %5466 = vmatprep.subr.mxu0 %v10143_v43 }
 0x18b   :  { %5529 = vmatpush3.msk.msra.mxu1 %vm6517_vm3, %v9950_v61  ;;  %5382 = vmatmul.mubr.f32.gmra.mxu0 %v7781_v14  ;;  %v4935_v2 = vpop.f32.mrf.mxu0 }
 0x18c   :  { %5444 = vmatmul.mubr.f32.gmra.mxu1 %v10144_v5  ;;  %5467 = vmatpush3.msra.mxu0 %v10143_v43  ;;  %v8076_v19 = vadd.f32 %v4991_v48, %v4935_v2  ;;  %v4997_v8 = vpop.f32.mrf.mxu1  ;;  %v10148_v48 = vld [vmem:[#allocation44_spill] sm:$0xff] }
 0x18d   :  { %5530 = vmatprep.subr.msk.mxu1 %vm6562_vm4, %v9950_v61  ;;  %5384 = vmatprep.mubr.f32.mxu0 %v7794_v29  ;;  %v8082_v6 = vpop.f32.mrf.mxu0 }
 0x18e   :  { %10145 = vst [vmem:[#allocation80_spill] sm:$0xff] %v8082_v6  ;;  %5468 = vmatprep.subr.mxu0 %v10146_v42  ;;  %5531 = vmatpush3.msk.msra.mxu1 %vm6562_vm4, %v9950_v61  ;;  %v8088_v14 = vpop.f32.mrf.mxu1 }
 0x18f   :  { %10147 = vst [vmem:[#allocation79_spill] sm:$0xff] %v8088_v14  ;;  %5534 = vmatprep.mubr.f32.mxu1 %v7524_v11  ;;  %5469 = vmatpush3.msra.mxu0 %v10146_v42  ;;  %v10149_v42 = vld [vmem:[#allocation17_spill] sm:$0xff]  ;;  %v10162_v14 = vld [vmem:[#allocation64_spill] sm:$0xff] }
 0x190   :  { %5532 = vmatprep.subr.msk.mxu1 %vm6587_vm0, %v9950_v61  ;;  %5470 = vmatprep.subr.mxu0 %v10148_v48 }
 0x191   :  { %5533 = vmatpush3.msk.msra.mxu1 %vm6587_vm0, %v9950_v61  ;;  %5385 = vmatmul.mubr.f32.gmra.mxu0 %v7817_v50  ;;  %v4938_v29 = vpop.f32.mrf.mxu0  ;;  %v10152_v50 = vld [vmem:[#allocation19_spill] sm:$0xff] }
 0x192   :  { %5471 = vmatpush3.msra.mxu0 %v10148_v48  ;;  %5535 = vmatmul.mubr.f32.vlgmr.msra.gmra.mxu1 %v7540_v23  ;;  %v8102_v2 = vadd.f32 %v4994_v12, %v4938_v29  ;;  %v5088_v5 = vpop.f32.mrf.mxu1  ;;  %v10153_v12 = vld [vmem:[#allocation50_spill] sm:$0xff]  ;;  %v10154_v29 = vld [vmem:[#allocation61_spill] sm:$0xff] }
 0x193   :  { %5614 = vmatprep.subr.mxu1 %v10149_v42  ;;  %5387 = vmatprep.mubr.f32.mxu0 %v7830_v51  ;;  %v8106_v43 = vpop.f32.mrf.mxu0 }
 0x194   :  { %10150 = vst [vmem:[#allocation82_spill] sm:$0xff] %v8106_v43  ;;  %5472 = vmatprep.subr.mxu0 %v10151_v32  ;;  %5537 = vmatprep.mubr.f32.mxu1 %v7555_v39  ;;  %v8110_v33 = vpop.f32.mrf.mxu1 }
 0x195   :  { %5615 = vmatpush3.msra.mxu1 %v10149_v42  ;;  %5473 = vmatpush3.msra.mxu0 %v10151_v32  ;;  %v10156_v42 = vld [vmem:[#allocation52_spill] sm:$0xff] }
 0x196   :  { %5616 = vmatprep.subr.mxu1 %v10152_v50  ;;  %5474 = vmatprep.subr.mxu0 %v10153_v12 }
 0x197   :  { %5617 = vmatpush3.msra.mxu1 %v10152_v50  ;;  %5388 = vmatmul.mubr.f32.gmra.mxu0 %v7851_v0  ;;  %v4941_v51 = vpop.f32.mrf.mxu0  ;;  %v10159_v0 = vld [vmem:[#allocation23_spill] sm:$0xff] }
 0x198   :  { %5475 = vmatpush3.msra.mxu0 %v10153_v12  ;;  %5538 = vmatmul.mubr.f32.gmra.mxu1 %v10154_v29  ;;  %v8120_v48 = vadd.f32 %v4997_v8, %v4941_v51  ;;  %v5091_v60 = vpop.f32.mrf.mxu1 }
 0x199   :  { %5618 = vmatprep.subr.mxu1 %v10155_v25  ;;  %5476 = vmatprep.subr.mxu0 %v10156_v42  ;;  %v8124_v32 = vpop.f32.mrf.mxu0 }
 0x19a   :  { %10157 = vst [vmem:[#allocation84_spill] sm:$0xff] %v8124_v32  ;;  %5478 = vmatprep.mubr.f32.mxu0 %v7524_v11  ;;  %5540 = vmatprep.mubr.f32.mxu1 %v10158_v16  ;;  %v8128_v50 = vpop.f32.mrf.mxu1  ;;  %v10160_v11 = vld [vmem:[#allocation59_spill] sm:$0xff] }
 0x19b   :  { %5619 = vmatpush3.msra.mxu1 %v10155_v25  ;;  %5477 = vmatpush3.msra.mxu0 %v10156_v42  ;;  %v10161_v42 = vld [vmem:[#allocation26_spill] sm:$0xff] }
 0x19c   :  { %5620 = vmatprep.subr.mxu1 %v10159_v0  ;;  %5558 = vmatprep.subr.msk.mxu0 %vm6188_vm5, %v9950_v61 }
 0x19d   :  { %5621 = vmatpush3.msra.mxu1 %v10159_v0  ;;  %5479 = vmatmul.mubr.f32.vlgmr.msra.gmra.mxu0 %v7540_v23  ;;  %v5032_v8 = vpop.f32.mrf.mxu0 }
 0x19e   :  { %5541 = vmatmul.mubr.f32.gmra.mxu1 %v10160_v11  ;;  %5559 = vmatpush3.msk.msra.mxu0 %vm6188_vm5, %v9950_v61  ;;  %v912_v25 = vadd.f32 %v5032_v8, %v7936_v40  ;;  %v5094_v51 = vpop.f32.mrf.mxu1  ;;  %v10163_v40 = vld [vmem:[#allocation30_spill] sm:$0xff] }
 0x19f   :  { %5622 = vmatprep.subr.mxu1 %v10161_v42  ;;  %5481 = vmatprep.mubr.f32.mxu0 %v7555_v39  ;;  %v8145_v12 = vpop.f32.mrf.mxu0  ;;  %v10164_v8 = vld [vmem:[#allocation58_spill] sm:$0xff] }
 0x1a0   :  { %5543 = vmatprep.mubr.f32.mxu1 %v10162_v14  ;;  %5560 = vmatprep.subr.msk.mxu0 %vm6196_vm7, %v9950_v61  ;;  %v8151_v23 = vpop.f32.mrf.mxu1  ;;  %v8153_v0 = vadd.f32 %v5088_v5, %v912_v25  ;;  %v10165_v25 = vld [vmem:[#allocation33_spill] sm:$0xff] }
 0x1a1   :  { %5623 = vmatpush3.msra.mxu1 %v10161_v42  ;;  %5561 = vmatpush3.msk.msra.mxu0 %vm6196_vm7, %v9950_v61 }
 0x1a2   :  { %5624 = vmatprep.subr.mxu1 %v10163_v40  ;;  %5562 = vmatprep.subr.msk.mxu0 %vm6212_vm9, %v9950_v61 }
 0x1a3   :  { %5625 = vmatpush3.msra.mxu1 %v10163_v40  ;;  %5482 = vmatmul.mubr.f32.gmra.mxu0 %v10154_v29  ;;  %v5035_v39 = vpop.f32.mrf.mxu0 }
 0x1a4   :  { %5544 = vmatmul.mubr.f32.gmra.mxu1 %v10164_v8  ;;  %5563 = vmatpush3.msk.msra.mxu0 %vm6212_vm9, %v9950_v61  ;;  %v926_v5 = vadd.f32 %v5035_v39, %v7964_v49  ;;  %v5097_v42 = vpop.f32.mrf.mxu1  ;;  %v10167_v49 = vld [vmem:[#allocation35_spill] sm:$0xff] }
 0x1a5   :  { %5626 = vmatprep.subr.mxu1 %v10165_v25  ;;  %5484 = vmatprep.mubr.f32.mxu0 %v10158_v16  ;;  %v8172_v32 = vpop.f32.mrf.mxu0  ;;  %v10168_v39 = vld [vmem:[#allocation67_spill] sm:$0xff] }
 0x1a6   :  { %5546 = vmatprep.mubr.f32.mxu1 %v10166_v24  ;;  %5564 = vmatprep.subr.msk.mxu0 %vm6228_vm12, %v9950_v61  ;;  %v8178_v29 = vpop.f32.mrf.mxu1  ;;  %v8180_v40 = vadd.f32 %v5091_v60, %v926_v5 }
 0x1a7   :  { %5627 = vmatpush3.msra.mxu1 %v10165_v25  ;;  %5565 = vmatpush3.msk.msra.mxu0 %vm6228_vm12, %v9950_v61  ;;  %v10169_v25 = vld [vmem:[#allocation39_spill] sm:$0xff] }
 0x1a8   :  { %5628 = vmatprep.subr.mxu1 %v10167_v49  ;;  %5566 = vmatprep.subr.msk.mxu0 %vm6252_vm15, %v9950_v61 }
 0x1a9   :  { %5629 = vmatpush3.msra.mxu1 %v10167_v49  ;;  %5485 = vmatmul.mubr.f32.gmra.mxu0 %v10160_v11  ;;  %v5038_v16 = vpop.f32.mrf.mxu0 }
 0x1aa   :  { %5547 = vmatmul.mubr.f32.gmra.mxu1 %v10168_v39  ;;  %5567 = vmatpush3.msk.msra.mxu0 %vm6252_vm15, %v9950_v61  ;;  %v940_v60 = vadd.f32 %v5038_v16, %v7992_v53  ;;  %v5100_v5 = vpop.f32.mrf.mxu1  ;;  %v10172_v53 = vld [vmem:[#allocation43_spill] sm:$0xff]  ;;  %v6073_v16 = vld [vmem:[%s9623_s1] sm:$0xff] }
 0x1ab   :  { %5630 = vmatprep.subr.mxu1 %v10169_v25  ;;  %5487 = vmatprep.mubr.f32.mxu0 %v10162_v14  ;;  %v8199_v58 = vpop.f32.mrf.mxu0 }
 0x1ac   :  { %5549 = vmatprep.mubr.f32.mxu1 %v10170_v4  ;;  %5568 = vmatprep.subr.msk.mxu0 %vm6271_vm1, %v9950_v61  ;;  %v8205_v11 = vpop.f32.mrf.mxu1  ;;  %v8207_v49 = vadd.f32 %v5094_v51, %v940_v60  ;;  %v6072_v51 = vld [vmem:[%s9622_s0] sm:$0xff] }
 0x1ad   :  { %10171 = vst [vmem:[#allocation17_spill] sm:$0xff] %v8205_v11  ;;  %5631 = vmatpush3.msra.mxu1 %v10169_v25  ;;  %5569 = vmatpush3.msk.msra.mxu0 %vm6271_vm1, %v9950_v61  ;;  %v252_v60 = vsub.f32 %v6072_v51, %v6073_v16  ;;  %v10173_v25 = vld [vmem:[#allocation73_spill] sm:$0xff] }
 0x1ae   :  { %5632 = vmatprep.subr.mxu1 %v10172_v53  ;;  %5570 = vmatprep.subr.msk.mxu0 %vm10011_vm10, %v9950_v61  ;;  %v10176_v11 = vld [vmem:[#allocation49_spill] sm:$0xff] }
 0x1af   :  { %5633 = vmatpush3.msra.mxu1 %v10172_v53  ;;  %5488 = vmatmul.mubr.f32.gmra.mxu0 %v10164_v8  ;;  %v5041_v14 = vpop.f32.mrf.mxu0  ;;  %v10174_v8 = vld [vmem:[#allocation46_spill] sm:$0xff] }
 0x1b0   :  { %5550 = vmatmul.mubr.f32.gmra.mxu1 %v10173_v25  ;;  %5571 = vmatpush3.msk.msra.mxu0 %vm10011_vm10, %v9950_v61  ;;  %v954_v53 = vadd.f32 %v5041_v14, %v8020_v35  ;;  %v8230_v43 = vpop.f32.mrf.mxu1  ;;  %v6074_v35 = vld [vmem:[%s9622_s0 + $0x8] sm:$0xff] }
 0x1b1   :  { %5634 = vmatprep.subr.mxu1 %v10174_v8  ;;  %5490 = vmatprep.mubr.f32.mxu0 %v10166_v24  ;;  %v8234_v56 = vpop.f32.mrf.mxu0  ;;  %v6075_v24 = vld [vmem:[%s9623_s1 + $0x8] sm:$0xff] }
 0x1b2   :  { %5552 = vmatprep.mubr.f32.mxu1 %v7768_v36  ;;  %5572 = vmatprep.subr.msk.mxu0 %vm10014_vm6, %v9950_v61  ;;  %v8240_v51 = vpop.f32.mrf.mxu1  ;;  %v8242_v16 = vadd.f32 %v5097_v42, %v954_v53  ;;  %v253_v14 = vsub.f32 %v6074_v35, %v6075_v24  ;;  %v10177_v42 = vld [vmem:[#allocation57_spill] sm:$0xff] }
 0x1b3   :  { %10175 = vst [vmem:[#allocation19_spill] sm:$0xff] %v8240_v51  ;;  %5635 = vmatpush3.msra.mxu1 %v10174_v8  ;;  %5573 = vmatpush3.msk.msra.mxu0 %vm10014_vm6, %v9950_v61  ;;  %v268_v53 = vmul.f32 %v10177_v42, %v252_v60  ;;  %v6076_v51 = vld [vmem:[%s9622_s0 + $0x10] sm:$0xff] }
 0x1b4   :  { %5636 = vmatprep.subr.mxu1 %v10176_v11  ;;  %5574 = vmatprep.subr.msk.mxu0 %vm6393_vm14, %v9950_v61  ;;  %v6077_v8 = vld [vmem:[%s9623_s1 + $0x10] sm:$0xff] }
 0x1b5   :  { %v254_v35 = vsub.f32 %v6076_v51, %v6077_v8  ;;  %5637 = vmatpush3.msra.mxu1 %v10176_v11  ;;  %5491 = vmatmul.mubr.f32.gmra.mxu0 %v10168_v39  ;;  %v5044_v24 = vpop.f32.mrf.mxu0  ;;  %v10179_v51 = vld [vmem:[#allocation62_spill] sm:$0xff]  ;;  %v8283_v39 = vand.u32 4294901760, %v268_v53 }
 0x1b6   :  { %5553 = vmatmul.mubr.f32.gmra.mxu1 %v7791_v38  ;;  %5575 = vmatpush3.msk.msra.mxu0 %vm6393_vm14, %v9950_v61  ;;  %v968_v60 = vadd.f32 %v5044_v24, %v8048_v21  ;;  %v8272_v42 = vpop.f32.mrf.mxu1  ;;  %v269_v8 = vmul.f32 %v10179_v51, %v253_v14  ;;  %v6079_v14 = vld [vmem:[%s9623_s1 + $0x18] sm:$0xff]  ;;  %v10184_v51 = vld [vmem:[#allocation56_spill] sm:$0xff] }
 0x1b7   :  { %5638 = vmatprep.subr.mxu1 %v10178_v44  ;;  %5493 = vmatprep.mubr.f32.mxu0 %v10170_v4  ;;  %v8277_v11 = vpop.f32.mrf.mxu0  ;;  %10181 = vst [vmem:[#allocation22_spill] sm:$0xff] %v8283_v39  ;;  %v6078_v4 = vld [vmem:[%s9622_s0 + $0x18] sm:$0xff]  ;;  %v270_v52 = vmul.f32 %v10184_v51, %v254_v35 }
 0x1b8   :  { %10180 = vst [vmem:[#allocation61_spill] sm:$0xff] %v8277_v11  ;;  %5555 = vmatprep.mubr.f32.mxu1 %v7804_v18  ;;  %5576 = vmatprep.subr.msk.mxu0 %vm6433_vm8, %v9950_v61  ;;  %v8285_v6 = vpop.f32.mrf.mxu1  ;;  %v8287_v21 = vadd.f32 %v5100_v5, %v968_v60  ;;  %v255_v24 = vsub.f32 %v6078_v4, %v6079_v14  ;;  %v6080_v5 = vld [vmem:[%s9622_s0 + $0x20] sm:$0xff]  ;;  %v8312_v35 = vand.u32 4294901760, %v269_v8 }
 0x1b9   :  { %10182 = vst [vmem:[#allocation41_spill] sm:$0xff] %v8285_v6  ;;  %5639 = vmatpush3.msra.mxu1 %v10178_v44  ;;  %5577 = vmatpush3.msk.msra.mxu0 %vm6433_vm8, %v9950_v61  ;;  %v10185_v6 = vld [vmem:[#allocation53_spill] sm:$0xff]  ;;  %v6081_v44 = vld [vmem:[%s9623_s1 + $0x20] sm:$0xff]  ;;  %v8319_v14 = vsub.f32 %v268_v53, %v8283_v39 }
 0x1ba   :  { %10183 = vst [vmem:[#allocation23_spill] sm:$0xff] %v8287_v21  ;;  %5640 = vmatprep.subr.mxu1 %v10185_v6  ;;  %5578 = vmatprep.subr.msk.mxu0 %vm6447_vm13, %v9950_v61  ;;  %v256_v60 = vsub.f32 %v6080_v5, %v6081_v44  ;;  %10186 = vst [vmem:[#allocation59_spill] sm:$0xff] %v8312_v35  ;;  %v10188_v5 = vld [vmem:[#allocation54_spill] sm:$0xff] }
 0x1bb   :  { %5641 = vmatpush3.msra.mxu1 %v10185_v6  ;;  %5494 = vmatmul.mubr.f32.gmra.mxu0 %v10173_v25  ;;  %v5047_v4 = vpop.f32.mrf.mxu0  ;;  %10187 = vst [vmem:[#allocation26_spill] sm:$0xff] %v8319_v14  ;;  %v8326_v6 = vand.u32 4294901760, %v270_v52  ;;  %v10190_v25 = vld [vmem:[#allocation60_spill] sm:$0xff] }
 0x1bc   :  { %5556 = vmatmul.mubr.f32.gmra.mxu1 %v7827_v45  ;;  %5579 = vmatpush3.msk.msra.mxu0 %vm6447_vm13, %v9950_v61  ;;  %v982_v51 = vadd.f32 %v5047_v4, %v8076_v19  ;;  %v8322_v21 = vpop.f32.mrf.mxu1  ;;  %v271_v44 = vmul.f32 %v10190_v25, %v255_v24  ;;  %v6083_v24 = vld [vmem:[%s9623_s1 + $0x28] sm:$0xff] }
 0x1bd   :  { %5642 = vmatprep.subr.mxu1 %v10188_v5  ;;  %5496 = vmatprep.mubr.f32.mxu0 %v7768_v36  ;;  %10189 = vst [vmem:[#allocation64_spill] sm:$0xff] %v8326_v6  ;;  %v8329_v11 = vpop.f32.mrf.mxu0  ;;  %v6082_v36 = vld [vmem:[%s9622_s0 + $0x28] sm:$0xff] }
 0x1be   :  { %5580 = vmatprep.subr.msk.mxu0 %vm6465_vm2, %v9950_v61  ;;  %5643 = vmatpush3.msra.mxu1 %v10188_v5  ;;  %v8335_v53 = vpop.f32.mrf.mxu1  ;;  %v8338_v19 = vadd.f32 %v8230_v43, %v982_v51  ;;  %v257_v4 = vsub.f32 %v6082_v36, %v6083_v24  ;;  %v8351_v5 = vsub.f32 %v269_v8, %v8312_v35  ;;  %v10194_v43 = vld [vmem:[#allocation66_spill] sm:$0xff]  ;;  %v10195_v25 = vld [vmem:[#allocation55_spill] sm:$0xff]  ;;  %v6084_v36 = vld [vmem:[%s9622_s0 + $0x30] sm:$0xff] }
 0x1bf   :  { %10191 = vst [vmem:[#allocation30_spill] sm:$0xff] %v8335_v53  ;;  %5646 = vmatprep.mubr.f32.mxu1 %v8283_v39  ;;  %5581 = vmatpush3.msk.msra.mxu0 %vm6465_vm2, %v9950_v61  ;;  %v272_v51 = vmul.f32 %v10194_v43, %v256_v60  ;;  %v6085_v24 = vld [vmem:[%s9623_s1 + $0x30] sm:$0xff]  ;;  %v8367_v60 = vand.u32 4294901760, %v271_v44  ;;  %v8370_v43 = vsub.f32 %v270_v52, %v8326_v6 }
 0x1c0   :  { %10192 = vst [vmem:[#allocation58_spill] sm:$0xff] %v8338_v19  ;;  %10193 = vst [vmem:[#allocation33_spill] sm:$0xff] %v8351_v5  ;;  %5644 = vmatprep.subr.mxu1 %v10195_v25  ;;  %5582 = vmatprep.subr.msk.mxu0 %vm6490_vm11, %v9950_v61  ;;  %v258_v8 = vsub.f32 %v6084_v36, %v6085_v24 }
 0x1c1   :  { %5645 = vmatpush3.msra.mxu1 %v10195_v25  ;;  %5497 = vmatmul.mubr.f32.gmra.mxu0 %v7791_v38  ;;  %10196 = vst [vmem:[#allocation63_spill] sm:$0xff] %v8367_v60  ;;  %10197 = vst [vmem:[#allocation35_spill] sm:$0xff] %v8370_v43  ;;  %v5050_v39 = vpop.f32.mrf.mxu0  ;;  %v8383_v38 = vand.u32 4294901760, %v272_v51  ;;  %v10199_v25 = vld [vmem:[#allocation65_spill] sm:$0xff] }
 0x1c2   :  { %5583 = vmatpush3.msk.msra.mxu0 %vm6490_vm11, %v9950_v61  ;;  %5647 = vmatmul.mubr.f32.vlgmr.msra.gmra.mxu1 %v8312_v35  ;;  %v996_v53 = vadd.f32 %v5050_v39, %v8102_v2  ;;  %v8377_v19 = vpop.f32.mrf.mxu1  ;;  %v273_v36 = vmul.f32 %v10199_v25, %v257_v4  ;;  %v10200_v2 = vand.u32 4294901760, %v8319_v14  ;;  %v6086_v4 = vld [vmem:[%s9622_s0 + $0x38] sm:$0xff] }
 0x1c3   :  { %5726 = vmatprep.subr.msk.mxu1 %vm6188_vm5, %v9950_v61  ;;  %5499 = vmatprep.mubr.f32.mxu0 %v7804_v18  ;;  %10198 = vst [vmem:[#allocation67_spill] sm:$0xff] %v8383_v38  ;;  %v8387_v24 = vpop.f32.mrf.mxu0  ;;  %v6087_v25 = vld [vmem:[%s9623_s1 + $0x38] sm:$0xff]  ;;  %v8440_v63 = vsub.f32 %v272_v51, %v8383_v38  ;;  %v10205_v51 = vand.u32 4294901760, %v8370_v43 }
 0x1c4   :  { %5584 = vmatprep.subr.msk.mxu0 %vm6517_vm3, %v9950_v61  ;;  %5649 = vmatprep.mubr.f32.mxu1 %v8326_v6  ;;  %v2818_v39 = vsub.f32 %v8319_v14, %v10200_v2  ;;  %v8396_v35 = vpop.f32.mrf.mxu1  ;;  %v8399_v18 = vadd.f32 %v8272_v42, %v996_v53  ;;  %v259_v52 = vsub.f32 %v6086_v4, %v6087_v25  ;;  %v10202_v53 = vld [vmem:[#allocation69_spill] sm:$0xff]  ;;  %v6088_v4 = vld [vmem:[%s9622_s0 + $0x40] sm:$0xff]  ;;  %v8437_v42 = vand.u32 4294901760, %v273_v36 }
 0x1c5   :  { %5727 = vmatpush3.msk.msra.mxu1 %vm6188_vm5, %v9950_v61  ;;  %5585 = vmatpush3.msk.msra.mxu0 %vm6517_vm3, %v9950_v61  ;;  %v274_v2 = vmul.f32 %v10202_v53, %v258_v8  ;;  %v8416_v6 = vsub.f32 %v271_v44, %v8367_v60  ;;  %v6089_v25 = vld [vmem:[%s9623_s1 + $0x40] sm:$0xff]  ;;  %v10203_v44 = vand.u32 4294901760, %v8351_v5 }
 0x1c6   :  { %10201 = vst [vmem:[#allocation39_spill] sm:$0xff] %v8399_v18  ;;  %5728 = vmatprep.subr.msk.mxu1 %vm6196_vm7, %v9950_v61  ;;  %5586 = vmatprep.subr.msk.mxu0 %vm6562_vm4, %v9950_v61  ;;  %v260_v8 = vsub.f32 %v6088_v4, %v6089_v25  ;;  %10204 = vst [vmem:[#allocation70_spill] sm:$0xff] %v8437_v42  ;;  %v2819_v4 = vand.u32 4294901760, %v2818_v39 }
 0x1c7   :  { %5729 = vmatpush3.msk.msra.mxu1 %vm6196_vm7, %v9950_v61  ;;  %5500 = vmatmul.mubr.f32.gmra.mxu0 %v7827_v45  ;;  %v2828_v53 = vsub.f32 %v8351_v5, %v10203_v44  ;;  %v5053_v18 = vpop.f32.mrf.mxu0  ;;  %v727_v45 = vadd.f32 %v7907_v34, %v7942_v15  ;;  %v2838_v44 = vsub.f32 %v8370_v43, %v10205_v51  ;;  %v8460_v39 = vand.u32 4294901760, %v274_v2  ;;  %v10207_v34 = vld [vmem:[#allocation68_spill] sm:$0xff]  ;;  %v6091_v5 = vld [vmem:[%s9623_s1 + $0x48] sm:$0xff] }
 0x1c8   :  { %5587 = vmatpush3.msk.msra.mxu0 %vm6562_vm4, %v9950_v61  ;;  %5650 = vmatmul.mubr.f32.gmra.mxu1 %v8367_v60  ;;  %v1010_v25 = vadd.f32 %v5053_v18, %v8120_v48  ;;  %v8449_v13 = vpop.f32.mrf.mxu1  ;;  %v9878_v15 = vand.u32 4294901760, %v8416_v6  ;;  %v275_v48 = vmul.f32 %v10207_v34, %v259_v52  ;;  %v6090_v60 = vld [vmem:[%s9622_s0 + $0x48] sm:$0xff] }
 0x1c9   :  { %5730 = vmatprep.subr.msk.mxu1 %vm6212_vm9, %v9950_v61  ;;  %5588 = vmatprep.subr.msk.mxu0 %vm6587_vm0, %v9950_v61  ;;  %10206 = vst [vmem:[#allocation43_spill] sm:$0xff] %v8460_v39  ;;  %v8464_v18 = vpop.f32.mrf.mxu0  ;;  %v261_v14 = vsub.f32 %v6090_v60, %v6091_v5  ;;  %v905_v51 = vadd.f32 %v8145_v12, %v727_v45  ;;  %v2829_v34 = vand.u32 4294901760, %v2828_v53  ;;  %v10209_v60 = vld [vmem:[#allocation71_spill] sm:$0xff]  ;;  %v8498_v45 = vld [vmem:[%s9623_s1 + $0x58] sm:$0xff]  ;;  %v2839_v53 = vand.u32 4294901760, %v2838_v44 }
 0x1ca   :  { %5590 = vmatprep.mubr.f32.mxu0 %v2819_v4  ;;  %5652 = vmatprep.mubr.f32.mxu1 %v8383_v38  ;;  %v8474_v43 = vpop.f32.mrf.mxu1  ;;  %v8477_v52 = vadd.f32 %v8322_v21, %v1010_v25  ;;  %v276_v4 = vmul.f32 %v10209_v60, %v260_v8  ;;  %v8488_v12 = vsub.f32 %v273_v36, %v8437_v42  ;;  %v8493_v21 = vld [vmem:[%s9622_s0 + $0x58] sm:$0xff]  ;;  %v6094_v8 = vld [vmem:[%s9622_s0 + $0x50] sm:$0xff]  ;;  %v8518_v38 = vand.u32 4294901760, %v275_v48 }
 0x1cb   :  { %5731 = vmatpush3.msk.msra.mxu1 %vm6212_vm9, %v9950_v61  ;;  %5589 = vmatpush3.msk.msra.mxu0 %vm6587_vm0, %v9950_v61  ;;  %v6095_v36 = vld [vmem:[%s9623_s1 + $0x50] sm:$0xff]  ;;  %v10210_v60 = vld [vmem:[#allocation5_spill] sm:$0xff]  ;;  %v2848_v5 = vsub.f32 %v8416_v6, %v9878_v15  ;;  %v1083_v57 = vadd.f32 %v8110_v33, %v905_v51  ;;  %v277_v17 = vmul.f32 %v10212_v20, %v261_v14 }
 0x1cc   :  { %10208 = vst [vmem:[#allocation73_spill] sm:$0xff] %v8477_v52  ;;  %v262_v25 = vsub.f32 %v6094_v8, %v6095_v36  ;;  %5732 = vmatprep.subr.msk.mxu1 %vm6228_vm12, %v9950_v61  ;;  %5670 = vmatprep.subr.mxu0 %v10210_v60  ;;  %v8521_v8 = vsub.f32 %v274_v2, %v8460_v39  ;;  %v10211_v2 = vand.u32 4294901760, %v8440_v63  ;;  %v10214_v20 = vld [vmem:[#allocation76_spill] sm:$0xff] }
 0x1cd   :  { %5733 = vmatpush3.msk.msra.mxu1 %vm6228_vm12, %v9950_v61  ;;  %5591 = vmatmul.mubr.f32.vlgmr.msra.gmra.mxu0 %v2829_v34  ;;  %v5144_v36 = vpop.f32.mrf.mxu0  ;;  %v919_v33 = vadd.f32 %v8172_v32, %v739_v31  ;;  %v2849_v14 = vand.u32 4294901760, %v2848_v5  ;;  %v8561_v31 = vld [vmem:[%s9622_s0 + $0x68] sm:$0xff] }
 0x1ce   :  { %5653 = vmatmul.mubr.f32.gmra.mxu1 %v8437_v42  ;;  %5671 = vmatpush3.msra.mxu0 %v10210_v60  ;;  %v1312_v34 = vadd.f32 %v5144_v36, %v8153_v0  ;;  %v8528_v44 = vpop.f32.mrf.mxu1  ;;  %v2858_v15 = vsub.f32 %v8440_v63, %v10211_v2  ;;  %v8537_v42 = vand.u32 4294901760, %v276_v4  ;;  %v10213_v36 = vld [vmem:[#allocation7_spill] sm:$0xff]  ;;  %v9883_v2 = vand.u32 4294901760, %v8521_v8 }
 0x1cf   :  { %5734 = vmatprep.subr.msk.mxu1 %vm6252_vm15, %v9950_v61  ;;  %5593 = vmatprep.mubr.f32.mxu0 %v2839_v53  ;;  %v1305_v0 = vpop.f32.mrf.mxu0  ;;  %v278_v60 = vmul.f32 %v10214_v20, %v262_v25  ;;  %v10215_v25 = vld [vmem:[#allocation10_spill] sm:$0xff] }
 0x1d0   :  { %5655 = vmatprep.mubr.f32.mxu1 %v8460_v39  ;;  %5672 = vmatprep.subr.mxu0 %v10213_v36  ;;  %v8545_v51 = vadd.f32 %v8377_v19, %v1312_v34  ;;  %v1306_v53 = vadd.f32 %v1305_v0, %v1083_v57  ;;  %v8547_v52 = vpop.f32.mrf.mxu1  ;;  %v8556_v39 = vsub.f32 %v275_v48, %v8518_v38  ;;  %v8566_v57 = vld [vmem:[%s9623_s1 + $0x68] sm:$0xff]  ;;  %v6098_v19 = vld [vmem:[%s9622_s0 + $0x60] sm:$0xff]  ;;  %v2859_v0 = vand.u32 4294901760, %v2858_v15 }
 0x1d1   :  { %5735 = vmatpush3.msk.msra.mxu1 %vm6252_vm15, %v9950_v61  ;;  %5673 = vmatpush3.msra.mxu0 %v10213_v36  ;;  %v6099_v48 = vld [vmem:[%s9623_s1 + $0x60] sm:$0xff]  ;;  %v10217_v36 = vand.u32 4294901760, %v8488_v12 }
 0x1d2   :  { %v264_v5 = vsub.f32 %v6098_v19, %v6099_v48  ;;  %5736 = vmatprep.subr.msk.mxu1 %vm6271_vm1, %v9950_v61  ;;  %5674 = vmatprep.subr.mxu0 %v10215_v25  ;;  %v8581_v34 = vadd.f32 %v8396_v35, %v1306_v53  ;;  %v8589_v19 = vand.u32 4294901760, %v277_v17  ;;  %v8592_v48 = vsub.f32 %v276_v4, %v8537_v42 }
 0x1d3   :  { %5737 = vmatpush3.msk.msra.mxu1 %vm6271_vm1, %v9950_v61  ;;  %5594 = vmatmul.mubr.f32.gmra.mxu0 %v2849_v14  ;;  %v2868_v20 = vsub.f32 %v8488_v12, %v10217_v36  ;;  %v5147_v32 = vpop.f32.mrf.mxu0  ;;  %v751_v35 = vadd.f32 %v7947_v7, %v7998_v46  ;;  %v1099_v14 = vadd.f32 %v8128_v50, %v919_v33  ;;  %v8608_v36 = vand.u32 4294901760, %v278_v60  ;;  %v10219_v46 = vld [vmem:[#allocation77_spill] sm:$0xff]  ;;  %v10220_v50 = vld [vmem:[#allocation12_spill] sm:$0xff] }
 0x1d4   :  { %10216 = vst [vmem:[#allocation46_spill] sm:$0xff] %v8581_v34  ;;  %5656 = vmatmul.mubr.f32.gmra.mxu1 %v8518_v38  ;;  %5675 = vmatpush3.msra.mxu0 %v10215_v25  ;;  %v1324_v53 = vadd.f32 %v5147_v32, %v8180_v40  ;;  %v8599_v15 = vpop.f32.mrf.mxu1  ;;  %v2878_v4 = vsub.f32 %v8521_v8, %v9883_v2  ;;  %v10283_v41 = vand.u32 4294901760, %v8592_v48  ;;  %5960 = vrcp.f32 %v8545_v51 }
 0x1d5   :  { %5738 = vmatprep.subr.msk.mxu1 %vm10011_vm10, %v9950_v61  ;;  %5596 = vmatprep.mubr.f32.mxu0 %v2859_v0  ;;  %v10218_v7 = vsub.f32 %v8493_v21, %v8498_v45  ;;  %v1317_v32 = vpop.f32.mrf.mxu0  ;;  %v933_v33 = vadd.f32 %v8199_v58, %v751_v35  ;;  %v2869_v21 = vand.u32 4294901760, %v2868_v20  ;;  %v9885_v45 = vand.u32 4294901760, %v8592_v48  ;;  %v8635_v58 = vld [vmem:[%s9622_s0 + $0x78] sm:$0xff]  ;;  %v6102_v20 = vld [vmem:[%s9622_s0 + $0x70] sm:$0xff] }
 0x1d6   :  { %5658 = vmatprep.mubr.f32.mxu1 %v8537_v42  ;;  %5676 = vmatprep.subr.mxu0 %v10220_v50  ;;  %v8619_v0 = vadd.f32 %v8449_v13, %v1324_v53  ;;  %v1318_v2 = vadd.f32 %v1317_v32, %v1099_v14  ;;  %v8621_v34 = vpop.f32.mrf.mxu1  ;;  %v8630_v25 = vsub.f32 %v277_v17, %v8589_v19  ;;  %v6101_v13 = vld [vmem:[%s9623_s1 + $0x78] sm:$0xff]  ;;  %v6103_v17 = vld [vmem:[%s9623_s1 + $0x70] sm:$0xff]  ;;  %v10222_v53 = vld [vmem:[#allocation14_spill] sm:$0xff]  ;;  %v2879_v32 = vand.u32 4294901760, %v2878_v4 }
 0x1d7   :  { %v279_v40 = vmul.f32 %v10219_v46, %v10218_v7  ;;  %5739 = vmatpush3.msk.msra.mxu1 %vm10011_vm10, %v9950_v61  ;;  %5677 = vmatpush3.msra.mxu0 %v10220_v50  ;;  %v10221_v7 = vld [vmem:[#allocation78_spill] sm:$0xff]  ;;  %v267_v35 = vsub.f32 %v8635_v58, %v6101_v13  ;;  %v10223_v50 = vand.u32 4294901760, %v8556_v39  ;;  %v8663_v13 = vsub.f32 %v278_v60, %v8608_v36 }
 0x1d8   :  { %v280_v46 = vmul.f32 %v10221_v7, %v264_v5  ;;  %v266_v5 = vsub.f32 %v6102_v20, %v6103_v17  ;;  %5740 = vmatprep.subr.msk.mxu1 %vm10014_vm6, %v9950_v61  ;;  %5678 = vmatprep.subr.mxu0 %v10222_v53  ;;  %v8652_v14 = vadd.f32 %v8474_v43, %v1318_v2  ;;  %5962 = vlog2.f32 %v8545_v51 }
 0x1d9   :  { %5741 = vmatpush3.msk.msra.mxu1 %vm10014_vm6, %v9950_v61  ;;  %5597 = vmatmul.mubr.f32.gmra.mxu0 %v2869_v21  ;;  %v2888_v7 = vsub.f32 %v8556_v39, %v10223_v50  ;;  %v8660_v58 = vand.u32 4294901760, %v279_v40  ;;  %v5150_v20 = vpop.f32.mrf.mxu0  ;;  %v763_v43 = vadd.f32 %v7975_v47, %v8026_v28  ;;  %v1115_v21 = vadd.f32 %v8151_v23, %v933_v33  ;;  %v10225_v28 = vld [vmem:[#allocation81_spill] sm:$0xff]  ;;  %v10226_v23 = vld [vmem:[#allocation16_spill] sm:$0xff] }
 0x1da   :  { %5659 = vmatmul.mubr.f32.gmra.mxu1 %v8589_v19  ;;  %5679 = vmatpush3.msra.mxu0 %v10222_v53  ;;  %v1336_v2 = vadd.f32 %v5150_v20, %v8207_v49  ;;  %v8670_v4 = vpop.f32.mrf.mxu1  ;;  %v2898_v60 = vsub.f32 %v8592_v48, %v9885_v45  ;;  %v8679_v17 = vand.u32 4294901760, %v280_v46  ;;  %v10224_v47 = vsub.f32 %v8561_v31, %v8566_v57 }
 0x1db   :  { %5742 = vmatprep.subr.msk.mxu1 %vm6393_vm14, %v9950_v61  ;;  %5599 = vmatprep.mubr.f32.mxu0 %v2879_v32  ;;  %v1329_v50 = vpop.f32.mrf.mxu0  ;;  %v947_v33 = vadd.f32 %v8234_v56, %v763_v43  ;;  %v2889_v31 = vand.u32 4294901760, %v2888_v7  ;;  %v9886_v57 = vand.u32 4294901760, %v8663_v13  ;;  %v8701_v53 = vsub.f32 %v279_v40, %v8660_v58  ;;  %v10228_v56 = vld [vmem:[#allocation21_spill] sm:$0xff] }
 0x1dc   :  { %v281_v49 = vmul.f32 %v10225_v28, %v10224_v47  ;;  %5661 = vmatprep.mubr.f32.mxu1 %v8608_v36  ;;  %5680 = vmatprep.subr.mxu0 %v10226_v23  ;;  %v8690_v32 = vadd.f32 %v8528_v44, %v1336_v2  ;;  %v1330_v20 = vadd.f32 %v1329_v50, %v1115_v21  ;;  %v8692_v45 = vpop.f32.mrf.mxu1  ;;  %v10227_v47 = vld [vmem:[#allocation83_spill] sm:$0xff]  ;;  %v2899_v7 = vand.u32 4294901760, %v2898_v60 }
 0x1dd   :  { %5743 = vmatpush3.msk.msra.mxu1 %vm6393_vm14, %v9950_v61  ;;  %5681 = vmatpush3.msra.mxu0 %v10226_v23  ;;  %v282_v28 = vmul.f32 %v10227_v47, %v266_v5  ;;  %v10230_v5 = vand.u32 4294901760, %v8630_v25  ;;  %v8719_v2 = vsub.f32 %v280_v46, %v8679_v17  ;;  %v1131_v23 = vadd.f32 %v8178_v29, %v947_v33  ;;  %v10232_v47 = vld [vmem:[#allocation25_spill] sm:$0xff] }
 0x1de   :  { %5744 = vmatprep.subr.msk.mxu1 %vm6433_vm8, %v9950_v61  ;;  %5682 = vmatprep.subr.mxu0 %v10228_v56  ;;  %v8708_v44 = vadd.f32 %v8547_v52, %v1330_v20  ;;  %v8716_v43 = vand.u32 4294901760, %v281_v49  ;;  %v775_v52 = vadd.f32 %v8003_v1, %v8054_v3  ;;  %v2918_v46 = vsub.f32 %v8663_v13, %v9886_v57  ;;  %v10231_v1 = vld [vmem:[#allocation85_spill] sm:$0xff] }
 0x1df   :  { %5745 = vmatpush3.msk.msra.mxu1 %vm6433_vm8, %v9950_v61  ;;  %5600 = vmatmul.mubr.f32.gmra.mxu0 %v2889_v31  ;;  %v2908_v40 = vsub.f32 %v8630_v25, %v10230_v5  ;;  %v5153_v21 = vpop.f32.mrf.mxu0  ;;  %v8735_v20 = vand.u32 4294901760, %v282_v28  ;;  %v9887_v31 = vand.u32 4294901760, %v8701_v53  ;;  %v283_v3 = vmul.f32 %v10231_v1, %v267_v35  ;;  %v10233_v29 = vld [vmem:[#allocation61_spill] sm:$0xff] }
 0x1e0   :  { %10229 = vst [vmem:[#allocation49_spill] sm:$0xff] %v8708_v44  ;;  %5662 = vmatmul.mubr.f32.gmra.mxu1 %v8660_v58  ;;  %5683 = vmatpush3.msra.mxu0 %v10228_v56  ;;  %v1348_v50 = vadd.f32 %v5153_v21, %v8242_v16  ;;  %v8726_v60 = vpop.f32.mrf.mxu1  ;;  %v961_v33 = vadd.f32 %v10233_v29, %v775_v52  ;;  %v10240_v57 = vld [vmem:[#allocation17_spill] sm:$0xff]  ;;  %v10287_v10 = vand.u32 4294901760, %v8663_v13  ;;  %v10291_v55 = vand.u32 4294901760, %v8719_v2 }
 0x1e1   :  { %5746 = vmatprep.subr.msk.mxu1 %vm6447_vm13, %v9950_v61  ;;  %5602 = vmatprep.mubr.f32.mxu0 %v2899_v7  ;;  %v1341_v16 = vpop.f32.mrf.mxu0  ;;  %v2909_v35 = vand.u32 4294901760, %v2908_v40  ;;  %v8753_v1 = vsub.f32 %v281_v49, %v8716_v43  ;;  %v2919_v40 = vand.u32 4294901760, %v2918_v46  ;;  %v2928_v49 = vsub.f32 %v8701_v53, %v9887_v31 }
 0x1e2   :  { %5664 = vmatprep.mubr.f32.mxu1 %v8679_v17  ;;  %5684 = vmatprep.subr.mxu0 %v10232_v47  ;;  %v8743_v56 = vadd.f32 %v8599_v15, %v1348_v50  ;;  %v1342_v7 = vadd.f32 %v1341_v16, %v1131_v23  ;;  %v8745_v5 = vpop.f32.mrf.mxu1  ;;  %v10235_v15 = vld [vmem:[#allocation28_spill] sm:$0xff]  ;;  %v8768_v50 = vand.u32 4294901760, %v283_v3  ;;  %v8771_v23 = vsub.f32 %v282_v28, %v8735_v20 }
 0x1e3   :  { %5747 = vmatpush3.msk.msra.mxu1 %vm6447_vm13, %v9950_v61  ;;  %5685 = vmatpush3.msra.mxu0 %v10232_v47  ;;  %v10238_v47 = vld [vmem:[#allocation72_spill] sm:$0xff]  ;;  %v1147_v21 = vadd.f32 %v10240_v57, %v961_v33  ;;  %v10241_v28 = vand.u32 4294901760, %v8719_v2 }
 0x1e4   :  { %10234 = vst [vmem:[#allocation57_spill] sm:$0xff] %v8743_v56  ;;  %5748 = vmatprep.subr.msk.mxu1 %vm6465_vm2, %v9950_v61  ;;  %5686 = vmatprep.subr.mxu0 %v10235_v15  ;;  %v8760_v52 = vadd.f32 %v8621_v34, %v1342_v7  ;;  %v10237_v34 = vld [vmem:[#allocation80_spill] sm:$0xff]  ;;  %v10239_v7 = vld [vmem:[#allocation23_spill] sm:$0xff]  ;;  %v10295_v30 = vand.u32 4294901760, %v8771_v23 }
 0x1e5   :  { %5749 = vmatpush3.msk.msra.mxu1 %vm6465_vm2, %v9950_v61  ;;  %5603 = vmatmul.mubr.f32.gmra.mxu0 %v2909_v35  ;;  %v5156_v16 = vpop.f32.mrf.mxu0  ;;  %v787_v29 = vadd.f32 %v10238_v47, %v10237_v34  ;;  %v2938_v31 = vsub.f32 %v8719_v2, %v10241_v28  ;;  %v10242_v34 = vld [vmem:[#allocation29_spill] sm:$0xff]  ;;  %v8800_v28 = vsub.f32 %v283_v3, %v8768_v50 }
 0x1e6   :  { %10236 = vst [vmem:[#allocation51_spill] sm:$0xff] %v8760_v52  ;;  %5665 = vmatmul.mubr.f32.gmra.mxu1 %v8716_v43  ;;  %5687 = vmatpush3.msra.mxu0 %v10235_v15  ;;  %v1360_v35 = vadd.f32 %v5156_v16, %v10239_v7  ;;  %v8778_v46 = vpop.f32.mrf.mxu1  ;;  %v9890_v15 = vand.u32 4294901760, %v8753_v1  ;;  %v10249_v7 = vld [vmem:[#allocation19_spill] sm:$0xff] }
 0x1e7   :  { %5750 = vmatprep.subr.msk.mxu1 %vm6490_vm11, %v9950_v61  ;;  %5605 = vmatprep.mubr.f32.mxu0 %v2919_v40  ;;  %v1353_v52 = vpop.f32.mrf.mxu0  ;;  %v975_v16 = vadd.f32 %v8329_v11, %v787_v29  ;;  %v2929_v40 = vand.u32 4294901760, %v2928_v49  ;;  %v10244_v11 = vld [vmem:[#allocation32_spill] sm:$0xff]  ;;  %v10246_v49 = vld [vmem:[#allocation82_spill] sm:$0xff]  ;;  %v10247_v29 = vld [vmem:[#allocation75_spill] sm:$0xff] }
 0x1e8   :  { %5667 = vmatprep.mubr.f32.mxu1 %v8735_v20  ;;  %5688 = vmatprep.subr.mxu0 %v10242_v34  ;;  %v8792_v57 = vadd.f32 %v8670_v4, %v1360_v35  ;;  %v1354_v33 = vadd.f32 %v1353_v52, %v1147_v21  ;;  %v1538_v47 = vpop.f32.mrf.mxu1  ;;  %v2939_v21 = vand.u32 4294901760, %v2938_v31  ;;  %v2948_v3 = vsub.f32 %v8753_v1, %v9890_v15 }
 0x1e9   :  { %5751 = vmatpush3.msk.msra.mxu1 %vm6490_vm11, %v9950_v61  ;;  %5689 = vmatpush3.msra.mxu0 %v10242_v34  ;;  %v799_v35 = vadd.f32 %v10247_v29, %v10246_v49  ;;  %v10250_v31 = vand.u32 4294901760, %v8771_v23  ;;  %v10253_v49 = vld [vmem:[#allocation26_spill] sm:$0xff] }
 0x1ea   :  { %10243 = vst [vmem:[#allocation62_spill] sm:$0xff] %v8792_v57  ;;  %5752 = vmatprep.subr.msk.mxu1 %vm6517_vm3, %v9950_v61  ;;  %5690 = vmatprep.subr.mxu0 %v10244_v11  ;;  %v8807_v4 = vadd.f32 %v8692_v45, %v1354_v33  ;;  %v10248_v45 = vld [vmem:[#allocation58_spill] sm:$0xff]  ;;  %v10251_v57 = vld [vmem:[#allocation36_spill] sm:$0xff]  ;;  %v10254_v29 = vand.u32 4294901760, %v10253_v49 }
 0x1eb   :  { %5753 = vmatpush3.msk.msra.mxu1 %vm6517_vm3, %v9950_v61  ;;  %5606 = vmatmul.mubr.f32.gmra.mxu0 %v2929_v40  ;;  %v5159_v52 = vpop.f32.mrf.mxu0  ;;  %v2958_v40 = vsub.f32 %v8771_v23, %v10250_v31  ;;  %v10255_v31 = vld [vmem:[#allocation38_spill] sm:$0xff] }
 0x1ec   :  { %10245 = vst [vmem:[#allocation56_spill] sm:$0xff] %v8807_v4  ;;  %5668 = vmatmul.mubr.f32.gmra.mxu1 %v8768_v50  ;;  %5691 = vmatpush3.msra.mxu0 %v10244_v11  ;;  %v1372_v34 = vadd.f32 %v5159_v52, %v10248_v45  ;;  %v5221_v33 = vpop.f32.mrf.mxu1  ;;  %v1163_v4 = vadd.f32 %v10249_v7, %v975_v16  ;;  %v2949_v45 = vand.u32 4294901760, %v2948_v3  ;;  %v10258_v3 = vld [vmem:[#allocation33_spill] sm:$0xff] }
 0x1ed   :  { %5754 = vmatprep.subr.msk.mxu1 %vm6562_vm4, %v9950_v61  ;;  %5608 = vmatprep.mubr.f32.mxu0 %v2939_v21  ;;  %v1365_v11 = vpop.f32.mrf.mxu0  ;;  %v989_v16 = vadd.f32 %v8387_v24, %v799_v35  ;;  %v2959_v24 = vand.u32 4294901760, %v2958_v40  ;;  %v10259_v35 = vand.u32 4294901760, %v10258_v3 }
 0x1ee   :  { %5692 = vmatprep.subr.mxu0 %v10251_v57  ;;  %5755 = vmatpush3.msk.msra.mxu1 %vm6562_vm4, %v9950_v61  ;;  %v8834_v7 = vadd.f32 %v8726_v60, %v1372_v34  ;;  %v1366_v52 = vadd.f32 %v1365_v11, %v1163_v4  ;;  %v1550_v21 = vpop.f32.mrf.mxu1  ;;  %v10257_v60 = vand.u32 4294901760, %v8800_v28  ;;  %v10260_v34 = vld [vmem:[#allocation84_spill] sm:$0xff]  ;;  %v10261_v11 = vld [vmem:[#allocation79_spill] sm:$0xff] }
 0x1ef   :  { %5758 = vmatprep.mubr.f32.mxu1 %v10254_v29  ;;  %5693 = vmatpush3.msra.mxu0 %v10251_v57 }
 0x1f0   :  { %10252 = vst [vmem:[#allocation53_spill] sm:$0xff] %v8834_v7  ;;  %5756 = vmatprep.subr.msk.mxu1 %vm6587_vm0, %v9950_v61  ;;  %5694 = vmatprep.subr.mxu0 %v10255_v31  ;;  %v8844_v15 = vadd.f32 %v8745_v5, %v1366_v52  ;;  %v2968_v57 = vsub.f32 %v8800_v28, %v10257_v60  ;;  %v10262_v52 = vld [vmem:[#allocation39_spill] sm:$0xff]  ;;  %v10263_v7 = vld [vmem:[#allocation41_spill] sm:$0xff]  ;;  %v10265_v60 = vld [vmem:[#allocation42_spill] sm:$0xff] }
 0x1f1   :  { %5757 = vmatpush3.msk.msra.mxu1 %vm6587_vm0, %v9950_v61  ;;  %5609 = vmatmul.mubr.f32.gmra.mxu0 %v2949_v45  ;;  %v5162_v4 = vpop.f32.mrf.mxu0  ;;  %v811_v5 = vadd.f32 %v10261_v11, %v10260_v34  ;;  %v1179_v56 = vadd.f32 %v10263_v7, %v989_v16 }
 0x1f2   :  { %10256 = vst [vmem:[#allocation54_spill] sm:$0xff] %v8844_v15  ;;  %5695 = vmatpush3.msra.mxu0 %v10255_v31  ;;  %5759 = vmatmul.mubr.f32.vlgmr.msra.gmra.mxu1 %v10259_v35  ;;  %v1384_v29 = vadd.f32 %v5162_v4, %v10262_v52  ;;  %v5312_v15 = vpop.f32.mrf.mxu1  ;;  %v10266_v31 = vld [vmem:[#allocation35_spill] sm:$0xff]  ;;  %v2969_v16 = vand.u32 4294901760, %v2968_v57  ;;  %v10272_v52 = vld [vmem:[#allocation30_spill] sm:$0xff] }
 0x1f3   :  { %5838 = vmatprep.subr.msk.mxu1 %vm6188_vm5, %v9950_v61  ;;  %5611 = vmatprep.mubr.f32.mxu0 %v2959_v24  ;;  %v1377_v45 = vpop.f32.mrf.mxu0  ;;  %v10267_v44 = vand.u32 4294901760, %v10266_v31  ;;  %v1003_v35 = vadd.f32 %v8464_v18, %v811_v5  ;;  %v10269_v24 = vld [vmem:[#allocation45_spill] sm:$0xff] }
 0x1f4   :  { %5696 = vmatprep.subr.mxu0 %v10265_v60  ;;  %v8867_v34 = vadd.f32 %v8778_v46, %v1384_v29  ;;  %v1378_v4 = vadd.f32 %v1377_v45, %v1179_v56  ;;  %v1916_v11 = vpop.f32.mrf.mxu1  ;;  %5839 = vmatpush3.msk.msra.mxu1 %vm6188_vm5, %v9950_v61  ;;  %v10270_v56 = vand.u32 4294901760, %v8416_v6  ;;  %v10271_v46 = vld [vmem:[#allocation73_spill] sm:$0xff] }
 0x1f5   :  { %5761 = vmatprep.mubr.f32.mxu1 %v10267_v44  ;;  %5697 = vmatpush3.msra.mxu0 %v10265_v60  ;;  %v1195_v29 = vadd.f32 %v10272_v52, %v1003_v35  ;;  %v10275_v60 = vand.u32 4294901760, %v8440_v63 }
 0x1f6   :  { %5840 = vmatprep.subr.msk.mxu1 %vm6196_vm7, %v9950_v61  ;;  %5698 = vmatprep.subr.mxu0 %v10269_v24  ;;  %v8877_v44 = vadd.f32 %v1538_v47, %v1378_v4  ;;  %v10274_v47 = vld [vmem:[#allocation48_spill] sm:$0xff] }
 0x1f7   :  { %5841 = vmatpush3.msk.msra.mxu1 %vm6196_vm7, %v9950_v61  ;;  %5612 = vmatmul.mubr.f32.gmra.mxu0 %v2969_v16  ;;  %v5165_v18 = vpop.f32.mrf.mxu0 }
 0x1f8   :  { %5699 = vmatpush3.msra.mxu0 %v10269_v24  ;;  %5762 = vmatmul.mubr.f32.gmra.mxu1 %v10270_v56  ;;  %v1396_v57 = vadd.f32 %v5165_v18, %v10271_v46  ;;  %v5315_v5 = vpop.f32.mrf.mxu1  ;;  %v10277_v24 = vld [vmem:[#allocation9_spill] sm:$0xff]  ;;  %v10278_v18 = vand.u32 4294901760, %v8488_v12 }
 0x1f9   :  { %5842 = vmatprep.subr.msk.mxu1 %vm6212_vm9, %v9950_v61  ;;  %5700 = vmatprep.subr.mxu0 %v10274_v47  ;;  %v1389_v45 = vpop.f32.mrf.mxu0 }
 0x1fa   :  { %5702 = vmatprep.mubr.f32.mxu0 %v10253_v49  ;;  %5764 = vmatprep.mubr.f32.mxu1 %v10275_v60  ;;  %v8894_v4 = vadd.f32 %v5221_v33, %v1396_v57  ;;  %v1390_v16 = vadd.f32 %v1389_v45, %v1195_v29  ;;  %v1928_v7 = vpop.f32.mrf.mxu1  ;;  %v10279_v57 = vand.u32 4294901760, %v8521_v8 }
 0x1fb   :  { %5843 = vmatpush3.msk.msra.mxu1 %vm6212_vm9, %v9950_v61  ;;  %5701 = vmatpush3.msra.mxu0 %v10274_v47 }
 0x1fc   :  { %5844 = vmatprep.subr.msk.mxu1 %vm6228_vm12, %v9950_v61  ;;  %5782 = vmatprep.subr.mxu0 %v10277_v24  ;;  %v8904_v49 = vadd.f32 %v1550_v21, %v1390_v16  ;;  %v10286_v16 = vand.u32 4294901760, %v8630_v25 }
 0x1fd   :  { %5845 = vmatpush3.msk.msra.mxu1 %vm6228_vm12, %v9950_v61  ;;  %5703 = vmatmul.mubr.f32.vlgmr.msra.gmra.mxu0 %v10258_v3  ;;  %v5256_v33 = vpop.f32.mrf.mxu0  ;;  %v10280_v3 = vld [vmem:[#allocation11_spill] sm:$0xff] }
 0x1fe   :  { %5765 = vmatmul.mubr.f32.gmra.mxu1 %v10278_v18  ;;  %5783 = vmatpush3.msra.mxu0 %v10277_v24  ;;  %v8913_v56 = vadd.f32 %v5312_v15, %v5256_v33  ;;  %v5318_v46 = vpop.f32.mrf.mxu1  ;;  %v10281_v15 = vld [vmem:[#allocation13_spill] sm:$0xff] }
 0x1ff   :  { %5846 = vmatprep.subr.msk.mxu1 %vm6252_vm15, %v9950_v61  ;;  %5705 = vmatprep.mubr.f32.mxu0 %v10266_v31  ;;  %v1631_v21 = vpop.f32.mrf.mxu0 }
 0x200   :  { %5767 = vmatprep.mubr.f32.mxu1 %v10279_v57  ;;  %5784 = vmatprep.subr.mxu0 %v10280_v3  ;;  %v8922_v52 = vadd.f32 %v1916_v11, %v1631_v21  ;;  %v1940_v29 = vpop.f32.mrf.mxu1  ;;  %v10282_v11 = vand.u32 4294901760, %v8556_v39 }
 0x201   :  { %5847 = vmatpush3.msk.msra.mxu1 %vm6252_vm15, %v9950_v61  ;;  %5785 = vmatpush3.msra.mxu0 %v10280_v3 }
 0x202   :  { %5848 = vmatprep.subr.msk.mxu1 %vm6271_vm1, %v9950_v61  ;;  %5786 = vmatprep.subr.mxu0 %v10281_v15 }
 0x203   :  { %5849 = vmatpush3.msk.msra.mxu1 %vm6271_vm1, %v9950_v61  ;;  %5706 = vmatmul.mubr.f32.gmra.mxu0 %v8416_v6  ;;  %v5259_v31 = vpop.f32.mrf.mxu0  ;;  %v10284_v6 = vld [vmem:[#allocation15_spill] sm:$0xff] }
 0x204   :  { %5768 = vmatmul.mubr.f32.gmra.mxu1 %v10282_v11  ;;  %5787 = vmatpush3.msra.mxu0 %v10281_v15  ;;  %v8939_v37 = vadd.f32 %v5315_v5, %v5259_v31  ;;  %v5321_v40 = vpop.f32.mrf.mxu1  ;;  %v10294_v31 = vand.u32 4294901760, %v8753_v1 }
 0x205   :  { %5850 = vmatprep.subr.msk.mxu1 %vm10011_vm10, %v9950_v61  ;;  %5708 = vmatprep.mubr.f32.mxu0 %v8440_v63  ;;  %v1651_v47 = vpop.f32.mrf.mxu0  ;;  %v10285_v63 = vld [vmem:[#allocation18_spill] sm:$0xff] }
 0x206   :  { %5770 = vmatprep.mubr.f32.mxu1 %v10283_v41  ;;  %5788 = vmatprep.subr.mxu0 %v10284_v6  ;;  %v8948_v45 = vadd.f32 %v1928_v7, %v1651_v47  ;;  %v1952_v60 = vpop.f32.mrf.mxu1 }
 0x207   :  { %5851 = vmatpush3.msk.msra.mxu1 %vm10011_vm10, %v9950_v61  ;;  %5789 = vmatpush3.msra.mxu0 %v10284_v6 }
 0x208   :  { %5852 = vmatprep.subr.msk.mxu1 %vm10014_vm6, %v9950_v61  ;;  %5790 = vmatprep.subr.mxu0 %v10285_v63 }
 0x209   :  { %5853 = vmatpush3.msk.msra.mxu1 %vm10014_vm6, %v9950_v61  ;;  %5709 = vmatmul.mubr.f32.gmra.mxu0 %v8488_v12  ;;  %v5262_v5 = vpop.f32.mrf.mxu0  ;;  %v10288_v12 = vld [vmem:[#allocation20_spill] sm:$0xff] }
 0x20a   :  { %5771 = vmatmul.mubr.f32.gmra.mxu1 %v10286_v16  ;;  %5791 = vmatpush3.msra.mxu0 %v10285_v63  ;;  %v8965_v54 = vadd.f32 %v5318_v46, %v5262_v5  ;;  %v5324_v7 = vpop.f32.mrf.mxu1  ;;  %v10290_v46 = vand.u32 4294901760, %v8701_v53 }
 0x20b   :  { %5854 = vmatprep.subr.msk.mxu1 %vm6393_vm14, %v9950_v61  ;;  %5711 = vmatprep.mubr.f32.mxu0 %v8521_v8  ;;  %v1671_v35 = vpop.f32.mrf.mxu0  ;;  %v10289_v8 = vld [vmem:[#allocation24_spill] sm:$0xff] }
 0x20c   :  { %5773 = vmatprep.mubr.f32.mxu1 %v10287_v10  ;;  %5792 = vmatprep.subr.mxu0 %v10288_v12  ;;  %v8974_v24 = vadd.f32 %v1940_v29, %v1671_v35  ;;  %v1964_v33 = vpop.f32.mrf.mxu1  ;;  %v10301_v35 = vld [vmem:[#allocation44_spill] sm:$0xff] }
 0x20d   :  { %5855 = vmatpush3.msk.msra.mxu1 %vm6393_vm14, %v9950_v61  ;;  %5793 = vmatpush3.msra.mxu0 %v10288_v12 }
 0x20e   :  { %5856 = vmatprep.subr.msk.mxu1 %vm6433_vm8, %v9950_v61  ;;  %5794 = vmatprep.subr.mxu0 %v10289_v8 }
 0x20f   :  { %5857 = vmatpush3.msk.msra.mxu1 %vm6433_vm8, %v9950_v61  ;;  %5712 = vmatmul.mubr.f32.gmra.mxu0 %v8556_v39  ;;  %v5265_v18 = vpop.f32.mrf.mxu0  ;;  %v10292_v39 = vld [vmem:[#allocation27_spill] sm:$0xff] }
 0x210   :  { %5774 = vmatmul.mubr.f32.gmra.mxu1 %v10290_v46  ;;  %5795 = vmatpush3.msra.mxu0 %v10289_v8  ;;  %v8991_v27 = vadd.f32 %v5321_v40, %v5265_v18  ;;  %v5327_v21 = vpop.f32.mrf.mxu1  ;;  %v10304_v18 = vld [vmem:[#allocation64_spill] sm:$0xff]  ;;  %v10306_v46 = vld [vmem:[#allocation63_spill] sm:$0xff] }
 0x211   :  { %5858 = vmatprep.subr.msk.mxu1 %vm6447_vm13, %v9950_v61  ;;  %5714 = vmatprep.mubr.f32.mxu0 %v8592_v48  ;;  %v1691_v57 = vpop.f32.mrf.mxu0  ;;  %v10293_v48 = vld [vmem:[#allocation31_spill] sm:$0xff] }
 0x212   :  { %5776 = vmatprep.mubr.f32.mxu1 %v10291_v55  ;;  %5796 = vmatprep.subr.mxu0 %v10292_v39  ;;  %v9000_v3 = vadd.f32 %v1952_v60, %v1691_v57  ;;  %v1976_v29 = vpop.f32.mrf.mxu1  ;;  %v10298_v60 = vand.u32 4294901760, %v8800_v28  ;;  %v10308_v57 = vld [vmem:[#allocation67_spill] sm:$0xff] }
 0x213   :  { %5859 = vmatpush3.msk.msra.mxu1 %vm6447_vm13, %v9950_v61  ;;  %5797 = vmatpush3.msra.mxu0 %v10292_v39 }
 0x214   :  { %5860 = vmatprep.subr.msk.mxu1 %vm6465_vm2, %v9950_v61  ;;  %5798 = vmatprep.subr.mxu0 %v10293_v48 }
 0x215   :  { %5861 = vmatpush3.msk.msra.mxu1 %vm6465_vm2, %v9950_v61  ;;  %5715 = vmatmul.mubr.f32.gmra.mxu0 %v8630_v25  ;;  %v5268_v15 = vpop.f32.mrf.mxu0  ;;  %v10296_v25 = vld [vmem:[#allocation34_spill] sm:$0xff] }
 0x216   :  { %5777 = vmatmul.mubr.f32.gmra.mxu1 %v10294_v31  ;;  %5799 = vmatpush3.msra.mxu0 %v10293_v48  ;;  %v9017_v59 = vadd.f32 %v5324_v7, %v5268_v15  ;;  %v5330_v11 = vpop.f32.mrf.mxu1  ;;  %v10300_v7 = vld [vmem:[#allocation22_spill] sm:$0xff]  ;;  %v10310_v31 = vld [vmem:[#allocation43_spill] sm:$0xff] }
 0x217   :  { %5862 = vmatprep.subr.msk.mxu1 %vm6490_vm11, %v9950_v61  ;;  %5717 = vmatprep.mubr.f32.mxu0 %v8663_v13  ;;  %v1711_v40 = vpop.f32.mrf.mxu0  ;;  %v10297_v13 = vld [vmem:[#allocation37_spill] sm:$0xff] }
 0x218   :  { %5779 = vmatprep.mubr.f32.mxu1 %v10295_v30  ;;  %5800 = vmatprep.subr.mxu0 %v10296_v25  ;;  %v9026_v47 = vadd.f32 %v1964_v33, %v1711_v40  ;;  %v1988_v41 = vpop.f32.mrf.mxu1  ;;  %v10303_v33 = vld [vmem:[#allocation47_spill] sm:$0xff] }
 0x219   :  { %5863 = vmatpush3.msk.msra.mxu1 %vm6490_vm11, %v9950_v61  ;;  %5801 = vmatpush3.msra.mxu0 %v10296_v25 }
 0x21a   :  { %5864 = vmatprep.subr.msk.mxu1 %vm6517_vm3, %v9950_v61  ;;  %5802 = vmatprep.subr.mxu0 %v10297_v13 }
 0x21b   :  { %5865 = vmatpush3.msk.msra.mxu1 %vm6517_vm3, %v9950_v61  ;;  %5718 = vmatmul.mubr.f32.gmra.mxu0 %v8701_v53  ;;  %v5271_v6 = vpop.f32.mrf.mxu0 }
 0x21c   :  { %5780 = vmatmul.mubr.f32.gmra.mxu1 %v10298_v60  ;;  %5803 = vmatpush3.msra.mxu0 %v10297_v13  ;;  %v9043_v62 = vadd.f32 %v5327_v21, %v5271_v6  ;;  %v5333_v63 = vpop.f32.mrf.mxu1  ;;  %v10307_v21 = vld [vmem:[#allocation52_spill] sm:$0xff] }
 0x21d   :  { %5866 = vmatprep.subr.msk.mxu1 %vm6562_vm4, %v9950_v61  ;;  %5720 = vmatprep.mubr.f32.mxu0 %v8719_v2  ;;  %v1731_v5 = vpop.f32.mrf.mxu0  ;;  %v10302_v2 = vld [vmem:[#allocation59_spill] sm:$0xff] }
 0x21e   :  { %5804 = vmatprep.subr.mxu0 %v10299_v22  ;;  %5867 = vmatpush3.msk.msra.mxu1 %vm6562_vm4, %v9950_v61  ;;  %v9053_v53 = vadd.f32 %v1976_v29, %v1731_v5  ;;  %v2000_v16 = vpop.f32.mrf.mxu1 }
 0x21f   :  { %5870 = vmatprep.mubr.f32.mxu1 %v10300_v7  ;;  %5805 = vmatpush3.msra.mxu0 %v10299_v22 }
 0x220   :  { %5868 = vmatprep.subr.msk.mxu1 %vm6587_vm0, %v9950_v61  ;;  %5806 = vmatprep.subr.mxu0 %v10301_v35 }
 0x221   :  { %5869 = vmatpush3.msk.msra.mxu1 %vm6587_vm0, %v9950_v61  ;;  %5721 = vmatmul.mubr.f32.gmra.mxu0 %v8753_v1  ;;  %v5274_v9 = vpop.f32.mrf.mxu0  ;;  %v10305_v1 = vld [vmem:[#allocation50_spill] sm:$0xff] }
 0x222   :  { %5807 = vmatpush3.msra.mxu0 %v10301_v35  ;;  %5871 = vmatmul.mubr.f32.vlgmr.msra.gmra.mxu1 %v10302_v2  ;;  %v9067_v10 = vadd.f32 %v5330_v11, %v5274_v9  ;;  %v5424_v12 = vpop.f32.mrf.mxu1 }
 0x223   :  { %5723 = vmatprep.mubr.f32.mxu0 %v8771_v23  ;;  %5808 = vmatprep.subr.mxu0 %v10303_v33  ;;  %v1751_v8 = vpop.f32.mrf.mxu0 }
 0x224   :  { %5873 = vmatprep.mubr.f32.mxu1 %v10304_v18  ;;  %5809 = vmatpush3.msra.mxu0 %v10303_v33  ;;  %v9073_v61 = vadd.f32 %v1988_v41, %v1751_v8  ;;  %v2272_v26 = vpop.f32.mrf.mxu1 }
 0x225   :  { %5810 = vmatprep.subr.mxu0 %v10305_v1  ;;  %5724 = vmatmul.mubr.f32.gmra.mxu0 %v8800_v28  ;;  %v10309_v28 = vld [vmem:[#allocation70_spill] sm:$0xff] }
 0x226   :  { %5811 = vmatpush3.msra.mxu0 %v10305_v1  ;;  %5874 = vmatmul.mubr.f32.gmra.mxu1 %v10306_v46 }
 0x227   :  { %5812 = vmatprep.subr.mxu0 %v10307_v21  ;;  %5814 = vmatprep.mubr.f32.mxu0 %v10300_v7  ;;  %v5277_v23 = vpop.f32.mrf.mxu0 }
 0x228   :  { %5876 = vmatprep.mubr.f32.mxu1 %v10308_v57  ;;  %5813 = vmatpush3.msra.mxu0 %v10307_v21  ;;  %v9083_v55 = vadd.f32 %v5333_v63, %v5277_v23  ;;  %v5427_v39 = vpop.f32.mrf.mxu1 }
 0x229   :  { %5815 = vmatmul.mubr.f32.vlgmr.msra.gmra.mxu0 %v10302_v2  ;;  %v1771_v29 = vpop.f32.mrf.mxu0 }
 0x22a   :  { %5877 = vmatmul.mubr.f32.gmra.mxu1 %v10309_v28  ;;  %5817 = vmatprep.mubr.f32.mxu0 %v10304_v18  ;;  %v9088_v48 = vadd.f32 %v2000_v16, %v1771_v29  ;;  %v2288_v15 = vpop.f32.mrf.mxu1 }
 0x22b   :  { %5879 = vmatprep.mubr.f32.mxu1 %v10310_v31 }
 0x22d   :  { %5818 = vmatmul.mubr.f32.gmra.mxu0 %v10306_v46  ;;  %v5368_v11 = vpop.f32.mrf.mxu0 }
 0x22e   :  { %5880 = vmatmul.mubr.f32.gmra.mxu1 %v8518_v38  ;;  %5820 = vmatprep.mubr.f32.mxu0 %v10308_v57  ;;  %v2102_v40 = vadd.f32 %v5368_v11, %v8913_v56  ;;  %v5430_v30 = vpop.f32.mrf.mxu1 }
 0x22f   :  { %5882 = vmatprep.mubr.f32.mxu1 %v8537_v42  ;;  %v2094_v25 = vpop.f32.mrf.mxu0 }
 0x230   :  { %v2095_v41 = vadd.f32 %v2094_v25, %v8922_v52  ;;  %v2304_v13 = vpop.f32.mrf.mxu1  ;;  %v9097_v6 = vadd.f32 %v5424_v12, %v2102_v40 }
 0x231   :  { %5821 = vmatmul.mubr.f32.gmra.mxu0 %v10309_v28 }
 0x232   :  { %5883 = vmatmul.mubr.f32.gmra.mxu1 %v8589_v19  ;;  %5823 = vmatprep.mubr.f32.mxu0 %v10310_v31  ;;  %v9102_v60 = vadd.f32 %v2272_v26, %v2095_v41 }
 0x233   :  { %5885 = vmatprep.mubr.f32.mxu1 %v8608_v36  ;;  %v5371_v56 = vpop.f32.mrf.mxu0 }
 0x234   :  { %v2116_v63 = vadd.f32 %v5371_v56, %v8939_v37  ;;  %v5433_v5 = vpop.f32.mrf.mxu1 }
 0x235   :  { %5824 = vmatmul.mubr.f32.gmra.mxu0 %v8518_v38  ;;  %v2108_v52 = vpop.f32.mrf.mxu0 }
 0x236   :  { %5886 = vmatmul.mubr.f32.gmra.mxu1 %v8660_v58  ;;  %5826 = vmatprep.mubr.f32.mxu0 %v8537_v42  ;;  %v2109_v22 = vadd.f32 %v2108_v52, %v8948_v45  ;;  %v2320_v16 = vpop.f32.mrf.mxu1  ;;  %v9110_v7 = vadd.f32 %v5427_v39, %v2116_v63 }
 0x237   :  { %5888 = vmatprep.mubr.f32.mxu1 %v8679_v17 }
 0x238   :  { %v9113_v35 = vadd.f32 %v2288_v15, %v2109_v22 }
 0x239   :  { %5827 = vmatmul.mubr.f32.gmra.mxu0 %v8589_v19  ;;  %v5374_v37 = vpop.f32.mrf.mxu0 }
 0x23a   :  { %5889 = vmatmul.mubr.f32.gmra.mxu1 %v8716_v43  ;;  %5829 = vmatprep.mubr.f32.mxu0 %v8608_v36  ;;  %v2130_v38 = vadd.f32 %v5374_v37, %v8965_v54  ;;  %v5436_v9 = vpop.f32.mrf.mxu1 }
 0x23b   :  { %5891 = vmatprep.mubr.f32.mxu1 %v8735_v20  ;;  %v2122_v42 = vpop.f32.mrf.mxu0 }
 0x23c   :  { %v2123_v45 = vadd.f32 %v2122_v42, %v8974_v24  ;;  %v2336_v2 = vpop.f32.mrf.mxu1  ;;  %v9121_v12 = vadd.f32 %v5430_v30, %v2130_v38 }
 0x23d   :  { %5830 = vmatmul.mubr.f32.gmra.mxu0 %v8660_v58 }
 0x23e   :  { %5892 = vmatmul.mubr.f32.gmra.mxu1 %v8768_v50  ;;  %5832 = vmatprep.mubr.f32.mxu0 %v8679_v17  ;;  %v9126_v19 = vadd.f32 %v2304_v13, %v2123_v45 }
 0x23f   :  { %v5377_v36 = vpop.f32.mrf.mxu0 }
 0x240   :  { %v2144_v54 = vadd.f32 %v5377_v36, %v8991_v27  ;;  %v5439_v33 = vpop.f32.mrf.mxu1 }
 0x241   :  { %5833 = vmatmul.mubr.f32.gmra.mxu0 %v8716_v43  ;;  %v2136_v8 = vpop.f32.mrf.mxu0 }
 0x242   :  { %5835 = vmatprep.mubr.f32.mxu0 %v8735_v20  ;;  %v2137_v24 = vadd.f32 %v2136_v8, %v9000_v3  ;;  %v2352_v18 = vpop.f32.mrf.mxu1  ;;  %v2329_v26 = vadd.f32 %v5433_v5, %v2144_v54 }
 0x244   :  { %v9132_v58 = vadd.f32 %v2320_v16, %v2137_v24 }
 0x245   :  { %5836 = vmatmul.mubr.f32.gmra.mxu0 %v8768_v50  ;;  %v5380_v17 = vpop.f32.mrf.mxu0 }
 0x246   :  { %v2158_v1 = vadd.f32 %v5380_v17, %v9017_v59  ;;  %v5442_v46 = vpop.f32.mrf.mxu1 }
 0x247   :  { %v2150_v21 = vpop.f32.mrf.mxu0 }
 0x248   :  { %v2151_v27 = vadd.f32 %v2150_v21, %v9026_v47  ;;  %v2368_v23 = vpop.f32.mrf.mxu1  ;;  %v2345_v43 = vadd.f32 %v5436_v9, %v2158_v1 }
 0x24a   :  { %v2337_v57 = vadd.f32 %v2336_v2, %v2151_v27 }
 0x24b   :  { %v5383_v39 = vpop.f32.mrf.mxu0 }
 0x24c   :  { %v2172_v20 = vadd.f32 %v5383_v39, %v9043_v62  ;;  %v5445_v3 = vpop.f32.mrf.mxu1 }
 0x24d   :  { %v2164_v29 = vpop.f32.mrf.mxu0 }
 0x24e   :  { %v2165_v28 = vadd.f32 %v2164_v29, %v9053_v53  ;;  %v2384_v15 = vpop.f32.mrf.mxu1  ;;  %v2361_v31 = vadd.f32 %v5439_v33, %v2172_v20 }
 0x250   :  { %v2353_v50 = vadd.f32 %v2352_v18, %v2165_v28 }
 0x251   :  { %v5386_v11 = vpop.f32.mrf.mxu0 }
 0x252   :  { %v2186_v59 = vadd.f32 %v5386_v11, %v9067_v10  ;;  %v5536_v40 = vpop.f32.mrf.mxu1 }
 0x253   :  { %v2178_v30 = vpop.f32.mrf.mxu0 }
 0x254   :  { %v2179_v47 = vadd.f32 %v2178_v30, %v9073_v61  ;;  %v2656_v25 = vpop.f32.mrf.mxu1  ;;  %v2377_v41 = vadd.f32 %v5442_v46, %v2186_v59 }
 0x256   :  { %v2369_v13 = vadd.f32 %v2368_v23, %v2179_v47 }
 0x257   :  { %v5389_v56 = vpop.f32.mrf.mxu0 }
 0x258   :  { %v2200_v62 = vadd.f32 %v5389_v56, %v9083_v55  ;;  %v5539_v63 = vpop.f32.mrf.mxu1 }
 0x259   :  { %v2192_v5 = vpop.f32.mrf.mxu0 }
 0x25a   :  { %v2193_v53 = vadd.f32 %v2192_v5, %v9088_v48  ;;  %v2668_v52 = vpop.f32.mrf.mxu1  ;;  %v2393_v22 = vadd.f32 %v5445_v3, %v2200_v62 }
 0x25c   :  { %v2385_v16 = vadd.f32 %v2384_v15, %v2193_v53 }
 0x25d   :  { %v5480_v37 = vpop.f32.mrf.mxu0 }
 0x25e   :  { %v2502_v10 = vadd.f32 %v5480_v37, %v9097_v6  ;;  %v5542_v38 = vpop.f32.mrf.mxu1 }
 0x25f   :  { %v2495_v9 = vpop.f32.mrf.mxu0 }
 0x260   :  { %v9144_v42 = vadd.f32 %v5536_v40, %v2502_v10  ;;  %v2496_v61 = vadd.f32 %v2495_v9, %v9102_v60  ;;  %v2680_v45 = vpop.f32.mrf.mxu1 }
 0x262   :  { %v9147_v2 = vadd.f32 %v2656_v25, %v2496_v61 }
 0x263   :  { %v5483_v55 = vpop.f32.mrf.mxu0 }
 0x264   :  { %v2514_v36 = vadd.f32 %v5483_v55, %v9110_v7  ;;  %v5545_v54 = vpop.f32.mrf.mxu1 }
 0x265   :  { %v2507_v48 = vpop.f32.mrf.mxu0 }
 0x266   :  { %v9150_v33 = vadd.f32 %v5539_v63, %v2514_v36  ;;  %v2508_v8 = vadd.f32 %v2507_v48, %v9113_v35  ;;  %v2692_v24 = vpop.f32.mrf.mxu1 }
 0x268   :  { %v9153_v6 = vadd.f32 %v2668_v52, %v2508_v8 }
 0x269   :  { %v5486_v18 = vpop.f32.mrf.mxu0 }
 0x26a   :  { %v2526_v17 = vadd.f32 %v5486_v18, %v9121_v12  ;;  %v5548_v1 = vpop.f32.mrf.mxu1 }
 0x26b   :  { %v2519_v60 = vpop.f32.mrf.mxu0 }
 0x26c   :  { %v9156_v46 = vadd.f32 %v5542_v38, %v2526_v17  ;;  %v2520_v21 = vadd.f32 %v2519_v60, %v9126_v19  ;;  %v2704_v27 = vpop.f32.mrf.mxu1 }
 0x26e   :  { %v9159_v7 = vadd.f32 %v2680_v45, %v2520_v21 }
 0x26f   :  { %v5489_v23 = vpop.f32.mrf.mxu0 }
 0x270   :  { %v2538_v39 = vadd.f32 %v5489_v23, %v2329_v26  ;;  %v5551_v20 = vpop.f32.mrf.mxu1 }
 0x271   :  { %v2531_v3 = vpop.f32.mrf.mxu0 }
 0x272   :  { %v9161_v35 = vadd.f32 %v5545_v54, %v2538_v39  ;;  %v2532_v29 = vadd.f32 %v2531_v3, %v9132_v58  ;;  %v2716_v28 = vpop.f32.mrf.mxu1 }
 0x274   :  { %v9164_v15 = vadd.f32 %v2692_v24, %v2532_v29 }
 0x275   :  { %v5492_v12 = vpop.f32.mrf.mxu0 }
 0x276   :  { %v2550_v11 = vadd.f32 %v5492_v12, %v2345_v43  ;;  %v5554_v59 = vpop.f32.mrf.mxu1 }
 0x277   :  { %v2543_v40 = vpop.f32.mrf.mxu0 }
 0x278   :  { %v9166_v30 = vadd.f32 %v5548_v1, %v2550_v11  ;;  %v2544_v19 = vadd.f32 %v2543_v40, %v2337_v57  ;;  %v2728_v47 = vpop.f32.mrf.mxu1 }
 0x27a   :  { %v9168_v25 = vadd.f32 %v2704_v27, %v2544_v19 }
 0x27b   :  { %v5495_v26 = vpop.f32.mrf.mxu0 }
 0x27c   :  { %v2562_v56 = vadd.f32 %v5495_v26, %v2361_v31  ;;  %v5557_v62 = vpop.f32.mrf.mxu1 }
 0x27d   :  { %v2555_v63 = vpop.f32.mrf.mxu0 }
 0x27e   :  { %v9170_v5 = vadd.f32 %v5551_v20, %v2562_v56  ;;  %v2556_v58 = vadd.f32 %v2555_v63, %v2353_v50  ;;  %v2740_v53 = vpop.f32.mrf.mxu1 }
 0x280   :  { %v9172_v52 = vadd.f32 %v2716_v28, %v2556_v58 }
 0x281   :  { %v5498_v37 = vpop.f32.mrf.mxu0 }
 0x282   :  { %v2574_v43 = vadd.f32 %v5498_v37, %v2377_v41  ;;  %v9174_v10 = vpop.f32.mrf.mxu1 }
 0x283   :  { %v2567_v38 = vpop.f32.mrf.mxu0 }
 0x284   :  { %v9176_v9 = vadd.f32 %v5554_v59, %v2574_v43  ;;  %v2568_v57 = vadd.f32 %v2567_v38, %v2369_v13  ;;  %v9178_v61 = vpop.f32.mrf.mxu1  ;;  %v10322_v38 = vld [vmem:[#allocation46_spill] sm:$0xff] }
 0x285   :  { %5964 = vrcp.f32 %v10322_v38 }
 0x286   :  { %v9180_v45 = vadd.f32 %v2728_v47, %v2568_v57  ;;  %5966 = vlog2.f32 %v10322_v38  ;;  %v10327_v38 = vld [vmem:[#allocation49_spill] sm:$0xff] }
 0x287   :  { %v5501_v31 = vpop.f32.mrf.mxu0  ;;  %5968 = vrcp.f32 %v8619_v0 }
 0x288   :  { %v2586_v55 = vadd.f32 %v5501_v31, %v2393_v22  ;;  %v9182_v36 = vpop.f32.mrf.mxu1  ;;  %5970 = vlog2.f32 %v8619_v0  ;;  %v10328_v0 = vld [vmem:[#allocation57_spill] sm:$0xff] }
 0x289   :  { %v2579_v50 = vpop.f32.mrf.mxu0  ;;  %5972 = vrcp.f32 %v8652_v14 }
 0x28a   :  { %v9184_v54 = vadd.f32 %v5557_v62, %v2586_v55  ;;  %v2580_v48 = vadd.f32 %v2579_v50, %v2385_v16  ;;  %v9186_v8 = vpop.f32.mrf.mxu1  ;;  %5974 = vlog2.f32 %v8652_v14 }
 0x28b   :  { %5976 = vrcp.f32 %v8690_v32 }
 0x28c   :  { %v9188_v41 = vadd.f32 %v2740_v53, %v2580_v48  ;;  %5978 = vlog2.f32 %v8690_v32 }
 0x28d   :  { %v9190_v24 = vpop.f32.mrf.mxu0  ;;  %5980 = vrcp.f32 %v10327_v38 }
 0x28e   :  { %v9192_v18 = vpop.f32.mrf.mxu1  ;;  %5982 = vlog2.f32 %v10327_v38 }
 0x28f   :  { %v9194_v13 = vpop.f32.mrf.mxu0  ;;  %5984 = vrcp.f32 %v10328_v0 }
 0x290   :  { %v9196_v17 = vpop.f32.mrf.mxu1  ;;  %5986 = vlog2.f32 %v10328_v0  ;;  %v10337_v0 = vld [vmem:[#allocation53_spill] sm:$0xff] }
 0x293   :  { %v9198_v1 = vpop.f32.mrf.mxu0 }
 0x294   :  { %v9200_v22 = vpop.f32.mrf.mxu1 }
 0x295   :  { %v9202_v60 = vpop.f32.mrf.mxu0 }
 0x296   :  { %v9204_v21 = vpop.f32.mrf.mxu1 }
 0x299   :  { %v9206_v16 = vpop.f32.mrf.mxu0 }
 0x29a   :  { %v9208_v27 = vpop.f32.mrf.mxu1 }
 0x29b   :  { %v9210_v23 = vpop.f32.mrf.mxu0 }
 0x29c   :  { %v9212_v39 = vpop.f32.mrf.mxu1 }
 0x29f   :  { %v9214_v20 = vpop.f32.mrf.mxu0 }
 0x2a0   :  { %v9216_v3 = vpop.f32.mrf.mxu1 }
 0x2a1   :  { %10311 = vst [vmem:[#allocation60_spill] sm:$0xff] %v9216_v3  ;;  %v9218_v29 = vpop.f32.mrf.mxu0 }
 0x2a2   :  { %v9220_v28 = vpop.f32.mrf.mxu1 }
 0x2a3   :  { %10312 = vst [vmem:[#allocation66_spill] sm:$0xff] %v9220_v28 }
 0x2a5   :  { %v9222_v12 = vpop.f32.mrf.mxu0 }
 0x2a6   :  { %v9224_v11 = vpop.f32.mrf.mxu1 }
 0x2a7   :  { %10313 = vst [vmem:[#allocation55_spill] sm:$0xff] %v9224_v11  ;;  %v9226_v59 = vpop.f32.mrf.mxu0 }
 0x2a8   :  { %v9228_v40 = vpop.f32.mrf.mxu1 }
 0x2a9   :  { %10314 = vst [vmem:[#allocation65_spill] sm:$0xff] %v9228_v40  ;;  %v10335_v40 = vld [vmem:[#allocation56_spill] sm:$0xff] }
 0x2ab   :  { %v9230_v19 = vpop.f32.mrf.mxu0 }
 0x2ac   :  { %v9232_v47 = vpop.f32.mrf.mxu1 }
 0x2ad   :  { %10315 = vst [vmem:[#allocation69_spill] sm:$0xff] %v9232_v47  ;;  %v9234_v26 = vpop.f32.mrf.mxu0  ;;  %v10331_v47 = vld [vmem:[#allocation51_spill] sm:$0xff] }
 0x2ae   :  { %10316 = vst [vmem:[#allocation68_spill] sm:$0xff] %v9234_v26  ;;  %v9236_v56 = vpop.f32.mrf.mxu1  ;;  %5988 = vlog2.f32 %v10331_v47 }
 0x2af   :  { %10317 = vst [vmem:[#allocation71_spill] sm:$0xff] %v9236_v56 }
 0x2b1   :  { %v9238_v62 = vpop.f32.mrf.mxu0 }
 0x2b2   :  { %10318 = vst [vmem:[#allocation5_spill] sm:$0xff] %v9238_v62  ;;  %v9240_v63 = vpop.f32.mrf.mxu1 }
 0x2b3   :  { %v9242_v58 = vpop.f32.mrf.mxu0 }
 0x2b4   :  { %10319 = vst [vmem:[#allocation74_spill] sm:$0xff] %v9242_v58  ;;  %v9244_v53 = vpop.f32.mrf.mxu1  ;;  %v10338_v58 = vld [vmem:[#allocation54_spill] sm:$0xff] }
 0x2b7   :  { %v9247_v37 = vpop.f32.mrf.mxu0 }
 0x2b8   :  { %10320 = vst [vmem:[#allocation7_spill] sm:$0xff] %v9247_v37  ;;  %v9250_v43 = vpop.f32.mrf.mxu1  ;;  %v10333_v37 = vld [vmem:[#allocation62_spill] sm:$0xff] }
 0x2b9   :  { %10321 = vst [vmem:[#allocation76_spill] sm:$0xff] %v9250_v43  ;;  %v9253_v57 = vpop.f32.mrf.mxu0  ;;  %5990 = vlog2.f32 %v10333_v37 }
 0x2ba   :  { %10323 = vst [vmem:[#allocation10_spill] sm:$0xff] %v9253_v57  ;;  %v9256_v31 = vpop.f32.mrf.mxu1  ;;  %v9277_v57 = vpop.eup %5960  ;;  %5992 = vlog2.f32 %v10335_v40 }
 0x2bb   :  { %10324 = vst [vmem:[#allocation77_spill] sm:$0xff] %v9256_v31  ;;  %10329 = vst [vmem:[#allocation14_spill] sm:$0xff] %v9277_v57 }
 0x2bd   :  { %v9261_v55 = vpop.f32.mrf.mxu0 }
 0x2be   :  { %v9264_v51 = vpop.f32.mrf.mxu1 }
 0x2bf   :  { %10325 = vst [vmem:[#allocation12_spill] sm:$0xff] %v9264_v51  ;;  %v9267_v50 = vpop.f32.mrf.mxu0  ;;  %v9282_v51 = vpop.eup %5962  ;;  %5994 = vlog2.f32 %v10337_v0 }
 0x2c0   :  { %v9270_v48 = vpop.f32.mrf.mxu1 }
 0x2c1   :  { %10326 = vst [vmem:[#allocation78_spill] sm:$0xff] %v9270_v48  ;;  %v9287_v48 = vpop.eup %5964  ;;  %5996 = vlog2.f32 %v10338_v58 }
 0x2c2   :  { %10332 = vst [vmem:[#allocation16_spill] sm:$0xff] %v9287_v48  ;;  %v9292_v31 = vpop.eup %5966  ;;  %5998 = vlog2.f32 %v8867_v34 }
 0x2c3   :  { %v9275_v56 = vpop.f32.mrf.mxu0  ;;  %v9295_v57 = vpop.eup %5968  ;;  %6000 = vlog2.f32 %v8877_v44 }
 0x2c4   :  { %v9280_v14 = vpop.f32.mrf.mxu1  ;;  %10336 = vst [vmem:[#allocation21_spill] sm:$0xff] %v9295_v57 }
 0x2c5   :  { %10330 = vst [vmem:[#allocation81_spill] sm:$0xff] %v9280_v14  ;;  %v9285_v32 = vpop.f32.mrf.mxu0  ;;  %v5971_v14 = vpop.eup %5970  ;;  %6002 = vlog2.f32 %v8894_v4 }
 0x2c6   :  { %v9290_v38 = vpop.f32.mrf.mxu1  ;;  %v9301_v62 = vpop.eup %5972  ;;  %6004 = vlog2.f32 %v9144_v42 }
 0x2c7   :  { %10334 = vst [vmem:[#allocation83_spill] sm:$0xff] %v9290_v38  ;;  %10340 = vst [vmem:[#allocation25_spill] sm:$0xff] %v9301_v62  ;;  %v5975_v38 = vpop.eup %5974  ;;  %6006 = vlog2.f32 %v9147_v2 }
 0x2c8   :  { %v9309_v26 = vpop.eup %5976  ;;  %6008 = vlog2.f32 %v9150_v33 }
 0x2c9   :  { %v9299_v11 = vpop.f32.mrf.mxu0  ;;  %10343 = vst [vmem:[#allocation80_spill] sm:$0xff] %v9309_v26  ;;  %v5979_v43 = vpop.eup %5978  ;;  %6010 = vlog2.f32 %v9153_v6 }
 0x2ca   :  { %10339 = vst [vmem:[#allocation85_spill] sm:$0xff] %v9299_v11  ;;  %v9304_v48 = vpop.f32.mrf.mxu1  ;;  %v9315_v11 = vpop.eup %5980  ;;  %6012 = vlog2.f32 %v9156_v46 }
 0x2cb   :  { %10341 = vst [vmem:[#allocation61_spill] sm:$0xff] %v9304_v48  ;;  %v9307_v28 = vpop.f32.mrf.mxu0  ;;  %10345 = vst [vmem:[#allocation23_spill] sm:$0xff] %v9315_v11  ;;  %v5983_v62 = vpop.eup %5982  ;;  %6014 = vlog2.f32 %v9159_v7 }
 0x2cc   :  { %10342 = vst [vmem:[#allocation28_spill] sm:$0xff] %v9307_v28  ;;  %v9312_v57 = vpop.f32.mrf.mxu1  ;;  %v9321_v3 = vpop.eup %5984  ;;  %6016 = vlog2.f32 %v9161_v35 }
 0x2cd   :  { %10344 = vst [vmem:[#allocation72_spill] sm:$0xff] %v9312_v57  ;;  %10347 = vst [vmem:[#allocation29_spill] sm:$0xff] %v9321_v3  ;;  %v5987_v28 = vpop.eup %5986  ;;  %6018 = vlog2.f32 %v9164_v15 }
 0x2ce   :  { %v5989_v42 = vpop.eup %5988  ;;  %6020 = vlog2.f32 %v9166_v30 }
 0x2cf   :  { %v9319_v48 = vpop.f32.mrf.mxu0  ;;  %v5991_v11 = vpop.eup %5990  ;;  %6022 = vlog2.f32 %v9168_v25 }
 0x2d0   :  { %10346 = vst [vmem:[#allocation17_spill] sm:$0xff] %v9319_v48  ;;  %v9324_v26 = vpop.f32.mrf.mxu1  ;;  %v5993_v33 = vpop.eup %5992  ;;  %6024 = vlog2.f32 %v9170_v5  ;;  %v9373_v48 = vmul.f32 0.6931472, %v5983_v62 }
 0x2d1   :  { %10348 = vst [vmem:[#allocation32_spill] sm:$0xff] %v9324_v26  ;;  %v9327_v57 = vpop.f32.mrf.mxu0  ;;  %v5995_v3 = vpop.eup %5994  ;;  %6026 = vlog2.f32 %v9172_v52 }
 0x2d2   :  { %10349 = vst [vmem:[#allocation82_spill] sm:$0xff] %v9327_v57  ;;  %v9330_v2 = vpop.f32.mrf.mxu1  ;;  %v5997_v26 = vpop.eup %5996  ;;  %6028 = vlog2.f32 %v9176_v9  ;;  %v9358_v9 = vmul.f32 0.6931472, %v9282_v51  ;;  %v9375_v51 = vmul.f32 0.6931472, %v5987_v28 }
 0x2d3   :  { %10350 = vst [vmem:[#allocation75_spill] sm:$0xff] %v9330_v2  ;;  %v5999_v57 = vpop.eup %5998  ;;  %6030 = vrcp.f32 %v10331_v47  ;;  %v9389_v62 = vmul.f32 0.6931472, %v5997_v26 }
 0x2d4   :  { %v6001_v2 = vpop.eup %6000  ;;  %6032 = vrcp.f32 %v10333_v37  ;;  %v9391_v28 = vmul.f32 0.6931472, %v5999_v57 }
 0x2d5   :  { %v9335_v6 = vpop.f32.mrf.mxu0  ;;  %v6003_v15 = vpop.eup %6002  ;;  %6034 = vrcp.f32 %v10335_v40  ;;  %v9366_v40 = vmul.f32 0.6931472, %v5971_v14  ;;  %v9382_v14 = vmul.f32 0.6931472, %v5993_v33  ;;  %10362 = vst [vmem:[#allocation42_spill] sm:$0xff] %v9389_v62 }
 0x2d6   :  { %10351 = vst [vmem:[#allocation58_spill] sm:$0xff] %v9335_v6  ;;  %v9338_v46 = vpop.f32.mrf.mxu1  ;;  %v6005_v30 = vpop.eup %6004  ;;  %6036 = vrcp.f32 %v10337_v0  ;;  %10363 = vst [vmem:[#allocation35_spill] sm:$0xff] %v9391_v28  ;;  %v9397_v33 = vmul.f32 0.6931472, %v6003_v15 }
 0x2d7   :  { %10352 = vst [vmem:[#allocation19_spill] sm:$0xff] %v9338_v46  ;;  %v9341_v7 = vpop.f32.mrf.mxu0  ;;  %v6007_v6 = vpop.eup %6006  ;;  %6038 = vrcp.f32 %v10338_v58  ;;  %10360 = vst [vmem:[#allocation41_spill] sm:$0xff] %v9382_v14 }
 0x2d8   :  { %10353 = vst [vmem:[#allocation36_spill] sm:$0xff] %v9341_v7  ;;  %v9344_v35 = vpop.f32.mrf.mxu1  ;;  %v6009_v46 = vpop.eup %6008  ;;  %6040 = vrcp.f32 %v8867_v34  ;;  %10365 = vst [vmem:[#allocation45_spill] sm:$0xff] %v9397_v33  ;;  %v9404_v26 = vmul.f32 0.6931472, %v6007_v6 }
 0x2d9   :  { %10354 = vst [vmem:[#allocation26_spill] sm:$0xff] %v9344_v35  ;;  %v6011_v7 = vpop.eup %6010  ;;  %6042 = vrcp.f32 %v8877_v44  ;;  %v3113_v44 = vadd.f32 %v9174_v10, %v9190_v24  ;;  %v9406_v57 = vmul.f32 0.6931472, %v6009_v46  ;;  %v3107_v10 = vadd.f32 %v9178_v61, %v9194_v13 }
 0x2da   :  { %v6013_v35 = vpop.eup %6012  ;;  %6044 = vrcp.f32 %v8894_v4  ;;  %v9400_v4 = vmul.f32 0.6931472, %v6005_v30  ;;  %v9412_v15 = vmul.f32 0.6931472, %v6011_v7  ;;  %v3125_v61 = vadd.f32 %v9182_v36, %v9198_v1 }
 0x2db   :  { %v9349_v25 = vpop.f32.mrf.mxu0  ;;  %v6015_v37 = vpop.eup %6014  ;;  %6046 = vrcp.f32 %v8904_v49  ;;  %v3292_v24 = vadd.f32 %v9261_v55, %v3113_v44  ;;  %v9414_v30 = vmul.f32 0.6931472, %v6013_v35  ;;  %v3285_v13 = vadd.f32 %v9267_v50, %v3107_v10 }
 0x2dc   :  { %10355 = vst [vmem:[#allocation38_spill] sm:$0xff] %v9349_v25  ;;  %v9352_v5 = vpop.f32.mrf.mxu1  ;;  %v9364_v25 = vmul.f32 0.6931472, %v9292_v31  ;;  %v6017_v0 = vpop.eup %6016  ;;  %v9380_v31 = vmul.f32 0.6931472, %v5991_v11  ;;  %6048 = vlog2.f32 %v8904_v49  ;;  %v3119_v36 = vadd.f32 %v9186_v8, %v9202_v60 }
 0x2dd   :  { %10356 = vst [vmem:[#allocation33_spill] sm:$0xff] %v9352_v5  ;;  %v9355_v52 = vpop.f32.mrf.mxu0  ;;  %v9368_v5 = vmul.f32 0.6931472, %v5975_v38  ;;  %v6019_v58 = vpop.eup %6018  ;;  %v9395_v11 = vmul.f32 0.6931472, %v6001_v2  ;;  %6050 = vlog2.f32 %v9180_v45  ;;  %v3306_v1 = vadd.f32 %v9275_v56, %v3125_v61  ;;  %v10374_v61 = vld [vmem:[#allocation60_spill] sm:$0xff] }
 0x2de   :  { %10357 = vst [vmem:[#allocation84_spill] sm:$0xff] %v9355_v52  ;;  %v9361_v47 = vpop.f32.mrf.mxu1  ;;  %v9371_v52 = vmul.f32 0.6931472, %v5979_v43  ;;  %v6021_v34 = vpop.eup %6020  ;;  %v9387_v43 = vmul.f32 0.6931472, %v5995_v3  ;;  %6052 = vlog2.f32 %v9184_v54  ;;  %v3137_v54 = vadd.f32 %v9192_v18, %v9206_v16 }
 0x2df   :  { %10358 = vst [vmem:[#allocation79_spill] sm:$0xff] %v9361_v47  ;;  %v9378_v47 = vmul.f32 0.6931472, %v5989_v42  ;;  %10364 = vst [vmem:[#allocation4_spill] sm:$0xff] %v9395_v11  ;;  %v9416_v33 = vmul.f32 0.6931472, %v6015_v37  ;;  %v3131_v8 = vadd.f32 %v9196_v17, %v9210_v23  ;;  %v3299_v60 = vadd.f32 %v9285_v32, %v3119_v36 }
 0x2e0   :  { %10361 = vst [vmem:[#allocation3_spill] sm:$0xff] %v9387_v43  ;;  %v9420_v46 = vmul.f32 0.6931472, %v6017_v0  ;;  %v9428_v7 = vmul.f32 0.6931472, %v6019_v58  ;;  %v3471_v58 = vadd.f32 %v9240_v63, %v3292_v24  ;;  %v10371_v63 = vld [vmem:[#allocation2_spill] sm:$0xff]  ;;  %v3463_v24 = vadd.f32 %v9244_v53, %v3285_v13 }
 0x2e1   :  { %10359 = vst [vmem:[#allocation39_spill] sm:$0xff] %v9378_v47  ;;  %v9385_v38 = vpop.f32.mrf.mxu0  ;;  %v6023_v47 = vpop.eup %6022  ;;  %v9430_v35 = vmul.f32 0.6931472, %v6021_v34  ;;  %6054 = vlog2.f32 %v9188_v41  ;;  %vm4068_vm5 = vcmp.lt.s32.totalorder %v10371_v63, 4  ;;  %v3149_v41 = vadd.f32 %v9200_v22, %v9214_v20  ;;  %v10389_v43 = vld [vmem:[#allocation82_spill] sm:$0xff] }
 0x2e2   :  { %v5872_v42 = vpop.f32.mrf.mxu1  ;;  %v6025_v3 = vpop.eup %6024  ;;  %v9432_v37 = vmul.f32 0.6931472, %v6023_v47  ;;  %v3143_v18 = vadd.f32 %v9204_v21, %v9218_v29  ;;  %v3161_v16 = vadd.f32 %v9208_v27, %v9222_v12  ;;  %v3155_v17 = vadd.f32 %v9212_v39, %v9226_v59  ;;  %v10377_v21 = vld [vmem:[#allocation68_spill] sm:$0xff]  ;;  %v10378_v29 = vld [vmem:[#allocation66_spill] sm:$0xff]  ;;  %v10379_v27 = vld [vmem:[#allocation5_spill] sm:$0xff] }
 0x2e3   :  { %v9402_v14 = vpop.f32.mrf.mxu0  ;;  %v6027_v11 = vpop.eup %6026  ;;  %v9439_v45 = vmul.f32 0.6931472, %v6025_v3  ;;  %v3173_v53 = vadd.f32 %v10374_v61, %v9230_v19  ;;  %v10380_v12 = vld [vmem:[#allocation55_spill] sm:$0xff]  ;;  %v10381_v39 = vld [vmem:[#allocation74_spill] sm:$0xff]  ;;  %v10382_v59 = vld [vmem:[#allocation65_spill] sm:$0xff] }
 0x2e4   :  { %v3846_v2 = vpop.f32.mrf.mxu1  ;;  %v6029_v6 = vpop.eup %6028  ;;  %10366 = vst [vmem:[#allocation73_spill] sm:$0xff] %v9432_v37  ;;  %v9447_v47 = vmul.f32 0.6931472, %v6027_v11  ;;  %v3327_v37 = vadd.f32 %v10389_v43, %v3143_v18  ;;  %v10396_v43 = vld [vmem:[#allocation36_spill] sm:$0xff] }
 0x2e5   :  { %v9418_v28 = vpop.f32.mrf.mxu0  ;;  %v9426_v49 = vpop.eup %6030  ;;  %10367 = vst [vmem:[#allocation30_spill] sm:$0xff] %v9439_v45  ;;  %v9449_v10 = vmul.f32 0.6931472, %v6029_v6  ;;  %v9486_v45 = vadd.f32 %v10382_v59, %v10381_v39  ;;  %v10390_v39 = vld [vmem:[#allocation58_spill] sm:$0xff]  ;;  %v3341_v18 = vadd.f32 %v10396_v43, %v3155_v17  ;;  %v10400_v17 = vld [vmem:[#allocation81_spill] sm:$0xff] }
 0x2e6   :  { %v5875_v55 = vpop.f32.mrf.mxu1  ;;  %v9437_v44 = vpop.eup %6032  ;;  %10368 = vst [vmem:[#allocation6_spill] sm:$0xff] %v9447_v47  ;;  %v9482_v47 = vadd.f32 %v10380_v12, %v10379_v27  ;;  %v10388_v27 = vld [vmem:[#allocation17_spill] sm:$0xff]  ;;  %v3348_v59 = vadd.f32 %v10390_v39, %v3161_v16  ;;  %v10397_v16 = vld [vmem:[#allocation12_spill] sm:$0xff] }
 0x2e7   :  { %v9435_v0 = vpop.f32.mrf.mxu0  ;;  %v9445_v34 = vpop.eup %6034  ;;  %10369 = vst [vmem:[#allocation48_spill] sm:$0xff] %v9449_v10  ;;  %v3167_v10 = vadd.f32 %v10378_v29, %v10377_v21  ;;  %v10387_v29 = vld [vmem:[#allocation28_spill] sm:$0xff]  ;;  %v3334_v12 = vadd.f32 %v10388_v27, %v3149_v41  ;;  %v10395_v41 = vld [vmem:[#allocation71_spill] sm:$0xff] }
 0x2e8   :  { %v3858_v50 = vpop.f32.mrf.mxu1  ;;  %v9454_v62 = vpop.eup %6036 }
 0x2e9   :  { %v5816_v3 = vpop.f32.mrf.mxu0  ;;  %10370 = vst [vmem:[#allocation8_spill] sm:$0xff] %v9454_v62  ;;  %v9461_v6 = vpop.eup %6038 }
 0x2ea   :  { %v3692_v56 = vadd.f32 %v5816_v3, %v3471_v58  ;;  %v5878_v11 = vpop.f32.mrf.mxu1  ;;  %10372 = vst [vmem:[#allocation9_spill] sm:$0xff] %v9461_v6  ;;  %v9471_v32 = vpop.eup %6040  ;;  %v10375_v3 = vld [vmem:[#allocation76_spill] sm:$0xff]  ;;  %v3313_v6 = vadd.f32 %v10387_v29, %v3131_v8  ;;  %v10394_v8 = vld [vmem:[#allocation10_spill] sm:$0xff] }
 0x2eb   :  { %v3685_v23 = vpop.f32.mrf.mxu0  ;;  %10373 = vst [vmem:[#allocation11_spill] sm:$0xff] %v9471_v32  ;;  %v3487_v22 = vadd.f32 %v10375_v3, %v3306_v1  ;;  %v9476_v20 = vpop.eup %6042  ;;  %v10383_v32 = vld [vmem:[#allocation85_spill] sm:$0xff] }
 0x2ec   :  { %v3853_v13 = vadd.f32 %v5872_v42, %v3692_v56  ;;  %v3686_v36 = vadd.f32 %v3685_v23, %v3463_v24  ;;  %v3870_v58 = vpop.f32.mrf.mxu1  ;;  %10376 = vst [vmem:[#allocation13_spill] sm:$0xff] %v9476_v20  ;;  %v3320_v19 = vadd.f32 %v10383_v32, %v3137_v54  ;;  %v9489_v56 = vpop.eup %6044  ;;  %v10385_v24 = vld [vmem:[#allocation14_spill] sm:$0xff]  ;;  %v10386_v20 = vld [vmem:[#allocation77_spill] sm:$0xff] }
 0x2ed   :  { %v5819_v42 = vpop.f32.mrf.mxu0  ;;  %10384 = vst [vmem:[#allocation15_spill] sm:$0xff] %v9489_v56  ;;  %v3479_v21 = vadd.f32 %v10386_v20, %v3299_v60  ;;  %v9497_v54 = vpop.eup %6046  ;;  %v10391_v56 = vld [vmem:[#allocation16_spill] sm:$0xff]  ;;  %v10393_v60 = vld [vmem:[#allocation69_spill] sm:$0xff] }
 0x2ee   :  { %v3957_v1 = vmul.f32 %v10385_v24, %v3853_v13  ;;  %v3847_v23 = vadd.f32 %v3846_v2, %v3686_v36  ;;  %v3704_v61 = vadd.f32 %v5819_v42, %v3487_v22  ;;  %v5881_v3 = vpop.f32.mrf.mxu1  ;;  %v10392_v42 = vld [vmem:[#allocation7_spill] sm:$0xff]  ;;  %v9507_v24 = vadd.f32 %v10395_v41, %v10394_v8  ;;  %v9511_v39 = vpop.eup %6048 }
 0x2ef   :  { %v3697_v62 = vpop.f32.mrf.mxu0  ;;  %v9503_v20 = vadd.f32 %v10393_v60, %v10392_v42  ;;  %v3503_v29 = vadd.f32 %v10397_v16, %v3320_v19  ;;  %v10399_v42 = vld [vmem:[#allocation78_spill] sm:$0xff]  ;;  %v3519_v41 = vadd.f32 %v10400_v17, %v3334_v12  ;;  %v10401_v19 = vld [vmem:[#allocation83_spill] sm:$0xff]  ;;  %v10404_v12 = vld [vmem:[#allocation72_spill] sm:$0xff] }
 0x2f0   :  { %v4005_v32 = vsub.f32 %v3957_v1, %v9358_v9  ;;  %v3956_v13 = vmul.f32 %v10391_v56, %v3847_v23  ;;  %v3865_v2 = vadd.f32 %v5875_v55, %v3704_v61  ;;  %v3698_v36 = vadd.f32 %v3697_v62, %v3479_v21  ;;  %v3882_v22 = vpop.f32.mrf.mxu1  ;;  %v10398_v55 = vld [vmem:[#allocation21_spill] sm:$0xff]  ;;  %v9516_v61 = vpop.eup %6050 }
 0x2f1   :  { %v5822_v27 = vpop.f32.mrf.mxu0  ;;  %v3495_v60 = vadd.f32 %v10399_v42, %v3313_v6  ;;  %v3511_v43 = vadd.f32 %v10401_v19, %v3327_v37  ;;  %v9521_v16 = vpop.eup %6052  ;;  %v3527_v42 = vadd.f32 %v10404_v12, %v3341_v18 }
 0x2f2   :  { %v4053_v9 = vadd.f32 %v9400_v4, %v4005_v32  ;;  %v4004_v62 = vsub.f32 %v3956_v13, %v9364_v25  ;;  %v3959_v56 = vmul.f32 %v10398_v55, %v3865_v2  ;;  %v3859_v1 = vadd.f32 %v3858_v50, %v3698_v36  ;;  %v5884_v23 = vpop.f32.mrf.mxu1  ;;  %v10402_v32 = vld [vmem:[#allocation25_spill] sm:$0xff]  ;;  %v9530_v37 = vpop.eup %6054 }
 0x2f3   :  { %v3716_v21 = vadd.f32 %v5822_v27, %v3503_v29  ;;  %v3709_v8 = vpop.f32.mrf.mxu0  ;;  %v10403_v2 = vld [vmem:[#allocation61_spill] sm:$0xff] }
 0x2f4   :  { %v4052_v4 = vadd.f32 %v9404_v26, %v4004_v62  ;;  %v4007_v25 = vsub.f32 %v3959_v56, %v9366_v40  ;;  %v3958_v13 = vmul.f32 %v10402_v32, %v3859_v1  ;;  %v3894_v50 = vpop.f32.mrf.mxu1  ;;  %v3535_v36 = vadd.f32 %v10403_v2, %v3348_v59  ;;  %v10405_v59 = vld [vmem:[#allocation38_spill] sm:$0xff] }
 0x2f5   :  { %v4070_v29 = vsel %vm4068_vm5, %v4053_v9, 0.0  ;;  %v3877_v6 = vadd.f32 %v5878_v11, %v3716_v21  ;;  %v3710_v27 = vadd.f32 %v3709_v8, %v3495_v60  ;;  %v5825_v55 = vpop.f32.mrf.mxu0  ;;  %v3362_v17 = vadd.f32 %v10405_v59, %v3173_v53  ;;  %v10406_v9 = vld [vmem:[#allocation80_spill] sm:$0xff]  ;;  %v10408_v53 = vld [vmem:[#allocation23_spill] sm:$0xff] }
 0x2f6   :  { %v4069_v26 = vsel %vm4068_vm5, %v4052_v4, 0.0  ;;  %v4055_v40 = vadd.f32 %v9406_v57, %v4007_v25  ;;  %v4006_v62 = vsub.f32 %v3958_v13, %v9368_v5  ;;  %v3728_v56 = vadd.f32 %v5825_v55, %v3519_v41  ;;  %v5887_v1 = vpop.f32.mrf.mxu1  ;;  %v10407_v8 = vld [vmem:[#allocation84_spill] sm:$0xff]  ;;  %v10409_v13 = vld [vmem:[#allocation29_spill] sm:$0xff]  ;;  %v10411_v59 = vld [vmem:[#allocation75_spill] sm:$0xff] }
 0x2f7   :  { %v4085_v19 = vadd.f32 %v4070_v29, %v4069_v26  ;;  %v3961_v11 = vmul.f32 %v10406_v9, %v3877_v6  ;;  %v3871_v21 = vadd.f32 %v3870_v58, %v3710_v27  ;;  %v3721_v60 = vpop.f32.mrf.mxu0  ;;  %v3355_v18 = vadd.f32 %v10407_v8, %v3167_v10 }
 0x2f8   :  { %v4054_v32 = vadd.f32 %v9412_v15, %v4006_v62  ;;  %v3889_v2 = vadd.f32 %v5881_v3, %v3728_v56  ;;  %v3722_v12 = vadd.f32 %v3721_v60, %v3511_v43  ;;  %v3376_v57 = vadd.f32 %v9385_v38, %v9482_v47  ;;  %v3906_v15 = vpop.f32.mrf.mxu1  ;;  %v10410_v62 = vld [vmem:[#allocation32_spill] sm:$0xff] }
 0x2f9   :  { %v3369_v5 = vadd.f32 %v9402_v14, %v9486_v45  ;;  %v4009_v41 = vsub.f32 %v3961_v11, %v9371_v52  ;;  %v3960_v4 = vmul.f32 %v10408_v53, %v3871_v21  ;;  %v5828_v25 = vpop.f32.mrf.mxu0  ;;  %v4072_v43 = vsel %vm4068_vm5, %v4055_v40, 0.0 }
 0x2fa   :  { %v4071_v58 = vsel %vm4068_vm5, %v4054_v32, 0.0  ;;  %v3963_v10 = vmul.f32 %v10409_v13, %v3889_v2  ;;  %v3883_v29 = vadd.f32 %v3882_v22, %v3722_v12  ;;  %v3740_v3 = vadd.f32 %v5828_v25, %v3535_v36  ;;  %v5890_v11 = vpop.f32.mrf.mxu1  ;;  %v10416_v25 = vld [vmem:[#allocation8_spill] sm:$0xff] }
 0x2fb   :  { %v4086_v38 = vadd.f32 %v4085_v19, %v4071_v58  ;;  %v4057_v47 = vadd.f32 %v9414_v30, %v4009_v41  ;;  %v4008_v14 = vsub.f32 %v3960_v4, %v9373_v48  ;;  %v3733_v52 = vpop.f32.mrf.mxu0  ;;  %v3551_v36 = vadd.f32 %v10410_v62, %v3362_v17  ;;  %v10412_v30 = vld [vmem:[#allocation39_spill] sm:$0xff] }
 0x2fc   :  { %v4011_v45 = vsub.f32 %v3963_v10, %v9375_v51  ;;  %v3962_v6 = vmul.f32 %v9426_v49, %v3883_v29  ;;  %v3901_v27 = vadd.f32 %v5884_v23, %v3740_v3  ;;  %v3734_v55 = vadd.f32 %v3733_v52, %v3527_v42  ;;  %v10413_v17 = vld [vmem:[#allocation19_spill] sm:$0xff]  ;;  %v3918_v53 = vpop.f32.mrf.mxu1  ;;  %v10417_v3 = vld [vmem:[#allocation33_spill] sm:$0xff] }
 0x2fd   :  { %v4056_v26 = vadd.f32 %v9416_v33, %v4008_v14  ;;  %v4087_v22 = vadd.f32 %v4086_v38, %v4072_v43  ;;  %v5831_v56 = vpop.f32.mrf.mxu0  ;;  %v3543_v40 = vadd.f32 %v10411_v59, %v3355_v18  ;;  %v3390_v49 = vadd.f32 %v9418_v28, %v9503_v20  ;;  %v10414_v18 = vld [vmem:[#allocation26_spill] sm:$0xff]  ;;  %v10419_v14 = vld [vmem:[#allocation3_spill] sm:$0xff] }
 0x2fe   :  { %v4059_v19 = vadd.f32 %v9420_v46, %v4011_v45  ;;  %v4010_v9 = vsub.f32 %v3962_v6, %v10412_v30  ;;  %v3965_v48 = vmul.f32 %v9437_v44, %v3901_v27  ;;  %v3895_v51 = vadd.f32 %v3894_v50, %v3734_v55  ;;  %v10420_v45 = vld [vmem:[#allocation9_spill] sm:$0xff]  ;;  %v5893_v27 = vpop.f32.mrf.mxu1  ;;  %v10421_v55 = vld [vmem:[#allocation11_spill] sm:$0xff]  ;;  %v10423_v59 = vld [vmem:[#allocation42_spill] sm:$0xff] }
 0x2ff   :  { %v4073_v33 = vsel %vm4068_vm5, %v4056_v26, 0.0  ;;  %v3752_v23 = vadd.f32 %v5831_v56, %v3551_v36  ;;  %v3745_v42 = vpop.f32.mrf.mxu0  ;;  %v3567_v21 = vadd.f32 %v10413_v17, %v3376_v57  ;;  %v3559_v32 = vadd.f32 %v10414_v18, %v3369_v5  ;;  %v10415_v5 = vld [vmem:[#allocation41_spill] sm:$0xff]  ;;  %v10422_v36 = vld [vmem:[#allocation30_spill] sm:$0xff] }
 0x300   :  { %v4088_v60 = vadd.f32 %v4087_v22, %v4073_v33  ;;  %v4058_v8 = vadd.f32 %v9428_v7, %v4010_v9  ;;  %v4013_v46 = vsub.f32 %v3965_v48, %v9380_v31  ;;  %v4074_v44 = vsel %vm4068_vm5, %v4057_v47, 0.0  ;;  %v3930_v18 = vpop.f32.mrf.mxu1 }
 0x301   :  { %v3964_v50 = vmul.f32 %v9445_v34, %v3895_v51  ;;  %v3913_v28 = vadd.f32 %v5887_v1, %v3752_v23  ;;  %v3746_v20 = vadd.f32 %v3745_v42, %v3543_v40  ;;  %v5834_v2 = vpop.f32.mrf.mxu0  ;;  %v3383_v31 = vadd.f32 %v9435_v0, %v9507_v24 }
 0x302   :  { %v4075_v12 = vsel %vm4068_vm5, %v4058_v8, 0.0  ;;  %v4089_v41 = vadd.f32 %v4088_v60, %v4074_v44  ;;  %v4061_v57 = vadd.f32 %v9430_v35, %v4013_v46  ;;  %v3764_v7 = vadd.f32 %v5834_v2, %v3567_v21  ;;  %v10418_v35 = vld [vmem:[#allocation73_spill] sm:$0xff]  ;;  %v10427_v21 = vld [vmem:[#allocation6_spill] sm:$0xff] }
 0x303   :  { %v4012_v4 = vsub.f32 %v3964_v50, %v10415_v5  ;;  %v3967_v58 = vmul.f32 %v10416_v25, %v3913_v28  ;;  %v3907_v13 = vadd.f32 %v3906_v15, %v3746_v20  ;;  %v3757_v34 = vpop.f32.mrf.mxu0  ;;  %v3583_v43 = vadd.f32 %v10417_v3, %v3390_v49  ;;  %v10426_v49 = vld [vmem:[#allocation13_spill] sm:$0xff]  ;;  %v10429_v50 = vld [vmem:[#allocation4_spill] sm:$0xff]  ;;  %v10430_v20 = vld [vmem:[#allocation15_spill] sm:$0xff] }
 0x304   :  { %v4090_v1 = vadd.f32 %v4089_v41, %v4075_v12  ;;  %v3925_v10 = vadd.f32 %v5890_v11, %v3764_v7  ;;  %v3758_v29 = vadd.f32 %v3757_v34, %v3559_v32  ;;  %v4076_v38 = vsel %vm4068_vm5, %v4059_v19, 0.0  ;;  %v10424_v19 = vld [vmem:[#allocation79_spill] sm:$0xff]  ;;  %v10428_v32 = vld [vmem:[#allocation48_spill] sm:$0xff] }
 0x305   :  { %v4060_v47 = vadd.f32 %v10418_v35, %v4012_v4  ;;  %v4015_v52 = vsub.f32 %v3967_v58, %v10419_v14  ;;  %v3966_v0 = vmul.f32 %v10420_v45, %v3907_v13  ;;  %v5837_v24 = vpop.f32.mrf.mxu0  ;;  %v3575_v30 = vadd.f32 %v10424_v19, %v3383_v31  ;;  %v10425_v11 = vld [vmem:[#allocation35_spill] sm:$0xff] }
 0x306   :  { %v4091_v6 = vadd.f32 %v4090_v1, %v4076_v38  ;;  %v3969_v15 = vmul.f32 %v10421_v55, %v3925_v10  ;;  %v3919_v26 = vadd.f32 %v3918_v53, %v3758_v29  ;;  %v3776_v22 = vadd.f32 %v5837_v24, %v3583_v43  ;;  %v10432_v24 = vld [vmem:[#allocation86_spill] sm:$0xff] }
 0x307   :  { %v4077_v62 = vsel %vm4068_vm5, %v4060_v47, 0.0  ;;  %v4063_v56 = vadd.f32 %v10422_v36, %v4015_v52  ;;  %v4014_v40 = vsub.f32 %v3966_v0, %v10423_v59  ;;  %v3769_v9 = vpop.f32.mrf.mxu0  ;;  %v4045_v42 = vmul.f32 0.6931472, %v9516_v61 }
 0x308   :  { %v4092_v48 = vadd.f32 %v4091_v6, %v4077_v62  ;;  %v4017_v51 = vsub.f32 %v3969_v15, %v10425_v11  ;;  %v3968_v33 = vmul.f32 %v10426_v49, %v3919_v26  ;;  %v3937_v23 = vadd.f32 %v5893_v27, %v3776_v22 }
 0x309   :  { %v4078_v17 = vsel %vm4068_vm5, %v4061_v57, 0.0  ;;  %v4062_v60 = vadd.f32 %v10427_v21, %v4014_v40  ;;  %v3770_v8 = vadd.f32 %v3769_v9, %v3575_v30  ;;  %v4051_v61 = vmul.f32 0.6931472, %v9521_v16  ;;  %v10431_v57 = vld [vmem:[#allocation45_spill] sm:$0xff] }
 0x30a   :  { %v4093_v46 = vadd.f32 %v4092_v48, %v4078_v17  ;;  %v4065_v44 = vadd.f32 %v10428_v32, %v4017_v51  ;;  %v4016_v28 = vsub.f32 %v3968_v33, %v10429_v50  ;;  %v3971_v2 = vmul.f32 %v10430_v20, %v3937_v23 }
 0x30b   :  { %v4079_v12 = vsel %vm4068_vm5, %v4062_v60, 0.0  ;;  %v3931_v41 = vadd.f32 %v3930_v18, %v3770_v8  ;;  %v4001_v5 = vmul.f32 0.6931472, %v9511_v39  ;;  %v4080_v4 = vsel %vm4068_vm5, %v4063_v56, 0.0 }
 0x30c   :  { %v4094_v53 = vadd.f32 %v4093_v46, %v4079_v12  ;;  %v4064_v7 = vadd.f32 %v4045_v42, %v4016_v28  ;;  %v4019_v31 = vsub.f32 %v3971_v2, %v10431_v57  ;;  %v4049_v1 = vmul.f32 0.6931472, %v9530_v37 }
 0x30d   :  { %v3970_v25 = vmul.f32 %v9497_v54, %v3931_v41  ;;  %v4082_v29 = vsel %vm4068_vm5, %v4065_v44, 0.0  ;;  %v4139_v6 = vrot.slane %v10432_v24, 4 }
 0x30e   :  { %v4081_v58 = vsel %vm4068_vm5, %v4064_v7, 0.0  ;;  %v4095_v13 = vadd.f32 %v4094_v53, %v4080_v4  ;;  %v4067_v34 = vadd.f32 %v4051_v61, %v4019_v31 }
 0x30f   :  { %v4018_v10 = vsub.f32 %v3970_v25, %v4001_v5  ;;  %v4140_v27 = vadd.f32 %v4139_v6, %v10432_v24 }
 0x310   :  { %v4096_v16 = vadd.f32 %v4095_v13, %v4081_v58  ;;  %v4084_v54 = vsel %vm4068_vm5, %v4067_v34, 0.0 }
 0x311   :  { %v4066_v3 = vadd.f32 %v4049_v1, %v4018_v10  ;;  %v4141_v55 = vrot.slane %v4140_v27, 2 }
 0x312   :  { %v4097_v43 = vadd.f32 %v4096_v16, %v4082_v29 }
 0x313   :  { %v4083_v39 = vsel %vm4068_vm5, %v4066_v3, 0.0  ;;  %v4142_v15 = vadd.f32 %v4141_v55, %v4140_v27 }
 0x314   :  { %v4098_v38 = vadd.f32 %v4097_v43, %v4083_v39 }
 0x315   :  { %v4143_v26 = vrot.slane %v4142_v15, 1 }
 0x316   :  { %v4099_v35 = vadd.f32 %v4098_v38, %v4084_v54 }
 0x317   :  { %v4144_v22 = vadd.f32 %v4143_v26, %v4142_v15 }
 0x318   :  { %v4100_v47 = vrot.slane %v4099_v35, 4 }
 0x319   :  { %v4145_v62 = vmul.f32 4.0, %v4144_v22 }
 0x31a   :  { %v4101_v14 = vadd.f32 %v4100_v47, %v4099_v35 }
 0x31c   :  { %v4102_v52 = vrot.slane %v4101_v14, 2 }
 0x31e   :  { %v4103_v45 = vadd.f32 %v4102_v52, %v4101_v14 }
 0x320   :  { %v4104_v37 = vrot.slane %v4103_v45, 1 }
 0x322   :  { %v4105_v0 = vadd.f32 %v4104_v37, %v4103_v45 }
 0x324   :  { %4106 = vadd.xlane.f32.xlu0 %v4105_v0 }
 0x3ad   :  { %v4107_v36 = vpop.xlane.xlu0 %4106 }
 0x3ae   :  { %v4146_v63 = vadd.f32 %v4145_v62, %v4107_v36 }
 0x3b0   :  { %4149 = vst [vmem:[%s9624_s2] sm:$0xff] %v4146_v63 }

</bundles_post_ra>
